<compile_context>
chip_gen: v7x
topology: tpu7x:2x2x1
jax: 0.10.0
libtpu: 0.0.40
codegen_flags: <defaults>
</compile_context>

<pallas_src>
import numpy as np
import jax
import jax.numpy as jnp
from jax.experimental import pallas as pl
from jax.experimental.pallas import tpu as pltpu


def hfam_kernel(x_ref,
                w23_ref, w24_ref, brc_ref,
                w26_ref, b26_ref,
                wc_ref, w3b_ref, b3_ref,
                out_ref,
                rowpad_ref, colpad_ref, ypad_ref):
    x = x_ref[0]                               # (H, W, C) f32, this batch element
    H, W, C = x.shape

    # ---- pool3 / pool4 ------------------------------------------------------
    p3 = jnp.mean(x, axis=0)                   # (W, C)  mean over H
    p4 = jnp.mean(x, axis=1)                   # (H, C)  mean over W

    # ---- conv2_3: (1,3) conv along W (pad 1), BN scale folded ---------------
    zrow = jnp.zeros((1, C), jnp.float32)
    rowpad_ref[0:1, :] = zrow                  # re-zero halo only
    rowpad_ref[W + 1:W + 2, :] = zrow
    rowpad_ref[pl.ds(1, W), :] = p3
    rp = rowpad_ref[...]                       # (W+2, C)
    rslab = jnp.concatenate([rp[0:W], rp[1:W + 1], rp[2:W + 2]], axis=-1)   # (W, 3C)
    r = jnp.dot(rslab, w23_ref[...], preferred_element_type=jnp.float32)    # (W, C)

    # ---- conv2_4: (3,1) conv along H (pad 1), BN scale folded ---------------
    colpad_ref[0:1, :] = zrow
    colpad_ref[H + 1:H + 2, :] = zrow
    colpad_ref[pl.ds(1, H), :] = p4
    cp = colpad_ref[...]                       # (H+2, C)
    cslab = jnp.concatenate([cp[0:H], cp[1:H + 1], cp[2:H + 2]], axis=-1)   # (H, 3C)
    c = jnp.dot(cslab, w24_ref[...], preferred_element_type=jnp.float32)    # (H, C)

    # ---- bilinear upsample from size-1 axes == broadcast; relu_(x2_5 + x2_4)
    # Combined BN biases (b23 + b24) are added once here.
    y = jnp.maximum(r[None, :, :] + c[:, None, :] + brc_ref[...].reshape(1, 1, C),
                    0.0)                                                    # (H, W, C)

    # ---- conv2_6: 3x3 conv (pad 1) + BN + ReLU, as one im2col matmul (K=9C) -
    ypad_ref[0:1, :, :] = jnp.zeros((1, W + 2, C), jnp.float32)
    ypad_ref[H + 1:H + 2, :, :] = jnp.zeros((1, W + 2, C), jnp.float32)
    ypad_ref[:, 0:1, :] = jnp.zeros((H + 2, 1, C), jnp.float32)
    ypad_ref[:, W + 1:W + 2, :] = jnp.zeros((H + 2, 1, C), jnp.float32)
    ypad_ref[pl.ds(1, H), pl.ds(1, W), :] = y
    yp = ypad_ref[...]                         # (H+2, W+2, C)
    taps = [yp[kh:kh + H, kw:kw + W, :].reshape(H * W, C)
            for kh in range(3) for kw in range(3)]
    slab = jnp.concatenate(taps, axis=-1).astype(jnp.bfloat16)              # (H*W, 9C)
    acc = jnp.dot(slab, w26_ref[...], preferred_element_type=jnp.float32)   # (H*W, C)
    x2 = jnp.maximum(acc + b26_ref[...], 0.0)

    # ---- conv3 on cat([x0, x2]) + BN + relu_ (Dropout eval = identity) ------
    # x0 = STViT-stub(x); the stub projection and conv3's x0 branch were folded
    # on the host into wc = wstub @ (w3a * bn3_scale), shape (C, 256).
    x2d = x.reshape(H * W, C).astype(jnp.bfloat16)
    o = (jnp.dot(x2d, wc_ref[...], preferred_element_type=jnp.float32)
         + jnp.dot(x2.astype(jnp.bfloat16), w3b_ref[...],
                   preferred_element_type=jnp.float32))
    out_ref[0] = jnp.maximum(o + b3_ref[...], 0.0)                          # (H*W, 256)


def hfam_forward_nhwc(x_nhwc, kernel_params):
    (w23f, w24f, brc, w26f, b26v, wc, w3bf, b3v) = kernel_params
    N, H, W, C = x_nhwc.shape
    out_flat = pl.pallas_call(
        hfam_kernel,
        out_shape=jax.ShapeDtypeStruct((N, H * W, 256), jnp.float32),
        grid_spec=pltpu.PrefetchScalarGridSpec(
            num_scalar_prefetch=0,
            grid=(N,),
            in_specs=[
                pl.BlockSpec((1, H, W, C), lambda b: (b, 0, 0, 0)),   # x (NHWC)
                pl.BlockSpec((3 * C, C), lambda b: (0, 0)),           # conv2_3 (im2col, BN folded)
                pl.BlockSpec((3 * C, C), lambda b: (0, 0)),           # conv2_4 (im2col, BN folded)
                pl.BlockSpec((1, C), lambda b: (0, 0)),               # b23 + b24
                pl.BlockSpec((9 * C, C), lambda b: (0, 0)),           # conv2_6 (im2col, bf16)
                pl.BlockSpec((1, C), lambda b: (0, 0)),               # b26
                pl.BlockSpec((C, 256), lambda b: (0, 0)),             # wstub @ (w3a*s3)  (bf16)
                pl.BlockSpec((C, 256), lambda b: (0, 0)),             # w3b * s3          (bf16)
                pl.BlockSpec((1, 256), lambda b: (0, 0)),             # b3
            ],
            out_specs=pl.BlockSpec((1, H * W, 256), lambda b: (b, 0, 0)),
            scratch_shapes=[
                pltpu.VMEM((W + 2, C), jnp.float32),        # padded pooled row
                pltpu.VMEM((H + 2, C), jnp.float32),        # padded pooled col
                pltpu.VMEM((H + 2, W + 2, C), jnp.float32), # padded y for 3x3 conv
            ]),
        compiler_params=pltpu.CompilerParams(
            dimension_semantics=("parallel",)),             # batch-parallel (v7x: 2 TCs)
    )(x_nhwc.astype(jnp.float32),
      w23f, w24f, brc, w26f, b26v, wc, w3bf, b3v)
    return out_flat.reshape(N, H, W, 256)


def hfam_forward(x_nchw, kernel_params):
    """NCHW compatibility wrapper (the PyTorch module is NCHW)."""
    out = hfam_forward_nhwc(jnp.transpose(x_nchw, (0, 2, 3, 1)), kernel_params)
    return jnp.transpose(out, (0, 3, 1, 2))


def init_params(key, C):
    """Raw synthetic parameters matching HFAM._initialize_weights (eval BN)."""
    ks = jax.random.split(key, 5)
    eps = 1e-5

    def conv_w(k, kh, kw, cin, cout):
        n = kh * kw * cout
        return (jax.random.normal(k, (kh, kw, cin, cout), jnp.float32)
                * np.sqrt(2.0 / n))

    def bn(c):
        # eval-mode affine of a freshly initialised BN:
        # gamma=1, beta=0, running_mean=0, running_var=1
        scale = jnp.full((c,), 1.0 / np.sqrt(1.0 + eps), jnp.float32)
        bias = jnp.zeros((c,), jnp.float32)
        return scale, bias

    w23 = conv_w(ks[0], 1, 3, C, C)[0]          # (3, C, C)    [kw, cin, cout]
    w24 = conv_w(ks[1], 3, 1, C, C)[:, 0]       # (3, C, C)    [kh, cin, cout]
    w26 = conv_w(ks[2], 3, 3, C, C)             # (3, 3, C, C) [kh, kw, cin, cout]
    # TODO(synk): GIE.STViT pretrained backbone (x0 path, loaded from
    # ./module/stvit-base-384.pth) has no clean Pallas equivalent; it is
    # replaced by a deterministic 1x1 projection of x to 384 channels.
    wstub = jax.random.normal(ks[3], (C, 384), jnp.float32) * 0.02
    w3 = conv_w(ks[4], 1, 1, 384 + C, 256)[0, 0]   # (384+C, 256)
    w3a, w3b = w3[:384], w3[384:]
    return (w23, bn(C), w24, bn(C), w26, bn(C), wstub, w3a, w3b, bn(256))


def fold_params(raw):
    """Host-side algebraic folding: BN scales into conv weights, im2col weight
    reshapes, and (STViT-stub @ conv3 x0-branch) into a single (C,256) matrix."""
    (w23, (s23, b23), w24, (s24, b24), w26, (s26, b26),
     wstub, w3a, w3b, (s3, b3)) = raw
    C = w23.shape[1]
    w23f = (w23 * s23[None, None, :]).reshape(3 * C, C)
    w24f = (w24 * s24[None, None, :]).reshape(3 * C, C)
    brc = (b23 + b24).reshape(1, C)
    w26f = (w26 * s26[None, None, None, :]).reshape(9 * C, C).astype(jnp.bfloat16)
    b26v = b26.reshape(1, C)
    wc = (wstub @ (w3a * s3[None, :])).astype(jnp.bfloat16)   # (C, 256)
    w3bf = (w3b * s3[None, :]).astype(jnp.bfloat16)           # (C, 256)
    b3v = b3.reshape(1, 256)
    return (w23f, w24f, brc, w26f, b26v, wc, w3bf, b3v)


def reference_forward_nhwc(x, raw):
    """Pure-JAX f32 reference with the unfused module math, for verification."""
    (w23, (s23, b23), w24, (s24, b24), w26, (s26, b26),
     wstub, w3a, w3b, (s3, b3)) = raw
    N, H, W, C = x.shape
    p3 = x.mean(axis=1)   # (N, W, C)   pool3: mean over H
    p4 = x.mean(axis=2)   # (N, H, C)   pool4: mean over W

    def conv1d(p, w, s, b):
        L = p.shape[1]
        pp = jnp.pad(p, ((0, 0), (1, 1), (0, 0)))
        out = sum(jnp.einsum('nlc,cd->nld', pp[:, k:k + L], w[k]) for k in range(3))
        return out * s + b

    r = conv1d(p3, w23, s23, b23)     # (N, W, C)
    c = conv1d(p4, w24, s24, b24)     # (N, H, C)
    y = jax.nn.relu(r[:, None, :, :] + c[:, :, None, :])    # (N, H, W, C)
    yp = jnp.pad(y, ((0, 0), (1, 1), (1, 1), (0, 0)))
    conv = sum(jnp.einsum('nhwc,cd->nhwd', yp[:, kh:kh + H, kw:kw + W], w26[kh, kw])
               for kh in range(3) for kw in range(3))
    x2 = jax.nn.relu(conv * s26 + b26)
    x0 = jnp.einsum('nhwc,cd->nhwd', x, wstub)               # STViT stub
    o = (jnp.einsum('nhwc,cd->nhwd', x0, w3a)
         + jnp.einsum('nhwc,cd->nhwd', x2, w3b))
    return jax.nn.relu(o * s3 + b3)


if __name__ == "__main__":
    key = jax.random.PRNGKey(0)
    N, C, H, W = 2, 32, 16, 16        # module default in_channels=32, small spatial
    kx, kp = jax.random.split(key)
    # NHWC at the API boundary (same tensor as the module's NCHW (N, C, H, W)
    # input up to layout); avoids paying transpose passes around the kernel.
    x_nhwc = jax.random.normal(kx, (N, H, W, C), jnp.float32)

    raw = init_params(kp, C)
    kparams = fold_params(raw)

    out = hfam_forward_nhwc(x_nhwc, kparams)
    out = jax.block_until_ready(out)
    assert out.shape == (N, H, W, 256), out.shape

    ref = reference_forward_nhwc(x_nhwc, raw)
    # Kernel uses bf16 MXU operands for the two big matmuls; reference is f32.
    np.testing.assert_allclose(np.asarray(out), np.asarray(ref),
                               rtol=5e-2, atol=5e-2)
    print("KERNEL_OK")
</pallas_src>

<mosaic_0001>
module attributes {stable_mosaic.version = 11 : i64} {
  func.func @hfam_kernel(%arg0: i32, %arg1: memref<1x16x16x32xf32, #tpu.memory_space<vmem>>, %arg2: memref<96x32xf32, #tpu.memory_space<vmem>>, %arg3: memref<96x32xf32, #tpu.memory_space<vmem>>, %arg4: memref<1x32xf32, #tpu.memory_space<vmem>>, %arg5: memref<288x32xbf16, #tpu.memory_space<vmem>>, %arg6: memref<1x32xf32, #tpu.memory_space<vmem>>, %arg7: memref<32x256xbf16, #tpu.memory_space<vmem>>, %arg8: memref<32x256xbf16, #tpu.memory_space<vmem>>, %arg9: memref<1x256xf32, #tpu.memory_space<vmem>>, %arg10: memref<1x256x256xf32, #tpu.memory_space<vmem>>, %arg11: memref<18x32xf32, #tpu.memory_space<vmem>>, %arg12: memref<18x32xf32, #tpu.memory_space<vmem>>, %arg13: memref<18x18x32xf32, #tpu.memory_space<vmem>>) attributes {dimension_semantics = [#tpu.dimension_semantics<parallel>], iteration_bounds = array<i64: 2>, scalar_prefetch = 0 : i64, scratch_operands = 3 : i64, tpu.core_type = #tpu.core_type<tc>, window_params = [{transform_indices = @transform_0, window_bounds = array<i64: 1, 16, 16, 32>}, {pipeline_mode = #tpu.pipeline_mode<synchronous>, transform_indices = @transform_1, window_bounds = array<i64: 96, 32>}, {pipeline_mode = #tpu.pipeline_mode<synchronous>, transform_indices = @transform_2, window_bounds = array<i64: 96, 32>}, {pipeline_mode = #tpu.pipeline_mode<synchronous>, transform_indices = @transform_3, window_bounds = array<i64: 1, 32>}, {pipeline_mode = #tpu.pipeline_mode<synchronous>, transform_indices = @transform_4, window_bounds = array<i64: 288, 32>}, {pipeline_mode = #tpu.pipeline_mode<synchronous>, transform_indices = @transform_5, window_bounds = array<i64: 1, 32>}, {pipeline_mode = #tpu.pipeline_mode<synchronous>, transform_indices = @transform_6, window_bounds = array<i64: 32, 256>}, {pipeline_mode = #tpu.pipeline_mode<synchronous>, transform_indices = @transform_7, window_bounds = array<i64: 32, 256>}, {pipeline_mode = #tpu.pipeline_mode<synchronous>, transform_indices = @transform_8, window_bounds = array<i64: 1, 256>}, {transform_indices = @transform_9, window_bounds = array<i64: 1, 256, 256>}]} {
    %c0 = arith.constant 0 : index
    %c0_0 = arith.constant 0 : index
    %c0_1 = arith.constant 0 : index
    %c0_2 = arith.constant 0 : index
    %0 = vector.load %arg1[%c0, %c0_0, %c0_1, %c0_2] : memref<1x16x16x32xf32, #tpu.memory_space<vmem>>, vector<1x16x16x32xf32>
    %1 = vector.shape_cast %0 : vector<1x16x16x32xf32> to vector<16x16x32xf32>
    %cst = arith.constant dense<0.000000e+00> : vector<16x32xf32>
    %2 = vector.multi_reduction <add>, %1, %cst [0] : vector<16x16x32xf32> to vector<16x32xf32>
    %cst_3 = arith.constant 1.600000e+01 : f32
    %3 = vector.broadcast %cst_3 : f32 to vector<16x32xf32>
    %4 = arith.divf %2, %3 : vector<16x32xf32>
    %cst_4 = arith.constant dense<0.000000e+00> : vector<16x32xf32>
    %5 = vector.multi_reduction <add>, %1, %cst_4 [1] : vector<16x16x32xf32> to vector<16x32xf32>
    %cst_5 = arith.constant 1.600000e+01 : f32
    %6 = vector.broadcast %cst_5 : f32 to vector<16x32xf32>
    %7 = arith.divf %5, %6 : vector<16x32xf32>
    %cst_6 = arith.constant 0.000000e+00 : f32
    %8 = vector.broadcast %cst_6 : f32 to vector<1x32xf32>
    %c0_7 = arith.constant 0 : index
    %c0_8 = arith.constant 0 : index
    %9 = vector.load %arg11[%c0_7, %c0_8] : memref<18x32xf32, #tpu.memory_space<vmem>>, vector<1x32xf32>
    tpu.vector_store %arg11[%c0_7, %c0_8], %8 {strides = array<i32>} : memref<18x32xf32, #tpu.memory_space<vmem>>, vector<1x32xf32>,
    %c17 = arith.constant 17 : index
    %c0_9 = arith.constant 0 : index
    %10 = vector.load %arg11[%c17, %c0_9] : memref<18x32xf32, #tpu.memory_space<vmem>>, vector<1x32xf32>
    tpu.vector_store %arg11[%c17, %c0_9], %8 {strides = array<i32>} : memref<18x32xf32, #tpu.memory_space<vmem>>, vector<1x32xf32>,
    %c1 = arith.constant 1 : index
    %c0_10 = arith.constant 0 : index
    %11 = vector.load %arg11[%c1, %c0_10] : memref<18x32xf32, #tpu.memory_space<vmem>>, vector<16x32xf32>
    tpu.vector_store %arg11[%c1, %c0_10], %4 {strides = array<i32>} : memref<18x32xf32, #tpu.memory_space<vmem>>, vector<16x32xf32>,
    %c0_11 = arith.constant 0 : index
    %c0_12 = arith.constant 0 : index
    %12 = vector.load %arg11[%c0_11, %c0_12] : memref<18x32xf32, #tpu.memory_space<vmem>>, vector<18x32xf32>
    %13 = vector.extract_strided_slice %12 {offsets = [0, 0], sizes = [16, 32], strides = [1, 1]} : vector<18x32xf32> to vector<16x32xf32>
    %14 = vector.extract_strided_slice %12 {offsets = [1, 0], sizes = [16, 32], strides = [1, 1]} : vector<18x32xf32> to vector<16x32xf32>
    %15 = vector.extract_strided_slice %12 {offsets = [2, 0], sizes = [16, 32], strides = [1, 1]} : vector<18x32xf32> to vector<16x32xf32>
    %16 = tpu.concatenate %13, %14, %15 in 1 : vector<16x32xf32>, vector<16x32xf32>, vector<16x32xf32> -> vector<16x96xf32>
    %c0_13 = arith.constant 0 : index
    %c0_14 = arith.constant 0 : index
    %17 = vector.load %arg2[%c0_13, %c0_14] : memref<96x32xf32, #tpu.memory_space<vmem>>, vector<96x32xf32>
    %cst_15 = arith.constant dense<0.000000e+00> : vector<16x32xf32>
    %18 = tpu.matmul %16, %17, %cst_15 {dimension_numbers = #tpu.dot_dimension_numbers<[1], [0], [0], [1], [0, 0, 1, 1], [], []>} : vector<16x96xf32>, vector<96x32xf32>, vector<16x32xf32> -> vector<16x32xf32>
    %c0_16 = arith.constant 0 : index
    %c0_17 = arith.constant 0 : index
    %19 = vector.load %arg12[%c0_16, %c0_17] : memref<18x32xf32, #tpu.memory_space<vmem>>, vector<1x32xf32>
    tpu.vector_store %arg12[%c0_16, %c0_17], %8 {strides = array<i32>} : memref<18x32xf32, #tpu.memory_space<vmem>>, vector<1x32xf32>,
    %c17_18 = arith.constant 17 : index
    %c0_19 = arith.constant 0 : index
    %20 = vector.load %arg12[%c17_18, %c0_19] : memref<18x32xf32, #tpu.memory_space<vmem>>, vector<1x32xf32>
    tpu.vector_store %arg12[%c17_18, %c0_19], %8 {strides = array<i32>} : memref<18x32xf32, #tpu.memory_space<vmem>>, vector<1x32xf32>,
    %c1_20 = arith.constant 1 : index
    %c0_21 = arith.constant 0 : index
    %21 = vector.load %arg12[%c1_20, %c0_21] : memref<18x32xf32, #tpu.memory_space<vmem>>, vector<16x32xf32>
    tpu.vector_store %arg12[%c1_20, %c0_21], %7 {strides = array<i32>} : memref<18x32xf32, #tpu.memory_space<vmem>>, vector<16x32xf32>,
    %c0_22 = arith.constant 0 : index
    %c0_23 = arith.constant 0 : index
    %22 = vector.load %arg12[%c0_22, %c0_23] : memref<18x32xf32, #tpu.memory_space<vmem>>, vector<18x32xf32>
    %23 = vector.extract_strided_slice %22 {offsets = [0, 0], sizes = [16, 32], strides = [1, 1]} : vector<18x32xf32> to vector<16x32xf32>
    %24 = vector.extract_strided_slice %22 {offsets = [1, 0], sizes = [16, 32], strides = [1, 1]} : vector<18x32xf32> to vector<16x32xf32>
    %25 = vector.extract_strided_slice %22 {offsets = [2, 0], sizes = [16, 32], strides = [1, 1]} : vector<18x32xf32> to vector<16x32xf32>
    %26 = tpu.concatenate %23, %24, %25 in 1 : vector<16x32xf32>, vector<16x32xf32>, vector<16x32xf32> -> vector<16x96xf32>
    %c0_24 = arith.constant 0 : index
    %c0_25 = arith.constant 0 : index
    %27 = vector.load %arg3[%c0_24, %c0_25] : memref<96x32xf32, #tpu.memory_space<vmem>>, vector<96x32xf32>
    %cst_26 = arith.constant dense<0.000000e+00> : vector<16x32xf32>
    %28 = tpu.matmul %26, %27, %cst_26 {dimension_numbers = #tpu.dot_dimension_numbers<[1], [0], [0], [1], [0, 0, 1, 1], [], []>} : vector<16x96xf32>, vector<96x32xf32>, vector<16x32xf32> -> vector<16x32xf32>
    %29 = vector.shape_cast %18 : vector<16x32xf32> to vector<1x16x32xf32>
    %30 = vector.shape_cast %28 : vector<16x32xf32> to vector<16x1x32xf32>
    %31 = vector.broadcast %29 : vector<1x16x32xf32> to vector<16x16x32xf32>
    %32 = vector.broadcast %30 : vector<16x1x32xf32> to vector<16x16x32xf32>
    %33 = arith.addf %31, %32 : vector<16x16x32xf32>
    %c0_27 = arith.constant 0 : index
    %c0_28 = arith.constant 0 : index
    %34 = vector.load %arg4[%c0_27, %c0_28] : memref<1x32xf32, #tpu.memory_space<vmem>>, vector<1x32xf32>
    %35 = vector.shape_cast %34 : vector<1x32xf32> to vector<1x1x32xf32>
    %36 = vector.broadcast %35 : vector<1x1x32xf32> to vector<16x16x32xf32>
    %37 = arith.addf %33, %36 : vector<16x16x32xf32>
    %cst_29 = arith.constant 0.000000e+00 : f32
    %38 = vector.broadcast %cst_29 : f32 to vector<16x16x32xf32>
    %39 = arith.maximumf %37, %38 : vector<16x16x32xf32>
    %cst_30 = arith.constant 0.000000e+00 : f32
    %40 = vector.broadcast %cst_30 : f32 to vector<1x18x32xf32>
    %c0_31 = arith.constant 0 : index
    %c0_32 = arith.constant 0 : index
    %c0_33 = arith.constant 0 : index
    %41 = vector.load %arg13[%c0_31, %c0_32, %c0_33] : memref<18x18x32xf32, #tpu.memory_space<vmem>>, vector<1x18x32xf32>
    tpu.vector_store %arg13[%c0_31, %c0_32, %c0_33], %40 {strides = array<i32>} : memref<18x18x32xf32, #tpu.memory_space<vmem>>, vector<1x18x32xf32>,
    %cst_34 = arith.constant 0.000000e+00 : f32
    %42 = vector.broadcast %cst_34 : f32 to vector<1x18x32xf32>
    %c17_35 = arith.constant 17 : index
    %c0_36 = arith.constant 0 : index
    %c0_37 = arith.constant 0 : index
    %43 = vector.load %arg13[%c17_35, %c0_36, %c0_37] : memref<18x18x32xf32, #tpu.memory_space<vmem>>, vector<1x18x32xf32>
    tpu.vector_store %arg13[%c17_35, %c0_36, %c0_37], %42 {strides = array<i32>} : memref<18x18x32xf32, #tpu.memory_space<vmem>>, vector<1x18x32xf32>,
    %cst_38 = arith.constant 0.000000e+00 : f32
    %44 = vector.broadcast %cst_38 : f32 to vector<18x1x32xf32>
    %c0_39 = arith.constant 0 : index
    %c0_40 = arith.constant 0 : index
    %c0_41 = arith.constant 0 : index
    %45 = vector.load %arg13[%c0_39, %c0_40, %c0_41] : memref<18x18x32xf32, #tpu.memory_space<vmem>>, vector<18x1x32xf32>
    tpu.vector_store %arg13[%c0_39, %c0_40, %c0_41], %44 {strides = array<i32>} : memref<18x18x32xf32, #tpu.memory_space<vmem>>, vector<18x1x32xf32>,
    %cst_42 = arith.constant 0.000000e+00 : f32
    %46 = vector.broadcast %cst_42 : f32 to vector<18x1x32xf32>
    %c0_43 = arith.constant 0 : index
    %c17_44 = arith.constant 17 : index
    %c0_45 = arith.constant 0 : index
    %47 = vector.load %arg13[%c0_43, %c17_44, %c0_45] : memref<18x18x32xf32, #tpu.memory_space<vmem>>, vector<18x1x32xf32>
    tpu.vector_store %arg13[%c0_43, %c17_44, %c0_45], %46 {strides = array<i32>} : memref<18x18x32xf32, #tpu.memory_space<vmem>>, vector<18x1x32xf32>,
    %c1_46 = arith.constant 1 : index
    %c1_47 = arith.constant 1 : index
    %c0_48 = arith.constant 0 : index
    %48 = vector.load %arg13[%c1_46, %c1_47, %c0_48] : memref<18x18x32xf32, #tpu.memory_space<vmem>>, vector<16x16x32xf32>
    tpu.vector_store %arg13[%c1_46, %c1_47, %c0_48], %39 {strides = array<i32>} : memref<18x18x32xf32, #tpu.memory_space<vmem>>, vector<16x16x32xf32>,
    %c0_49 = arith.constant 0 : index
    %c0_50 = arith.constant 0 : index
    %c0_51 = arith.constant 0 : index
    %49 = vector.load %arg13[%c0_49, %c0_50, %c0_51] : memref<18x18x32xf32, #tpu.memory_space<vmem>>, vector<18x18x32xf32>
    %50 = vector.extract_strided_slice %49 {offsets = [0, 0, 0], sizes = [16, 16, 32], strides = [1, 1, 1]} : vector<18x18x32xf32> to vector<16x16x32xf32>
    %51 = vector.shape_cast %50 : vector<16x16x32xf32> to vector<256x32xf32>
    %52 = vector.extract_strided_slice %49 {offsets = [0, 1, 0], sizes = [16, 16, 32], strides = [1, 1, 1]} : vector<18x18x32xf32> to vector<16x16x32xf32>
    %53 = vector.shape_cast %52 : vector<16x16x32xf32> to vector<256x32xf32>
    %54 = vector.extract_strided_slice %49 {offsets = [0, 2, 0], sizes = [16, 16, 32], strides = [1, 1, 1]} : vector<18x18x32xf32> to vector<16x16x32xf32>
    %55 = vector.shape_cast %54 : vector<16x16x32xf32> to vector<256x32xf32>
    %56 = vector.extract_strided_slice %49 {offsets = [1, 0, 0], sizes = [16, 16, 32], strides = [1, 1, 1]} : vector<18x18x32xf32> to vector<16x16x32xf32>
    %57 = vector.shape_cast %56 : vector<16x16x32xf32> to vector<256x32xf32>
    %58 = vector.extract_strided_slice %49 {offsets = [1, 1, 0], sizes = [16, 16, 32], strides = [1, 1, 1]} : vector<18x18x32xf32> to vector<16x16x32xf32>
    %59 = vector.shape_cast %58 : vector<16x16x32xf32> to vector<256x32xf32>
    %60 = vector.extract_strided_slice %49 {offsets = [1, 2, 0], sizes = [16, 16, 32], strides = [1, 1, 1]} : vector<18x18x32xf32> to vector<16x16x32xf32>
    %61 = vector.shape_cast %60 : vector<16x16x32xf32> to vector<256x32xf32>
    %62 = vector.extract_strided_slice %49 {offsets = [2, 0, 0], sizes = [16, 16, 32], strides = [1, 1, 1]} : vector<18x18x32xf32> to vector<16x16x32xf32>
    %63 = vector.shape_cast %62 : vector<16x16x32xf32> to vector<256x32xf32>
    %64 = vector.extract_strided_slice %49 {offsets = [2, 1, 0], sizes = [16, 16, 32], strides = [1, 1, 1]} : vector<18x18x32xf32> to vector<16x16x32xf32>
    %65 = vector.shape_cast %64 : vector<16x16x32xf32> to vector<256x32xf32>
    %66 = vector.extract_strided_slice %49 {offsets = [2, 2, 0], sizes = [16, 16, 32], strides = [1, 1, 1]} : vector<18x18x32xf32> to vector<16x16x32xf32>
    %67 = vector.shape_cast %66 : vector<16x16x32xf32> to vector<256x32xf32>
    %68 = tpu.concatenate %51, %53, %55, %57, %59, %61, %63, %65, %67 in 1 : vector<256x32xf32>, vector<256x32xf32>, vector<256x32xf32>, vector<256x32xf32>, vector<256x32xf32>, vector<256x32xf32>, vector<256x32xf32>, vector<256x32xf32>, vector<256x32xf32> -> vector<256x288xf32>
    %69 = arith.truncf %68 : vector<256x288xf32> to vector<256x288xbf16>
    %c0_52 = arith.constant 0 : index
    %c0_53 = arith.constant 0 : index
    %70 = vector.load %arg5[%c0_52, %c0_53] : memref<288x32xbf16, #tpu.memory_space<vmem>>, vector<288x32xbf16>
    %cst_54 = arith.constant dense<0.000000e+00> : vector<256x32xf32>
    %71 = tpu.matmul %69, %70, %cst_54 {dimension_numbers = #tpu.dot_dimension_numbers<[1], [0], [0], [1], [0, 0, 1, 1], [], []>} : vector<256x288xbf16>, vector<288x32xbf16>, vector<256x32xf32> -> vector<256x32xf32>
    %c0_55 = arith.constant 0 : index
    %c0_56 = arith.constant 0 : index
    %72 = vector.load %arg6[%c0_55, %c0_56] : memref<1x32xf32, #tpu.memory_space<vmem>>, vector<1x32xf32>
    %73 = vector.broadcast %72 : vector<1x32xf32> to vector<256x32xf32>
    %74 = arith.addf %71, %73 : vector<256x32xf32>
    %cst_57 = arith.constant 0.000000e+00 : f32
    %75 = vector.broadcast %cst_57 : f32 to vector<256x32xf32>
    %76 = arith.maximumf %74, %75 : vector<256x32xf32>
    %77 = vector.shape_cast %1 : vector<16x16x32xf32> to vector<256x32xf32>
    %78 = arith.truncf %77 : vector<256x32xf32> to vector<256x32xbf16>
    %c0_58 = arith.constant 0 : index
    %c0_59 = arith.constant 0 : index
    %79 = vector.load %arg7[%c0_58, %c0_59] : memref<32x256xbf16, #tpu.memory_space<vmem>>, vector<32x256xbf16>
    %cst_60 = arith.constant dense<0.000000e+00> : vector<256x256xf32>
    %80 = tpu.matmul %78, %79, %cst_60 {dimension_numbers = #tpu.dot_dimension_numbers<[1], [0], [0], [1], [0, 0, 1, 1], [], []>} : vector<256x32xbf16>, vector<32x256xbf16>, vector<256x256xf32> -> vector<256x256xf32>
    %81 = arith.truncf %76 : vector<256x32xf32> to vector<256x32xbf16>
    %c0_61 = arith.constant 0 : index
    %c0_62 = arith.constant 0 : index
    %82 = vector.load %arg8[%c0_61, %c0_62] : memref<32x256xbf16, #tpu.memory_space<vmem>>, vector<32x256xbf16>
    %cst_63 = arith.constant dense<0.000000e+00> : vector<256x256xf32>
    %83 = tpu.matmul %81, %82, %cst_63 {dimension_numbers = #tpu.dot_dimension_numbers<[1], [0], [0], [1], [0, 0, 1, 1], [], []>} : vector<256x32xbf16>, vector<32x256xbf16>, vector<256x256xf32> -> vector<256x256xf32>
    %84 = arith.addf %80, %83 : vector<256x256xf32>
    %c0_64 = arith.constant 0 : index
    %c0_65 = arith.constant 0 : index
    %85 = vector.load %arg9[%c0_64, %c0_65] : memref<1x256xf32, #tpu.memory_space<vmem>>, vector<1x256xf32>
    %86 = vector.broadcast %85 : vector<1x256xf32> to vector<256x256xf32>
    %87 = arith.addf %84, %86 : vector<256x256xf32>
    %cst_66 = arith.constant 0.000000e+00 : f32
    %88 = vector.broadcast %cst_66 : f32 to vector<256x256xf32>
    %89 = arith.maximumf %87, %88 : vector<256x256xf32>
    %c0_67 = arith.constant 0 : index
    %c0_68 = arith.constant 0 : index
    %c0_69 = arith.constant 0 : index
    %90 = vector.load %arg10[%c0_67, %c0_68, %c0_69] : memref<1x256x256xf32, #tpu.memory_space<vmem>>, vector<1x256x256xf32>
    %91 = vector.shape_cast %90 : vector<1x256x256xf32> to vector<256x256xf32>
    %92 = vector.shape_cast %89 : vector<256x256xf32> to vector<1x256x256xf32>
    tpu.vector_store %arg10[%c0_67, %c0_68, %c0_69], %92 {strides = array<i32>} : memref<1x256x256xf32, #tpu.memory_space<vmem>>, vector<1x256x256xf32>,
    return
  }
  func.func @transform_0(%arg0: i32) -> (i32, i32, i32, i32) {
    %c0_i32 = arith.constant 0 : i32
    %c0_i32_0 = arith.constant 0 : i32
    %c0_i32_1 = arith.constant 0 : i32
    %c0_i32_2 = arith.constant 0 : i32
    return %arg0, %c0_i32, %c0_i32_0, %c0_i32_1 : i32, i32, i32, i32
  }
  func.func @transform_1(%arg0: i32) -> (i32, i32) {
    %c0_i32 = arith.constant 0 : i32
    %c0_i32_0 = arith.constant 0 : i32
    %c0_i32_1 = arith.constant 0 : i32
    return %c0_i32, %c0_i32_0 : i32, i32
  }
  func.func @transform_2(%arg0: i32) -> (i32, i32) {
    %c0_i32 = arith.constant 0 : i32
    %c0_i32_0 = arith.constant 0 : i32
    %c0_i32_1 = arith.constant 0 : i32
    return %c0_i32, %c0_i32_0 : i32, i32
  }
  func.func @transform_3(%arg0: i32) -> (i32, i32) {
    %c0_i32 = arith.constant 0 : i32
    %c0_i32_0 = arith.constant 0 : i32
    %c0_i32_1 = arith.constant 0 : i32
    return %c0_i32, %c0_i32_0 : i32, i32
  }
  func.func @transform_4(%arg0: i32) -> (i32, i32) {
    %c0_i32 = arith.constant 0 : i32
    %c0_i32_0 = arith.constant 0 : i32
    %c0_i32_1 = arith.constant 0 : i32
    return %c0_i32, %c0_i32_0 : i32, i32
  }
  func.func @transform_5(%arg0: i32) -> (i32, i32) {
    %c0_i32 = arith.constant 0 : i32
    %c0_i32_0 = arith.constant 0 : i32
    %c0_i32_1 = arith.constant 0 : i32
    return %c0_i32, %c0_i32_0 : i32, i32
  }
  func.func @transform_6(%arg0: i32) -> (i32, i32) {
    %c0_i32 = arith.constant 0 : i32
    %c0_i32_0 = arith.constant 0 : i32
    %c0_i32_1 = arith.constant 0 : i32
    return %c0_i32, %c0_i32_0 : i32, i32
  }
  func.func @transform_7(%arg0: i32) -> (i32, i32) {
    %c0_i32 = arith.constant 0 : i32
    %c0_i32_0 = arith.constant 0 : i32
    %c0_i32_1 = arith.constant 0 : i32
    return %c0_i32, %c0_i32_0 : i32, i32
  }
  func.func @transform_8(%arg0: i32) -> (i32, i32) {
    %c0_i32 = arith.constant 0 : i32
    %c0_i32_0 = arith.constant 0 : i32
    %c0_i32_1 = arith.constant 0 : i32
    return %c0_i32, %c0_i32_0 : i32, i32
  }
  func.func @transform_9(%arg0: i32) -> (i32, i32, i32) {
    %c0_i32 = arith.constant 0 : i32
    %c0_i32_0 = arith.constant 0 : i32
    %c0_i32_1 = arith.constant 0 : i32
    return %arg0, %c0_i32, %c0_i32_0 : i32, i32, i32
  }
}

</mosaic_0001>

<bundles_post_ra>
// kernel: tpu_custom_call.1
= control target key start
LH: loop header
LB: loop body
LE: loop exit
PB: predicated region body
PF: predicated region fallthrough
CT: control target
= control target key end

     0   :  { %14 = vsyncpa [#allocation6], 0  ;;  %s7545_s0 = inlined_call_operand.hbm [shape: f32[2,16,16,32], index: 0, kind: input, shape index: {}]   ;;  %s7546_s1 = inlined_call_operand.vmem [shape: f32[96,32], index: 1, kind: input, shape index: {}]   ;;  %s7547_s2 = inlined_call_operand.vmem [shape: f32[96,32], index: 2, kind: input, shape index: {}]   ;;  %s7548_s3 = inlined_call_operand.vmem [shape: f32[1,32], index: 3, kind: input, shape index: {}]   ;;  %s7549_s4 = inlined_call_operand.vmem [shape: bf16[288,32], index: 4, kind: input, shape index: {}]   ;;  %s7550_s5 = inlined_call_operand.vmem [shape: f32[1,32], index: 5, kind: input, shape index: {}]   ;;  %s7551_s6 = inlined_call_operand.vmem [shape: bf16[32,256], index: 6, kind: input, shape index: {}]   ;;  %s7552_s7 = inlined_call_operand.vmem [shape: bf16[32,256], index: 7, kind: input, shape index: {}]   ;;  %s7553_s8 = inlined_call_operand.vmem [shape: f32[1,256], index: 8, kind: input, shape index: {}]   ;;  %s7554_s9 = inlined_call_operand.hbm [shape: f32[2,256,256], index: 9, kind: output, shape index: {}]  }
   0x1   :  { %16 = vsyncpa [#allocation6 + $0x1], 0 }
   0x2   :  { %17 = vsyncpa [#allocation7], 0 }
   0x3   :  { %19 = vsyncpa [#allocation7 + $0x1], 0  ;;  %s5064_s30 = smov 0   ;;  %s5066_s10 = smov 0  }
   0x4   :  { %s5068_s11 = smov 0   ;;  %s5070_s12 = smov 0  }
   0x5 LB: > { %s5085_s13 = sadd.s32 4294967295, %s5000_s12   ;;  %s3814_s14 = sadd.s32 4294967294, %s5000_s12   ;;  %s5000_s12 = sphi %s5070_s12, %s7677_s12   ;;  %s4996_s11 = sphi %s5068_s11, %s7676_s11   ;;  %s4992_s10 = sphi %s5066_s10, %s7675_s10   ;;  %s4988_s30 = sphi %s5064_s30, %s7674_s30  }
   0x6   : > { %s5089_s15 = sadd.s32 1, %s5000_s12   ;;  %s32_s16 = sadd.s32 1, %s4996_s11 }
   0x7   : > { %s29_s17 = ssub.s32 %s5000_s12, %s5089_s15  ;;  %p39_p0 = scmp.ne.s32.totalorder %s4996_s11, %s4992_s10 }
   0x8   : > { %p30_p1 = scmp.eq.s32.totalorder %s29_s17, 0  ;;  %p40_p2 = scmp.eq.s32.totalorder %s5000_s12, 0 }
   0x9   : > { %p45_p3 = scmp.ne.s32.totalorder %s4992_s10, %s4988_s30  ;;  %p46_p4 = scmp.eq.s32.totalorder %s5085_s13, 0 }
   0xa   : > { %s5101_s18 = scalar_select %p30_p1, %s4996_s11, %s32_s16  }
   0xb   : > { %p5103_p5 = por %p40_p2, %p39_p0  ;;  %p5107_p6 = por %p46_p4, %p45_p3 }
   0xc   : > { %p237_p7 = scmp.eq.s32.totalorder %s5085_s13, 1  ;;  %p243_p8 = scmp.eq.s32.totalorder %s3814_s14, 1 }
   0xd   : > { %p4286_p10 = scmp.lt.s32.totalorder %s5000_s12, 2  ;;  %s287_s23 = sand.u32 1, %s4996_s11  }
   0xe   : > { %p5114_p11 = por %p237_p7, %p39_p0  ;;  %p5118_p12 = por %p243_p8, %p45_p3 }
   0xf   : > { %s3908_s24 = sshll.u32 %s5000_s12, 12  ;;  %s3817_s25 = sshll.u32 %s287_s23, 8 }
  0x10   : > { %s7595_s21 = scalar_select %p5114_p11, 1, 0 }
  0x11   : > { %s7596_s22 = scalar_select %p5118_p12, 1, 0 }
  0x12   : > { %s5127_s28 = scalar_lea.hbm %s7545_s0, %s3908_s24  ;;  %s291_s29 = scalar_lea.vmem [#allocation5], %s3817_s25 }
  0x13   : > { %s298_s14 = sshll.u32 %s291_s29, 4  ;;  %p5131_p13 = pnand %p4286_p10, %p5103_p5  ;;  %s5135_s14 = int_to_ptr.vmem [resolvable:$true] %s298_s14 }
  0x14   : > { %s5137_s17 = scalar_lea.sflag [#allocation6], %s287_s23  ;;  %s4904_s26 = scalar_lea.hbm %s5127_s28, 4096 }
  0x15   : > { %p4905_p0 = scmp.ne.s32.totalorder %s5127_s28, %s4904_s26  ;;  %p4906_p1 = pneg %p5131_p13 }
  0x16   : > { %s4909_s25 = scalar_lea.hbm %s7545_s0, 8192  ;;  %p4910_p4 = scmp.lt.u32.totalorder %s5127_s28, %s7545_s0 }
  0x17   : > { %p4907_p2 = pnand %p4906_p1, %p4905_p0  ;;  %p4911_p5 = scmp.lt.u32.totalorder %s4909_s25, %s4904_s26 }
  0x18   : > { %p4913_p8 = scmp.lt.u32.totalorder %s4904_s26, %s5127_s28 }
  0x19   : > { %p4908_p3 = pneg %p4907_p2  ;;  %p4912_p7 = por %p4911_p5, %p4910_p4 }
  0x1b   : > { %p4914_p10 = por %p4913_p8, %p4912_p7 }
  0x1d   : > { %p4915_p9 = pnand %p4914_p10, %p4908_p3 }
  0x1f   : > { %4918 = shalt.err (!%p4915_p9)
}
  0x20   : > { %s4919_s23 = scalar_lea.vmem %s5135_s14, 4096  ;;  %s5002_s24 = smov [#allocation5]  }
  0x21   : > { %p4920_p0 = scmp.ne.s32.totalorder %s5135_s14, %s4919_s23  ;;  %s4924_s19 = sshll.u32 %s5002_s24, 4  ;;  %s4925_s19 = int_to_ptr.vmem [resolvable:$false] %s4924_s19 }
  0x22   : > { %s4926_s27 = scalar_lea.vmem %s4925_s19, 8192  ;;  %p4927_p11 = scmp.lt.s32.totalorder %s5135_s14, %s4925_s19 }
  0x23   : > { %p4922_p2 = pnand %p4920_p0, %p4906_p1  ;;  %p4928_p4 = scmp.lt.s32.totalorder %s4926_s27, %s4919_s23 }
  0x25   : > { %p4923_p12 = pneg %p4922_p2  ;;  %p4929_p5 = por %p4928_p4, %p4927_p11 }
  0x27   : > { %p4930_p7 = pnand %p4929_p5, %p4923_p12 }
  0x29   : > { %4933 = shalt.err (!%p4930_p7)
}
  0x2a   : > { %s5003_s26 = smov 128   ;;  %s5004_s25 = smov 8  }
  0x2b   : > { %4281 = dma.hbm_to_vmem [thread:$0]  (!%p5131_p13), %s5127_s28, 4096, %s5135_s14, %s5137_s17, %s5003_s26, %s5003_s26, %s5004_s25  }
  0x2c   : > { %p3820_p9 = scmp.ge.s32.totalorder %s5000_s12, 1  ;;  %p306_p1 = scmp.lt.s32.totalorder %s5000_s12, 3 }
  0x2e   : > { %p307_p3 = pnand %p3820_p9, %p306_p1 }
  0x30   : > { %310 = sbr.rel (%p307_p3) target bundleno = 1406 (0x57e), region = 56 }
  0x37   : > { %s5168_s29 = sand.u32 1, %s4992_s10  }
  0x38   : > { %s3821_s23 = sshll.u32 %s5168_s29, 8  ;;  %s313_s24 = scalar_lea.sflag [#allocation6], %s5168_s29 }
  0x39   : > { %s5172_s19 = scalar_lea.vmem [#allocation5], %s3821_s23 }
  0x3a   : > { %4979 = dma.done.wait (%p5107_p6), %s313_s24, 4096  }
  0x3b   : > { %4981 = vsyncadd (%p5107_p6), %s313_s24, 4294963200  ;;  %vm384_vm0 = vcmask 261120   ;;  %vm578_vm1 = vcmask 253952   ;;  %v5005_v0 = vmov 0.0   ;;  %v352_v1 = vld [vmem:[%s5172_s19] sm:$0xff]  ;;  %v353_v2 = vld [vmem:[%s5172_s19 + $0x8] sm:$0xff] }
  0x3c   : > { %712 = vst.msk [vmem:[#allocation3] sm:$0x1] %vm578_vm1, %v5005_v0  ;;  %579 = vst.msk [vmem:[#allocation2] sm:$0x1] %vm578_vm1, %v5005_v0  ;;  %v354_v3 = vld [vmem:[%s5172_s19 + $0x10] sm:$0xff]  ;;  %v355_v4 = vld [vmem:[%s5172_s19 + $0x18] sm:$0xff] }
  0x3d   : > { %580 = vst.msk [vmem:[#allocation2 + $0x11] sm:$0x1] %vm578_vm1, %v5005_v0  ;;  %713 = vst.msk [vmem:[#allocation3 + $0x11] sm:$0x1] %vm578_vm1, %v5005_v0  ;;  %v356_v5 = vld [vmem:[%s5172_s19 + $0x20] sm:$0xff]  ;;  %v357_v6 = vld [vmem:[%s5172_s19 + $0x28] sm:$0xff] }
  0x3e   : > { %1163 = vst.msk [vmem:[#allocation4] sm:$0xff] %vm384_vm0, %v5005_v0  ;;  %1164 = vst.msk [vmem:[#allocation4 + $0x8] sm:$0xff] %vm384_vm0, %v5005_v0  ;;  %v5269_v7 = vsel %vm384_vm0, %v352_v1, 0.0  ;;  %v5272_v8 = vsel %vm384_vm0, %v354_v3, 0.0  ;;  %v416_v9 = vsel %vm384_vm0, %v353_v2, 0.0  ;;  %v358_v10 = vld [vmem:[%s5172_s19 + $0x30] sm:$0xff] }
  0x3f   : > { %1168 = vst.msk [vmem:[#allocation4 + $0x198] sm:$0xff] %vm384_vm0, %v5005_v0  ;;  %1169 = vst.msk [vmem:[#allocation4 + $0x1a0] sm:$0xff] %vm384_vm0, %v5005_v0  ;;  %v359_v11 = vld [vmem:[%s5172_s19 + $0x38] sm:$0xff]  ;;  %v360_v12 = vld [vmem:[%s5172_s19 + $0x40] sm:$0xff]  ;;  %v5279_v13 = vsel %vm384_vm0, %v356_v5, 0.0  ;;  %v417_v14 = vsel %vm384_vm0, %v355_v4, 0.0  ;;  %v450_v16 = vadd.f32 %v416_v9, %v5269_v7 }
  0x40   : > { %1172 = vst.msk [vmem:[#allocation4 + $0x18] sm:$0x1] %vm578_vm1, %v5005_v0  ;;  %1173 = vst.msk [vmem:[#allocation4 + $0x30] sm:$0x1] %vm578_vm1, %v5005_v0  ;;  %v419_v15 = vsel %vm384_vm0, %v357_v6, 0.0  ;;  %v361_v17 = vld [vmem:[%s5172_s19 + $0x48] sm:$0xff]  ;;  %v418_v22 = vadd.f32 %v417_v14, %v416_v9  ;;  %v457_v30 = vadd.f32 %v417_v14, %v5272_v8 }
  0x41   : > { %1174 = vst.msk [vmem:[#allocation4 + $0x48] sm:$0x1] %vm578_vm1, %v5005_v0  ;;  %1175 = vst.msk [vmem:[#allocation4 + $0x60] sm:$0x1] %vm578_vm1, %v5005_v0  ;;  %v362_v18 = vld [vmem:[%s5172_s19 + $0x50] sm:$0xff]  ;;  %v363_v19 = vld [vmem:[%s5172_s19 + $0x58] sm:$0xff]  ;;  %v464_v44 = vadd.f32 %v419_v15, %v5279_v13 }
  0x42   : > { %1176 = vst.msk [vmem:[#allocation4 + $0x78] sm:$0x1] %vm578_vm1, %v5005_v0  ;;  %1177 = vst.msk [vmem:[#allocation4 + $0x90] sm:$0x1] %vm578_vm1, %v5005_v0  ;;  %v5288_v20 = vsel %vm384_vm0, %v358_v10, 0.0  ;;  %v5291_v21 = vsel %vm384_vm0, %v360_v12, 0.0  ;;  %v420_v36 = vadd.f32 %v419_v15, %v418_v22 }
  0x43   : > { %1178 = vst.msk [vmem:[#allocation4 + $0xa8] sm:$0x1] %vm578_vm1, %v5005_v0  ;;  %1179 = vst.msk [vmem:[#allocation4 + $0xc0] sm:$0x1] %vm578_vm1, %v5005_v0  ;;  %v421_v23 = vsel %vm384_vm0, %v359_v11, 0.0  ;;  %v364_v24 = vld [vmem:[%s5172_s19 + $0x60] sm:$0xff] }
  0x44   : > { %1180 = vst.msk [vmem:[#allocation4 + $0xd8] sm:$0x1] %vm578_vm1, %v5005_v0  ;;  %1181 = vst.msk [vmem:[#allocation4 + $0xf0] sm:$0x1] %vm578_vm1, %v5005_v0  ;;  %v365_v25 = vld [vmem:[%s5172_s19 + $0x68] sm:$0xff]  ;;  %v366_v26 = vld [vmem:[%s5172_s19 + $0x70] sm:$0xff]  ;;  %v422_v50 = vadd.f32 %v421_v23, %v420_v36  ;;  %v471_v58 = vadd.f32 %v421_v23, %v5288_v20 }
  0x45   : > { %1182 = vst.msk [vmem:[#allocation4 + $0x108] sm:$0x1] %vm578_vm1, %v5005_v0  ;;  %1183 = vst.msk [vmem:[#allocation4 + $0x120] sm:$0x1] %vm578_vm1, %v5005_v0  ;;  %v5298_v27 = vsel %vm384_vm0, %v362_v18, 0.0  ;;  %v423_v28 = vsel %vm384_vm0, %v361_v17, 0.0 }
  0x46   : > { %1184 = vst.msk [vmem:[#allocation4 + $0x138] sm:$0x1] %vm578_vm1, %v5005_v0  ;;  %1185 = vst.msk [vmem:[#allocation4 + $0x150] sm:$0x1] %vm578_vm1, %v5005_v0  ;;  %v425_v29 = vsel %vm384_vm0, %v363_v19, 0.0  ;;  %v367_v31 = vld [vmem:[%s5172_s19 + $0x78] sm:$0xff]  ;;  %v424_v1 = vadd.f32 %v423_v28, %v422_v50  ;;  %v478_v22 = vadd.f32 %v423_v28, %v5291_v21 }
  0x47   : > { %1186 = vst.msk [vmem:[#allocation4 + $0x168] sm:$0x1] %vm578_vm1, %v5005_v0  ;;  %1187 = vst.msk [vmem:[#allocation4 + $0x180] sm:$0x1] %vm578_vm1, %v5005_v0  ;;  %v368_v32 = vld [vmem:[%s5172_s19 + $0x80] sm:$0xff]  ;;  %v369_v33 = vld [vmem:[%s5172_s19 + $0x88] sm:$0xff] }
  0x48   : > { %1190 = vst.msk [vmem:[#allocation4 + $0x29] sm:$0x1] %vm578_vm1, %v5005_v0  ;;  %1191 = vst.msk [vmem:[#allocation4 + $0x41] sm:$0x1] %vm578_vm1, %v5005_v0  ;;  %v5307_v34 = vsel %vm384_vm0, %v364_v24, 0.0  ;;  %v5310_v35 = vsel %vm384_vm0, %v366_v26, 0.0  ;;  %v426_v12 = vadd.f32 %v425_v29, %v424_v1 }
  0x49   : > { %1192 = vst.msk [vmem:[#allocation4 + $0x59] sm:$0x1] %vm578_vm1, %v5005_v0  ;;  %1193 = vst.msk [vmem:[#allocation4 + $0x71] sm:$0x1] %vm578_vm1, %v5005_v0  ;;  %v427_v37 = vsel %vm384_vm0, %v365_v25, 0.0  ;;  %v370_v38 = vld [vmem:[%s5172_s19 + $0x90] sm:$0xff]  ;;  %v485_v25 = vadd.f32 %v425_v29, %v5298_v27 }
  0x4a   : > { %1194 = vst.msk [vmem:[#allocation4 + $0x89] sm:$0x1] %vm578_vm1, %v5005_v0  ;;  %1195 = vst.msk [vmem:[#allocation4 + $0xa1] sm:$0x1] %vm578_vm1, %v5005_v0  ;;  %v371_v39 = vld [vmem:[%s5172_s19 + $0x98] sm:$0xff]  ;;  %v372_v40 = vld [vmem:[%s5172_s19 + $0xa0] sm:$0xff]  ;;  %v428_v23 = vadd.f32 %v427_v37, %v426_v12  ;;  %v492_v26 = vadd.f32 %v427_v37, %v5307_v34 }
  0x4b   : > { %1196 = vst.msk [vmem:[#allocation4 + $0xb9] sm:$0x1] %vm578_vm1, %v5005_v0  ;;  %1197 = vst.msk [vmem:[#allocation4 + $0xd1] sm:$0x1] %vm578_vm1, %v5005_v0  ;;  %v5317_v41 = vsel %vm384_vm0, %v368_v32, 0.0  ;;  %v5320_v42 = vsel %vm384_vm0, %v367_v31, 0.0 }
  0x4c   : > { %1198 = vst.msk [vmem:[#allocation4 + $0xe9] sm:$0x1] %vm578_vm1, %v5005_v0  ;;  %1199 = vst.msk [vmem:[#allocation4 + $0x101] sm:$0x1] %vm578_vm1, %v5005_v0  ;;  %v5323_v43 = vsel %vm384_vm0, %v369_v33, 0.0  ;;  %v373_v45 = vld [vmem:[%s5172_s19 + $0xa8] sm:$0xff] }
  0x4d   : > { %1200 = vst.msk [vmem:[#allocation4 + $0x119] sm:$0x1] %vm578_vm1, %v5005_v0  ;;  %1201 = vst.msk [vmem:[#allocation4 + $0x131] sm:$0x1] %vm578_vm1, %v5005_v0  ;;  %v374_v46 = vld [vmem:[%s5172_s19 + $0xb0] sm:$0xff]  ;;  %v375_v47 = vld [vmem:[%s5172_s19 + $0xb8] sm:$0xff] }
  0x4e   : > { %1202 = vst.msk [vmem:[#allocation4 + $0x149] sm:$0x1] %vm578_vm1, %v5005_v0  ;;  %1203 = vst.msk [vmem:[#allocation4 + $0x161] sm:$0x1] %vm578_vm1, %v5005_v0  ;;  %v5330_v48 = vsel %vm384_vm0, %v370_v38, 0.0  ;;  %v5333_v49 = vsel %vm384_vm0, %v372_v40, 0.0  ;;  %v430_v38 = vadd.f32 %v5320_v42, %v428_v23 }
  0x4f   : > { %1204 = vst.msk [vmem:[#allocation4 + $0x179] sm:$0x1] %vm578_vm1, %v5005_v0  ;;  %1205 = vst.msk [vmem:[#allocation4 + $0x191] sm:$0x1] %vm578_vm1, %v5005_v0  ;;  %v5336_v51 = vsel %vm384_vm0, %v371_v39, 0.0  ;;  %v376_v52 = vld [vmem:[%s5172_s19 + $0xc0] sm:$0xff] }
  0x50   : > { %1171 = vst.msk [vmem:[#allocation4] sm:$0x1] %vm578_vm1, %v5005_v0  ;;  %1188 = vst.msk [vmem:[#allocation4 + $0x198] sm:$0x1] %vm578_vm1, %v5005_v0  ;;  %v377_v53 = vld [vmem:[%s5172_s19 + $0xc8] sm:$0xff]  ;;  %v378_v54 = vld [vmem:[%s5172_s19 + $0xd0] sm:$0xff]  ;;  %v5385_v28 = vadd.f32 %v5323_v43, %v430_v38 }
  0x51   : > { %v5342_v55 = vsel %vm384_vm0, %v374_v46, 0.0  ;;  %v5345_v56 = vsel %vm384_vm0, %v373_v45, 0.0  ;;  %v5348_v57 = vsel %vm384_vm0, %v375_v47, 0.0  ;;  %v379_v59 = vld [vmem:[%s5172_s19 + $0xd8] sm:$0xff]  ;;  %v380_v60 = vld [vmem:[%s5172_s19 + $0xe0] sm:$0xff]  ;;  %v381_v61 = vld [vmem:[%s5172_s19 + $0xe8] sm:$0xff] }
  0x52   : > { %v5355_v62 = vsel %vm384_vm0, %v376_v52, 0.0  ;;  %v5358_v63 = vsel %vm384_vm0, %v378_v54, 0.0  ;;  %v5361_v2 = vsel %vm384_vm0, %v377_v53, 0.0  ;;  %v382_v3 = vld [vmem:[%s5172_s19 + $0xf0] sm:$0xff]  ;;  %v383_v4 = vld [vmem:[%s5172_s19 + $0xf8] sm:$0xff]  ;;  %v5366_v5 = vsel %vm384_vm0, %v380_v60, 0.0 }
  0x53   : > { %v5369_v6 = vsel %vm384_vm0, %v379_v59, 0.0  ;;  %v5372_v9 = vsel %vm384_vm0, %v381_v61, 0.0  ;;  %v451_v10 = vrot.slane %v450_v16, 4  ;;  %v5375_v11 = vsel %vm384_vm0, %v382_v3, 0.0  ;;  %s5006_s17 = smov 32   ;;  %s5007_s27 = smov 64  }
  0x54   : > { %v5378_v14 = vsel %vm384_vm0, %v383_v4, 0.0  ;;  %v458_v15 = vrot.slane %v457_v30, 4  ;;  %v465_v18 = vrot.slane %v464_v44, 4  ;;  %v472_v19 = vrot.slane %v471_v58, 4  ;;  %s5009_s23 = smov 96   ;;  %s3822_s14 = sshll.u32 %s5168_s29, 9 }
  0x55   : > { %v452_v17 = vadd.f32 %v451_v10, %v450_v16  ;;  %v479_v36 = vrot.slane %v478_v22, 4  ;;  %v486_v40 = vrot.slane %v485_v25, 4  ;;  %v493_v45 = vrot.slane %v492_v26, 4  ;;  %p7671_p11 = scmp.ne.s32.totalorder %s7595_s21, 0  ;;  %s5011_s20 = smov [#allocation8]  }
  0x56   : > { %v459_v24 = vadd.f32 %v458_v15, %v457_v30  ;;  %v466_v32 = vadd.f32 %v465_v18, %v464_v44  ;;  %v473_v33 = vadd.f32 %v472_v19, %v471_v58  ;;  %v499_v61 = vadd.f32 %v5320_v42, %v5310_v35 }
  0x57   : > { %v453_v31 = vrot.slane %v452_v17, 2  ;;  %v480_v50 = vadd.f32 %v479_v36, %v478_v22  ;;  %v487_v29 = vadd.f32 %v486_v40, %v485_v25  ;;  %v494_v52 = vadd.f32 %v493_v45, %v492_v26 }
  0x58   : > { %v460_v39 = vrot.slane %v459_v24, 2  ;;  %v467_v46 = vrot.slane %v466_v32, 2  ;;  %v474_v47 = vrot.slane %v473_v33, 2  ;;  %v500_v18 = vrot.slane %v499_v61, 4 }
  0x59   : > { %v454_v16 = vadd.f32 %v453_v31, %v452_v17  ;;  %v481_v54 = vrot.slane %v480_v50, 2  ;;  %v488_v59 = vrot.slane %v487_v29, 2  ;;  %v495_v60 = vrot.slane %v494_v52, 2 }
  0x5a   : > { %v461_v30 = vadd.f32 %v460_v39, %v459_v24  ;;  %v468_v53 = vadd.f32 %v467_v46, %v466_v32  ;;  %v475_v44 = vadd.f32 %v474_v47, %v473_v33  ;;  %v506_v24 = vadd.f32 %v5323_v43, %v5317_v41 }
  0x5b   : > { %v455_v37 = vrot.slane %v454_v16, 1  ;;  %v482_v10 = vadd.f32 %v481_v54, %v480_v50  ;;  %v489_v15 = vadd.f32 %v488_v59, %v487_v29  ;;  %v496_v17 = vadd.f32 %v495_v60, %v494_v52 }
  0x5c   : > { %v462_v58 = vrot.slane %v461_v30, 1  ;;  %v469_v3 = vrot.slane %v468_v53, 1  ;;  %v476_v4 = vrot.slane %v475_v44, 1  ;;  %v501_v26 = vadd.f32 %v500_v18, %v499_v61 }
  0x5d   : > { %v5389_v1 = vadd.f32 %v455_v37, %v454_v16  ;;  %v483_v23 = vrot.slane %v482_v10, 1  ;;  %v490_v25 = vrot.slane %v489_v15, 1  ;;  %v497_v42 = vrot.slane %v496_v17, 1 }
  0x5e   : > { %v5391_v12 = vadd.f32 %v462_v58, %v461_v30  ;;  %v5393_v19 = vadd.f32 %v469_v3, %v468_v53  ;;  %v5395_v22 = vadd.f32 %v476_v4, %v475_v44  ;;  %v513_v31 = vadd.f32 %v5336_v51, %v5330_v48 }
  0x5f   : > { %v5401_v32 = vadd.f32 %v483_v23, %v482_v10  ;;  %v507_v33 = vrot.slane %v506_v24, 4  ;;  %v520_v36 = vadd.f32 %v5345_v56, %v5333_v49  ;;  %v527_v38 = vadd.f32 %v5348_v57, %v5342_v55 }
  0x60   : > { %v5407_v39 = vadd.f32 %v490_v25, %v489_v15  ;;  %v5409_v40 = vadd.f32 %v497_v42, %v496_v17  ;;  %v502_v43 = vrot.slane %v501_v26, 2  ;;  %v514_v45 = vrot.slane %v513_v31, 4 }
  0x61   : > { %v508_v16 = vadd.f32 %v507_v33, %v506_v24  ;;  %v521_v46 = vrot.slane %v520_v36, 4  ;;  %v528_v47 = vrot.slane %v527_v38, 4  ;;  %v534_v50 = vadd.f32 %v5361_v2, %v5355_v62 }
  0x62   : > { %v503_v30 = vadd.f32 %v502_v43, %v501_v26  ;;  %v515_v29 = vadd.f32 %v514_v45, %v513_v31  ;;  %v541_v52 = vadd.f32 %v5369_v6, %v5358_v63  ;;  %v548_v37 = vadd.f32 %v5372_v9, %v5366_v5 }
  0x63   : > { %v509_v53 = vrot.slane %v508_v16, 2  ;;  %v522_v44 = vadd.f32 %v521_v46, %v520_v36  ;;  %v529_v54 = vadd.f32 %v528_v47, %v527_v38  ;;  %v535_v58 = vrot.slane %v534_v50, 4 }
  0x64   : > { %v504_v59 = vrot.slane %v503_v30, 1  ;;  %v516_v60 = vrot.slane %v515_v29, 2  ;;  %v542_v61 = vrot.slane %v541_v52, 4  ;;  %v549_v3 = vrot.slane %v548_v37, 4 }
  0x65   : > { %v510_v4 = vadd.f32 %v509_v53, %v508_v16  ;;  %v523_v10 = vrot.slane %v522_v44, 2  ;;  %v530_v15 = vrot.slane %v529_v54, 2  ;;  %v536_v17 = vadd.f32 %v535_v58, %v534_v50 }
  0x66   : > { %v505_v18 = vadd.f32 %v504_v59, %v503_v30  ;;  %v517_v23 = vadd.f32 %v516_v60, %v515_v29  ;;  %v543_v24 = vadd.f32 %v542_v61, %v541_v52  ;;  %v550_v25 = vadd.f32 %v549_v3, %v548_v37 }
  0x67   : > { %vm730_vm2 = vcmask 1041409   ;;  %v511_v42 = vrot.slane %v510_v4, 1  ;;  %v524_v26 = vadd.f32 %v523_v10, %v522_v44  ;;  %v531_v31 = vadd.f32 %v530_v15, %v529_v54 }
  0x68   : > { %v537_v33 = vrot.slane %v536_v17, 2  ;;  %vm732_vm3 = vcmask 1042434   ;;  %v518_v36 = vrot.slane %v517_v23, 1  ;;  %v544_v38 = vrot.slane %v543_v24, 2 }
  0x69   : > { %v551_v43 = vrot.slane %v550_v25, 2  ;;  %v555_v45 = vadd.f32 %v5378_v14, %v5375_v11  ;;  %vm734_vm4 = vcmask 1043459   ;;  %v512_v16 = vadd.f32 %v511_v42, %v510_v4 }
  0x6a   : > { %v525_v46 = vrot.slane %v524_v26, 1  ;;  %v532_v47 = vrot.slane %v531_v31, 1  ;;  %v538_v50 = vadd.f32 %v537_v33, %v536_v17  ;;  %vm736_vm5 = vcmask 1044484  }
  0x6b   : > { %v519_v30 = vadd.f32 %v518_v36, %v517_v23  ;;  %v545_v29 = vadd.f32 %v544_v38, %v543_v24  ;;  %v552_v52 = vadd.f32 %v551_v43, %v550_v25  ;;  %v556_v37 = vrot.slane %v555_v45, 4 }
  0x6c   : > { %vm738_vm6 = vcmask 1045509   ;;  %v526_v53 = vadd.f32 %v525_v46, %v524_v26  ;;  %v533_v44 = vadd.f32 %v532_v47, %v531_v31  ;;  %v539_v54 = vrot.slane %v538_v50, 1 }
  0x6d   : > { %v562_v58 = vmul.f32 0.0625, %v5389_v1  ;;  %vm740_vm7 = vcmask 1046534   ;;  %v546_v59 = vrot.slane %v545_v29, 1  ;;  %v553_v60 = vrot.slane %v552_v52, 1 }
  0x6e   : > { %v557_v61 = vadd.f32 %v556_v37, %v555_v45  ;;  %v563_v3 = vmul.f32 0.0625, %v5391_v12  ;;  %vm742_vm8 = vcmask 1047559   ;;  %v540_v4 = vadd.f32 %v539_v54, %v538_v50  ;;  %v789_v50 = vld [vmem:[%s7547_s2 + $0x10] sm:$0xff] }
  0x6f   : > { %v564_v10 = vmul.f32 0.0625, %v5393_v19  ;;  %v565_v15 = vmul.f32 0.0625, %v5395_v22  ;;  %v566_v17 = vmul.f32 0.0625, %v5401_v32  ;;  %v547_v23 = vadd.f32 %v546_v59, %v545_v29  ;;  %v787_v19 = vld [vmem:[%s7547_s2] sm:$0xff]  ;;  %v788_v22 = vld [vmem:[%s7547_s2 + $0x8] sm:$0xff] }
  0x70   : > { %v554_v24 = vadd.f32 %v553_v60, %v552_v52  ;;  %v558_v25 = vrot.slane %v557_v61, 2  ;;  %v567_v42 = vmul.f32 0.0625, %v5407_v39  ;;  %v568_v1 = vmul.f32 0.0625, %v5409_v40  ;;  %v792_v59 = vld [vmem:[%s7547_s2 + $0x28] sm:$0xff] }
  0x71   : > { %v569_v26 = vmul.f32 0.0625, %v505_v18  ;;  %v570_v31 = vmul.f32 0.0625, %v512_v16  ;;  %v571_v33 = vmul.f32 0.0625, %v519_v30  ;;  %v572_v12 = vmul.f32 0.0625, %v526_v53  ;;  %v790_v30 = vld [vmem:[%s7547_s2 + $0x18] sm:$0xff] }
  0x72   : > { %v559_v36 = vadd.f32 %v558_v25, %v557_v61  ;;  %v573_v38 = vmul.f32 0.0625, %v533_v44  ;;  %v574_v43 = vmul.f32 0.0625, %v540_v4  ;;  %v575_v32 = vmul.f32 0.0625, %v547_v23  ;;  %v620_v4 = vld [vmem:[%s7546_s1 + $0x10] sm:$0xff] }
  0x73   : > { %v576_v45 = vmul.f32 0.0625, %v554_v24  ;;  %v731_v39 = vsel %vm730_vm2, %v563_v3, %v562_v58  ;;  %v744_v40 = vsel %vm730_vm2, %v571_v33, %v570_v31  ;;  %v387_v47 = vadd.f32 %v5272_v8, %v5269_v7  ;;  %v791_v7 = vld [vmem:[%s7547_s2 + $0x20] sm:$0xff]  ;;  %v793_v33 = vld [vmem:[%s7547_s2 + $0x30] sm:$0xff] }
  0x74   : > { %v560_v18 = vrot.slane %v559_v36, 1  ;;  %v733_v16 = vsel %vm732_vm3, %v564_v10, %v731_v39  ;;  %v745_v46 = vsel %vm732_vm3, %v572_v12, %v744_v40  ;;  %v434_v37 = vadd.f32 %v5336_v51, %v5385_v28  ;;  %v618_v51 = vld [vmem:[%s7546_s1] sm:$0xff]  ;;  %v619_v28 = vld [vmem:[%s7546_s1 + $0x8] sm:$0xff]  ;;  %v621_v10 = vld [vmem:[%s7546_s1 + $0x18] sm:$0xff] }
  0x75   : > { %v735_v29 = vsel %vm734_vm4, %v565_v15, %v733_v16  ;;  %v746_v52 = vsel %vm734_vm4, %v573_v38, %v745_v46  ;;  %v4182_v53 = vpack.c.bf16 %v788_v22, %v787_v19  ;;  %v389_v58 = vadd.f32 %v5279_v13, %v387_v47  ;;  %v623_v12 = vld [vmem:[%s7546_s1 + $0x28] sm:$0xff]  ;;  %v625_v39 = vld [vmem:[%s7546_s1 + $0x38] sm:$0xff]  ;;  %v797_v40 = vld [vmem:[%s7547_s2 + $0x50] sm:$0xff] }
  0x76   : > { %v561_v8 = vadd.f32 %v560_v18, %v559_v36  ;;  %v737_v44 = vsel %vm736_vm5, %v566_v17, %v735_v29  ;;  %v747_v54 = vsel %vm736_vm5, %v574_v43, %v746_v52  ;;  %v436_v3 = vadd.f32 %v5345_v56, %v434_v37  ;;  %v798_v46 = vld [vmem:[%s7547_s2 + $0x58] sm:$0xff]  ;;  %v627_v37 = vld [vmem:[%s7546_s1 + $0x48] sm:$0xff] }
  0x77   : > { %v739_v60 = vsel %vm738_vm6, %v567_v42, %v737_v44  ;;  %v748_v61 = vsel %vm738_vm6, %v575_v32, %v747_v54  ;;  %4183 = vmatprep.subr.bf16.mxu1 %v4182_v53  ;;  %v4186_v13 = vpack.c.bf16 %v790_v30, %v789_v50  ;;  %v391_v24 = vadd.f32 %v5288_v20, %v389_v58  ;;  %v794_v20 = vld [vmem:[%s7547_s2 + $0x38] sm:$0xff] }
  0x78   : > { %v577_v15 = vmul.f32 0.0625, %v561_v8  ;;  %v741_v17 = vsel %vm740_vm7, %v568_v1, %v739_v60  ;;  %v749_v23 = vsel %vm740_vm7, %v576_v45, %v748_v61  ;;  %4185 = vmatpush3.bf16.msra.mxu1 %v4182_v53  ;;  %v438_v25 = vadd.f32 %v5348_v57, %v436_v3  ;;  %v622_v57 = vld [vmem:[%s7546_s1 + $0x20] sm:$0xff] }
  0x79   : > { %v743_v56 = vsel %vm742_vm8, %v569_v26, %v741_v17  ;;  %4187 = vmatprep.subr.bf16.mxu1 %v4186_v13  ;;  %v4190_v42 = vpack.c.bf16 %v792_v59, %v791_v7  ;;  %v4158_v31 = vpack.c.bf16 %v619_v28, %v618_v51  ;;  %v393_v1 = vadd.f32 %v5291_v21, %v391_v24  ;;  %v795_v45 = vld [vmem:[%s7547_s2 + $0x40] sm:$0xff] }
  0x7a   : > { %v750_v36 = vsel %vm742_vm8, %v577_v15, %v749_v23  ;;  %753 = vst.msk [vmem:[#allocation3 + $0x1] sm:$0xff] %vm384_vm0, %v743_v56  ;;  %v4162_v26 = vpack.c.bf16 %v621_v10, %v620_v4  ;;  %v440_v38 = vadd.f32 %v5361_v2, %v438_v25  ;;  %v4194_v19 = vpack.c.bf16 %v794_v20, %v793_v33  ;;  %v796_v2 = vld [vmem:[%s7547_s2 + $0x48] sm:$0xff]  ;;  %v629_v15 = vld [vmem:[%s7546_s1 + $0x58] sm:$0xff] }
  0x7b   : > { %754 = vst.msk [vmem:[#allocation3 + $0x9] sm:$0xff] %vm384_vm0, %v750_v36  ;;  %4159 = vmatprep.subr.bf16.mxu0 %v4158_v31  ;;  %v395_v21 = vadd.f32 %v5298_v27, %v393_v1  ;;  %v4166_v22 = vpack.c.bf16 %v623_v12, %v622_v57  ;;  %vm589_vm9 = vcmask 1046528   ;;  %vm601_vm10 = vcmask 1045504  }
  0x7c   : > { %4189 = vmatpush3.bf16.msra.mxu1 %v4186_v13  ;;  %4161 = vmatpush3.bf16.msra.mxu0 %v4158_v31  ;;  %v442_v43 = vadd.f32 %v5369_v6, %v440_v38  ;;  %v624_v6 = vld [vmem:[%s7546_s1 + $0x30] sm:$0xff]  ;;  %v4198_v16 = vpack.c.bf16 %v796_v2, %v795_v45  ;;  %v4202_v51 = vpack.c.bf16 %v798_v46, %v797_v40  ;;  %vm615_vm11 = vcmask 523264  }
  0x7d   : > { %4191 = vmatprep.subr.bf16.mxu1 %v4190_v42  ;;  %4163 = vmatprep.subr.bf16.mxu0 %v4162_v26  ;;  %v397_v32 = vadd.f32 %v5307_v34, %v395_v21  ;;  %v4170_v52 = vpack.c.bf16 %v625_v39, %v624_v6  ;;  %vm630_vm12 = vcmask 785408   ;;  %vm1165_vm13 = vcmask 254976  }
  0x7e   : > { %v444_v27 = vadd.f32 %v5372_v9, %v442_v43  ;;  %1166 = vst.msk [vmem:[#allocation4 + $0x10] sm:$0x3] %vm1165_vm13, %v5005_v0  ;;  %1170 = vst.msk [vmem:[#allocation4 + $0x1a8] sm:$0x3] %vm1165_vm13, %v5005_v0 }
  0x7f   : > { %v399_v34 = vadd.f32 %v5310_v35, %v397_v32  ;;  %v626_v35 = vld [vmem:[%s7546_s1 + $0x40] sm:$0xff]  ;;  %1189 = vst.msk [vmem:[#allocation4 + $0x11] sm:$0x1] %vm578_vm1, %v5005_v0  ;;  %1206 = vst.msk [vmem:[#allocation4 + $0x1a9] sm:$0x1] %vm578_vm1, %v5005_v0 }
  0x80   : > { %4193 = vmatpush3.bf16.msra.mxu1 %v4190_v42  ;;  %4165 = vmatpush3.bf16.msra.mxu0 %v4162_v26  ;;  %v446_v9 = vadd.f32 %v5378_v14, %v444_v27  ;;  %v4174_v28 = vpack.c.bf16 %v627_v37, %v626_v35 }
  0x81   : > { %v5514_v18 = vld [vmem:[#allocation3] sm:$0xff]  ;;  %4195 = vmatprep.subr.bf16.mxu1 %v4194_v19  ;;  %4167 = vmatprep.subr.bf16.mxu0 %v4166_v22  ;;  %v401_v30 = vadd.f32 %v5317_v41, %v399_v34 }
  0x82   : > { %v5523_v47 = vld [vmem:[#allocation3 + $0x8] sm:$0xff]  ;;  %v761_v50 = vrot.slane %v5514_v18, 1  ;;  %v772_v29 = vrot.slane %v5514_v18, 2  ;;  %v757_v14 = vld [vmem:[#allocation3 + $0x10] sm:$0x3]  ;;  %v449_v58 = vmul.f32 0.0625, %v446_v9 }
  0x83   : > { %v762_v53 = vrot.slane %v5523_v47, 1  ;;  %v773_v7 = vrot.slane %v5523_v47, 2  ;;  %v764_v8 = vrot.slane %v757_v14, 1  ;;  %v775_v44 = vrot.slane %v757_v14, 2  ;;  %v1241_v9 = vld [vmem:[#allocation4 + $0x8] sm:$0xff] }
  0x84   : > { %v403_v54 = vadd.f32 %v5330_v48, %v401_v30  ;;  %4197 = vmatpush3.bf16.msra.mxu1 %v4194_v19  ;;  %4169 = vmatpush3.bf16.msra.mxu0 %v4166_v22  ;;  %582 = vst.msk [vmem:[#allocation2 + $0x9] sm:$0xff] %vm384_vm0, %v449_v58  ;;  %v1343_v35 = vrot.slane %v1241_v9, 1  ;;  %v1423_v30 = vrot.slane %v1241_v9, 2 }
  0x85   : > { %v763_v41 = vsel %vm589_vm9, %v761_v50, %v762_v53  ;;  %v774_v59 = vsel %vm601_vm10, %v772_v29, %v773_v7  ;;  %4199 = vmatprep.subr.bf16.mxu1 %v4198_v16  ;;  %v765_v48 = vsel %vm589_vm9, %v762_v53, %v764_v8  ;;  %v776_v61 = vsel %vm601_vm10, %v773_v7, %v775_v44 }
  0x86   : > { %766 = vrot.lane.b32.xlu0 %v763_v41, %s5006_s17  ;;  %777 = vrot.lane.b32.xlu1 %v774_v59, %s5007_s27  ;;  %v405_v60 = vadd.f32 %v5333_v49, %v403_v54  ;;  %v1242_v29 = vld [vmem:[#allocation4 + $0x10] sm:$0x3]  ;;  %v5008_v54 = vmov 1966171168   ;;  %v886_v41 = vlaneseq }
  0x87   : > { %4171 = vmatprep.subr.bf16.mxu0 %v4170_v52  ;;  %v1345_v0 = vrot.slane %v1242_v29, 1  ;;  %v884_v58 = vunpack.c.l.s4 %v5008_v54 }
  0x88   : > { %v407_v3 = vadd.f32 %v5342_v55, %v405_v60  ;;  %4201 = vmatpush3.bf16.msra.mxu1 %v4198_v16  ;;  %4173 = vmatpush3.bf16.msra.mxu0 %v4170_v52  ;;  %v628_v55 = vld [vmem:[%s7546_s1 + $0x50] sm:$0xff]  ;;  %v4810_v16 = vld [vmem:[%s7549_s4 + $0x80] sm:$0xff]   ;;  %v1425_v52 = vrot.slane %v1242_v29, 2 }
  0x89   : > { %4203 = vmatprep.subr.bf16.mxu1 %v4202_v51  ;;  %4175 = vmatprep.subr.bf16.mxu0 %v4174_v28  ;;  %v4178_v23 = vpack.c.bf16 %v629_v15, %v628_v55  ;;  %v1346_v37 = vsel %vm589_vm9, %v1343_v35, %v1345_v0  ;;  %v885_v59 = vunpack.c.0.s8 %v884_v58 }
  0x8a   : > { %768 = vrot.lane.b32.xlu0 %v765_v48, %s5006_s17  ;;  %779 = vrot.lane.b32.xlu1 %v776_v61, %s5007_s27  ;;  %v409_v13 = vadd.f32 %v5355_v62, %v407_v3  ;;  %v1426_v7 = vsel %vm601_vm10, %v1423_v30, %v1425_v52 }
  0x8b   : > { %v585_v62 = vld [vmem:[#allocation2 + $0x10] sm:$0x3] }
  0x8c   : > { %v411_v49 = vadd.f32 %v5358_v63, %v409_v13  ;;  %4205 = vmatpush3.bf16.msra.mxu1 %v4202_v51  ;;  %4177 = vmatpush3.bf16.msra.mxu0 %v4174_v28  ;;  %v593_v63 = vrot.slane %v585_v62, 1  ;;  %v605_v56 = vrot.slane %v585_v62, 2  ;;  %v5596_v51 = vshrl.u32 %v886_v41, 7 }
  0x8d   : > { %4179 = vmatprep.subr.bf16.mxu0 %v4178_v23  ;;  %4122 = vmatprep.subr.bf16.mxu1 %v4810_v16 }
  0x8e   : > { %v413_v4 = vadd.f32 %v5366_v5, %v411_v49  ;;  %7598 = vst [vmem:[#allocation11_spill] sm:$0xff] %v5596_v51  ;;  %v5599_v48 = vsub.s32 %v885_v59, %v5596_v51 }
  0x90   : > { %v415_v10 = vadd.f32 %v5375_v11, %v413_v4  ;;  %4181 = vmatpush3.bf16.msra.mxu0 %v4178_v23 }
  0x92   : > { %v448_v17 = vmul.f32 0.0625, %v415_v10 }
  0x94   : > { %581 = vst.msk [vmem:[#allocation2 + $0x1] sm:$0xff] %vm384_vm0, %v448_v17 }
  0x9b   : > { %v584_v24 = vld [vmem:[#allocation2 + $0x8] sm:$0xff]  ;;  %v583_v5 = vld [vmem:[#allocation2] sm:$0xff] }
  0x9c   : > { %v591_v11 = vrot.slane %v584_v24, 1  ;;  %v590_v25 = vrot.slane %v583_v5, 1  ;;  %v603_v42 = vrot.slane %v584_v24, 2  ;;  %v602_v31 = vrot.slane %v583_v5, 2 }
  0x9e   : > { %v594_v33 = vsel %vm589_vm9, %v591_v11, %v593_v63  ;;  %v592_v36 = vsel %vm589_vm9, %v590_v25, %v591_v11  ;;  %v606_v1 = vsel %vm601_vm10, %v603_v42, %v605_v56  ;;  %v604_v20 = vsel %vm601_vm10, %v602_v31, %v603_v42 }
  0x9f   : > { %597 = vrot.lane.b32.xlu1 %v594_v33, %s5006_s17  ;;  %595 = vrot.lane.b32.xlu0 %v592_v36, %s5006_s17  ;;  %v5611_v25 = vsub.s32 0, %v5596_v51 }
  0xa1   : > { %7599 = vst [vmem:[#allocation12_spill] sm:$0xff] %v5611_v25 }
  0xa3   : > { %609 = vrot.lane.b32.xlu1 %v606_v1, %s5007_s27  ;;  %607 = vrot.lane.b32.xlu0 %v604_v20, %s5007_s27 }
  0xf8   : > { %v767_v26 = vpop.permute.xlu0 %766  ;;  %v778_v57 = vpop.permute.xlu1 %777 }
  0xf9   : > { %v783_v12 = vsel %vm384_vm0, %v5514_v18, %v767_v26  ;;  %v1240_v18 = vld [vmem:[#allocation4] sm:$0xff] }
  0xfa   : > { %v785_v38 = vsel %vm615_vm11, %v783_v12, %v778_v57  ;;  %v1342_v46 = vrot.slane %v1240_v18, 1  ;;  %v1422_v50 = vrot.slane %v1240_v18, 2 }
  0xfb   : > { %4119 = vmatprep.mubr.msk.f32.mxu1 %vm630_vm12, %v785_v38 }
  0xfc   : > { %v769_v21 = vpop.permute.xlu0 %768  ;;  %v780_v43 = vpop.permute.xlu1 %779  ;;  %v1344_v14 = vsel %vm589_vm9, %v1342_v46, %v1343_v35  ;;  %v1424_v53 = vsel %vm601_vm10, %v1422_v50, %v1423_v30 }
  0xfd   : > { %v784_v19 = vsel %vm384_vm0, %v5523_v47, %v769_v21  ;;  %v4811_v47 = vld [vmem:[%s7549_s4 + $0x88] sm:$0xff]   ;;  %v4330_v8 = vpack.i.bf16 %v1346_v37, %v1344_v14  ;;  %v4335_v44 = vpack.i.bf16 %v1426_v7, %v1424_v53 }
  0xfe   : > { %v786_v22 = vsel %vm615_vm11, %v784_v19, %v780_v43 }
  0xff   : > { %4120 = vmatmul.mubr.msk.f32.vlgmr.msra.gmra.mrb[0].mxu1 %vm630_vm12, %v786_v22  ;;  %4331 = vrot.lane.b32.xlu1 %v4330_v8, %s5006_s17 }
 0x100   : > { %4123 = vmatpush3.bf16.msra.mxu1 %v4810_v16 }
 0x101   : > { %4124 = vmatprep.subr.bf16.mxu1 %v4811_v47 }
 0x103   : > { %4336 = vrot.lane.b32.xlu1 %v4335_v44, %s5007_s27 }
 0x104   : > { %4125 = vmatpush3.bf16.msra.mxu1 %v4811_v47 }
 0x111   : > { %v598_v32 = vpop.permute.xlu1 %597  ;;  %v596_v45 = vpop.permute.xlu0 %595 }
 0x112   : > { %v614_v2 = vsel %vm384_vm0, %v584_v24, %v598_v32  ;;  %v613_v27 = vsel %vm384_vm0, %v583_v5, %v596_v45 }
 0x115   : > { %v610_v6 = vpop.permute.xlu1 %609  ;;  %v608_v39 = vpop.permute.xlu0 %607 }
 0x116   : > { %v617_v34 = vsel %vm615_vm11, %v614_v2, %v610_v6  ;;  %v616_v40 = vsel %vm615_vm11, %v613_v27, %v608_v39  ;;  %v5641_v6 = vld [vmem:[%s7548_s3] ss:$0 sm:$0xff] }
 0x117   : > { %4092 = vmatprep.mubr.msk.f32.mxu0 %vm630_vm12, %v616_v40 }
 0x118   : > { %4093 = vmatmul.mubr.msk.f32.vlgmr.msra.gmra.mrb[0].mxu0 %vm630_vm12, %v617_v34 }
 0x1d2   : > { %v4121_v28 = vpop.f32.mrb[0].mxu1 }
 0x1d3   : > { %v871_v60 = vpop.f32.mrb[1].mxu1  ;;  %v938_v13 = vrot.slane %v4121_v28, %v5599_v48  ;;  %v931_v11 = vcombine.high %v4121_v28, %v4121_v28 }
 0x1d4   : > { %v882_v61 = vcombine.high %v871_v60, %v871_v60  ;;  %v889_v3 = vrot.slane %v871_v60, %v5599_v48 }
 0x1d5   : > { %v946_v10 = vcombine.high %v938_v13, %v938_v13  ;;  %v954_v23 = vrot.slane %v938_v13, %v5599_v48  ;;  %v5617_v57 = vrot.slane %v931_v11, %v5599_v48 }
 0x1d6   : > { %v896_v49 = vrot.slane %v882_v61, %v5599_v48  ;;  %v897_v4 = vcombine.high %v889_v3, %v889_v3  ;;  %v905_v15 = vrot.slane %v889_v3, %v5599_v48 }
 0x1d7   : > { %v968_v62 = vrot.slane %v946_v10, %v5599_v48  ;;  %v976_v42 = vcombine.high %v954_v23, %v954_v23  ;;  %v1015_v12 = vrot.slane %v954_v23, %v5611_v25 }
 0x1d8   : > { %v898_v55 = vcombine.high %v896_v49, %v896_v49  ;;  %v919_v17 = vrot.slane %v897_v4, %v5599_v48  ;;  %v912_v63 = vrot.slane %v896_v49, %v5599_v48  ;;  %v927_v5 = vcombine.high %v905_v15, %v905_v15 }
 0x1d9   : > { %v978_v31 = vcombine.high %v968_v62, %v968_v62  ;;  %v1019_v38 = vrot.slane %v968_v62, %v5611_v25  ;;  %v5622_v21 = vrot.slane %v976_v42, %v5611_v25  ;;  %v983_v19 = vrot.slane %v905_v15, %v5611_v25 }
 0x1da   : > { %v926_v24 = vrot.slane %v898_v55, %v5599_v48  ;;  %v929_v56 = vcombine.high %v919_v17, %v919_v17  ;;  %v928_v33 = vcombine.high %v912_v63, %v912_v63  ;;  %v987_v1 = vrot.slane %v919_v17, %v5611_v25 }
 0x1db   : > { %v991_v20 = vrot.slane %v927_v5, %v5611_v25  ;;  %v5625_v43 = vrot.slane %v978_v31, %v5611_v25  ;;  %v999_v22 = vrot.slane %v912_v63, %v5611_v25 }
 0x1dc   : > { %v930_v36 = vcombine.high %v926_v24, %v926_v24  ;;  %v995_v26 = vrot.slane %v929_v56, %v5611_v25  ;;  %v1003_v32 = vrot.slane %v926_v24, %v5611_v25  ;;  %v5631_v45 = vrot.slane %v928_v33, %v5611_v25 }
 0x1de   : > { %v5634_v2 = vrot.slane %v930_v36, %v5611_v25 }
 0x1eb   : > { %v5636_v27 = vpop.f32.mrb[0].mxu0 }
 0x1ec   : > { %v5643_v39 = vpop.f32.mrb[1].mxu0  ;;  %v1063_v34 = vadd.f32 %v5636_v27, %v987_v1  ;;  %v1061_v40 = vadd.f32 %v5636_v27, %v983_v19  ;;  %v1065_v18 = vadd.f32 %v5636_v27, %v991_v20  ;;  %v1067_v9 = vadd.f32 %v5636_v27, %v995_v26 }
 0x1ed   : > { %v1062_v16 = vadd.f32 %v987_v1, %v5643_v39  ;;  %v1060_v46 = vadd.f32 %v983_v19, %v5643_v39  ;;  %v1064_v35 = vadd.f32 %v991_v20, %v5643_v39  ;;  %v1066_v47 = vadd.f32 %v995_v26, %v5643_v39 }
 0x1ee   : > { %v1102_v50 = vadd.f32 %v5641_v6, %v1063_v34  ;;  %v1100_v30 = vadd.f32 %v5641_v6, %v1061_v40  ;;  %v1104_v29 = vadd.f32 %v5641_v6, %v1065_v18  ;;  %v1106_v14 = vadd.f32 %v5641_v6, %v1067_v9 }
 0x1ef   : > { %v1101_v0 = vadd.f32 %v5641_v6, %v1062_v16  ;;  %v1099_v52 = vadd.f32 %v5641_v6, %v1060_v46  ;;  %v1103_v37 = vadd.f32 %v5641_v6, %v1064_v35  ;;  %v1105_v53 = vadd.f32 %v5641_v6, %v1066_v47 }
 0x1f0   : > { %v1134_v7 = vmax.f32 %v1102_v50, 0.0  ;;  %v1132_v8 = vmax.f32 %v1100_v30, 0.0  ;;  %v1136_v44 = vmax.f32 %v1104_v29, 0.0  ;;  %v1138_v54 = vmax.f32 %v1106_v14, 0.0 }
 0x1f1   : > { %v1133_v58 = vmax.f32 %v1101_v0, 0.0  ;;  %v1131_v41 = vmax.f32 %v1099_v52, 0.0  ;;  %v1135_v59 = vmax.f32 %v1103_v37, 0.0  ;;  %v1137_v28 = vmax.f32 %v1105_v53, 0.0 }
 0x1f2   : > { %1211 = vst.msk [vmem:[#allocation4 + $0x39] sm:$0xff] %vm384_vm0, %v1134_v7  ;;  %1209 = vst.msk [vmem:[#allocation4 + $0x21] sm:$0xff] %vm384_vm0, %v1132_v8  ;;  %v1068_v60 = vadd.f32 %v999_v22, %v5643_v39  ;;  %v1069_v61 = vadd.f32 %v5636_v27, %v999_v22  ;;  %v1076_v3 = vadd.f32 %v1015_v12, %v5643_v39 }
 0x1f3   : > { %1213 = vst.msk [vmem:[#allocation4 + $0x51] sm:$0xff] %vm384_vm0, %v1136_v44  ;;  %1215 = vst.msk [vmem:[#allocation4 + $0x69] sm:$0xff] %vm384_vm0, %v1138_v54  ;;  %v1077_v13 = vadd.f32 %v5636_v27, %v1015_v12  ;;  %v1070_v49 = vadd.f32 %v1003_v32, %v5643_v39  ;;  %v1071_v4 = vadd.f32 %v5636_v27, %v1003_v32 }
 0x1f4   : > { %1210 = vst.msk [vmem:[#allocation4 + $0x31] sm:$0xff] %vm384_vm0, %v1133_v58  ;;  %1208 = vst.msk [vmem:[#allocation4 + $0x19] sm:$0xff] %vm384_vm0, %v1131_v41  ;;  %v1078_v10 = vadd.f32 %v1019_v38, %v5643_v39  ;;  %v1079_v55 = vadd.f32 %v5636_v27, %v1019_v38  ;;  %v1107_v15 = vadd.f32 %v5641_v6, %v1068_v60 }
 0x1f5   : > { %1212 = vst.msk [vmem:[#allocation4 + $0x49] sm:$0xff] %vm384_vm0, %v1135_v59  ;;  %1214 = vst.msk [vmem:[#allocation4 + $0x61] sm:$0xff] %vm384_vm0, %v1137_v28  ;;  %v1108_v17 = vadd.f32 %v5641_v6, %v1069_v61  ;;  %v1115_v23 = vadd.f32 %v5641_v6, %v1076_v3  ;;  %v1116_v62 = vadd.f32 %v5641_v6, %v1077_v13 }
 0x1f6   : > { %v1109_v63 = vadd.f32 %v5641_v6, %v1070_v49  ;;  %v1110_v24 = vadd.f32 %v5641_v6, %v1071_v4  ;;  %v1117_v5 = vadd.f32 %v5641_v6, %v1078_v10  ;;  %v1118_v56 = vadd.f32 %v5641_v6, %v1079_v55  ;;  %v4812_v4 = vld [vmem:[%s7549_s4 + $0x40] sm:$0xff]  }
 0x1f7   : > { %v1139_v11 = vmax.f32 %v1107_v15, 0.0  ;;  %v1140_v42 = vmax.f32 %v1108_v17, 0.0  ;;  %v1147_v31 = vmax.f32 %v1115_v23, 0.0  ;;  %v1148_v33 = vmax.f32 %v1116_v62, 0.0  ;;  %3938 = vmatprep.subr.bf16.mxu0 %v4812_v4 }
 0x1f8   : > { %v1141_v36 = vmax.f32 %v1109_v63, 0.0  ;;  %v1142_v1 = vmax.f32 %v1110_v24, 0.0  ;;  %v1149_v20 = vmax.f32 %v1117_v5, 0.0  ;;  %v1150_v26 = vmax.f32 %v1118_v56, 0.0  ;;  %v4813_v63 = vld [vmem:[%s7549_s4] sm:$0xff]  }
 0x1f9   : > { %1216 = vst.msk [vmem:[#allocation4 + $0x79] sm:$0xff] %vm384_vm0, %v1139_v11  ;;  %1217 = vst.msk [vmem:[#allocation4 + $0x81] sm:$0xff] %vm384_vm0, %v1140_v42  ;;  %v1080_v12 = vadd.f32 %v5622_v21, %v5643_v39  ;;  %v1081_v38 = vadd.f32 %v5636_v27, %v5622_v21  ;;  %v5695_v19 = vadd.f32 %v5631_v45, %v5643_v39  ;;  %v5701_v32 = vld [vmem:[#allocation4 + $0x40] sm:$0x3]  ;;  %3939 = vmatpush3.bf16.msra.mxu0 %v4813_v63 }
 0x1fa   : > { %1224 = vst.msk [vmem:[#allocation4 + $0xd9] sm:$0xff] %vm384_vm0, %v1147_v31  ;;  %1225 = vst.msk [vmem:[#allocation4 + $0xe1] sm:$0xff] %vm384_vm0, %v1148_v33  ;;  %v5699_v22 = vadd.f32 %v5636_v27, %v5631_v45  ;;  %v5703_v34 = vld [vmem:[#allocation4 + $0x58] sm:$0x3]  ;;  %v5705_v40 = vld [vmem:[#allocation4 + $0x70] sm:$0x3]  ;;  %v5713_v21 = vadd.f32 %v5634_v2, %v5643_v39  ;;  %v5717_v45 = vadd.f32 %v5636_v27, %v5634_v2 }
 0x1fb   : > { %7600 = vst [vmem:[#allocation13_spill] sm:$0xff] %v5705_v40  ;;  %1218 = vst.msk [vmem:[#allocation4 + $0x91] sm:$0xff] %vm384_vm0, %v1141_v36  ;;  %v5721_v18 = vadd.f32 %v5625_v43, %v5643_v39  ;;  %v5725_v9 = vadd.f32 %v5636_v27, %v5625_v43  ;;  %v947_v16 = vcombine.high %v5617_v57, %v5617_v57  ;;  %v5729_v46 = vld [vmem:[#allocation4 + $0x30] sm:$0xff]  ;;  %v5731_v35 = vld [vmem:[#allocation4 + $0x38] sm:$0xff]  ;;  %v1435_v2 = vrot.slane %v5701_v32, 2 }
 0x1fc   : > { %1219 = vst.msk [vmem:[#allocation4 + $0x99] sm:$0xff] %vm384_vm0, %v1142_v1  ;;  %1226 = vst.msk [vmem:[#allocation4 + $0xf1] sm:$0xff] %vm384_vm0, %v1149_v20  ;;  %v5733_v47 = vld [vmem:[#allocation4 + $0x18] sm:$0xff]  ;;  %v1440_v50 = vrot.slane %v5703_v34, 2  ;;  %v4340_v30 = vpack.i.bf16 %v5731_v35, %v5729_v46  ;;  %v5739_v29 = vld [vmem:[#allocation4 + $0x20] sm:$0xff]  ;;  %v1432_v43 = vrot.slane %v5729_v46, 2  ;;  %v1119_v58 = vadd.f32 %v5641_v6, %v1080_v12 }
 0x1fd   : > { %1227 = vst.msk [vmem:[#allocation4 + $0xf9] sm:$0xff] %vm384_vm0, %v1150_v26  ;;  %v1433_v14 = vrot.slane %v5731_v35, 2  ;;  %v5743_v0 = vld [vmem:[#allocation4 + $0x48] sm:$0xff]  ;;  %v5745_v52 = vld [vmem:[#allocation4 + $0x50] sm:$0xff]  ;;  %v1445_v37 = vrot.slane %v5705_v40, 2  ;;  %v4345_v53 = vpack.i.bf16 %v5739_v29, %v5733_v47  ;;  %v5752_v44 = vld [vmem:[#allocation4 + $0x60] sm:$0xff]  ;;  %v1120_v62 = vadd.f32 %v5641_v6, %v1081_v38 }
 0x1fe   : > { %v1438_v7 = vrot.slane %v5745_v52, 2  ;;  %v1437_v8 = vrot.slane %v5743_v0, 2  ;;  %7601 = vst [vmem:[#allocation14_spill] sm:$0xff] %v5752_v44  ;;  %v5754_v54 = vld [vmem:[#allocation4 + $0x68] sm:$0xff]  ;;  %4341 = vrot.lane.b32.xlu0 %v4340_v30, %s5007_s27  ;;  %v1442_v28 = vrot.slane %v5752_v44, 2  ;;  %v4350_v3 = vpack.i.bf16 %v5745_v52, %v5743_v0 }
 0x1ff   : > { %7602 = vst [vmem:[#allocation15_spill] sm:$0xff] %v5754_v54  ;;  %v5759_v41 = vsel %vm601_vm10, %v1432_v43, %v1433_v14  ;;  %v5762_v59 = vsel %vm601_vm10, %v1433_v14, %v1435_v2  ;;  %v1443_v60 = vrot.slane %v5754_v54, 2  ;;  %4346 = vrot.lane.b32.xlu1 %v4345_v53, %s5009_s23  ;;  %v961_v20 = vrot.slane %v5617_v57, %v5599_v48  ;;  %v4814_v2 = vld [vmem:[%s7549_s4 + $0x48] sm:$0xff]  }
 0x200   : > { %v2362_v61 = vpack.c.bf16 %v5762_v59, %v5759_v41  ;;  %v5772_v13 = vsel %vm601_vm10, %v1437_v8, %v1438_v7  ;;  %v5775_v49 = vsel %vm601_vm10, %v1438_v7, %v1440_v50  ;;  %v5788_v17 = vld [vmem:[#allocation4 + $0x78] sm:$0xff]  ;;  %v5790_v23 = vld [vmem:[#allocation4 + $0x80] sm:$0xff]  ;;  %v5799_v5 = vld [vmem:[#allocation4 + $0x88] sm:$0x3]  ;;  %v975_v26 = vrot.slane %v947_v16, %v5599_v48  ;;  %3940 = vmatprep.subr.bf16.mxu0 %v4814_v2 }
 0x201   : > { %v2365_v10 = vpack.c.bf16 %v5775_v49, %v5772_v13  ;;  %v5783_v55 = vsel %vm601_vm10, %v1442_v28, %v1443_v60  ;;  %v5786_v15 = vsel %vm601_vm10, %v1443_v60, %v1445_v37  ;;  %v1447_v56 = vrot.slane %v5788_v17, 2  ;;  %v4815_v48 = vld [vmem:[%s7549_s4 + $0x8] sm:$0xff]   ;;  %v5830_v16 = vld [vmem:[#allocation4 + $0xe0] sm:$0xff] }
 0x202   : > { %4126 = vmatprep.mubr.msk.bf16.mxu1 %vm384_vm0, %v2362_v61  ;;  %v2368_v24 = vpack.c.bf16 %v5786_v15, %v5783_v55  ;;  %v1448_v11 = vrot.slane %v5790_v23, 2  ;;  %v5803_v42 = vld [vmem:[#allocation4 + $0x90] sm:$0xff]  ;;  %4351 = vrot.lane.b32.xlu0 %v4350_v3, %s5007_s27  ;;  %v1450_v31 = vrot.slane %v5799_v5, 2  ;;  %v4365_v50 = vpack.i.bf16 %v5790_v23, %v5788_v17  ;;  %v5828_v57 = vld [vmem:[#allocation4 + $0xd8] sm:$0xff] }
 0x203   : > { %7603 = vst [vmem:[#allocation16_spill] sm:$0xff] %v5803_v42  ;;  %4127 = vmatmul.mubr.msk.bf16.vlgmr.msra.gmra.mrb[4].mxu1 %vm384_vm0, %v2365_v10  ;;  %v5808_v33 = vld [vmem:[#allocation4 + $0x98] sm:$0xff]  ;;  %v5810_v36 = vld [vmem:[#allocation4 + $0xa0] sm:$0x3]  ;;  %v1452_v1 = vrot.slane %v5803_v42, 2  ;;  %4356 = vrot.lane.b32.xlu1 %v4340_v30, %s5009_s23  ;;  %v1151_v43 = vmax.f32 %v1119_v58, 0.0  ;;  %v1111_v53 = vadd.f32 %v5641_v6, %v5695_v19  ;;  %v1112_v58 = vadd.f32 %v5641_v6, %v5699_v22 }
 0x204   : > { %7604 = vst [vmem:[#allocation17_spill] sm:$0xff] %v5808_v33  ;;  %7605 = vst [vmem:[#allocation18_spill] sm:$0xff] %v5810_v36  ;;  %4130 = vmatprep.mubr.msk.bf16.mxu1 %vm384_vm0, %v2368_v24  ;;  %v1453_v12 = vrot.slane %v5808_v33, 2  ;;  %v1455_v38 = vrot.slane %v5810_v36, 2  ;;  %v1152_v14 = vmax.f32 %v1120_v62, 0.0  ;;  %v5833_v30 = vsel %vm601_vm10, %v1447_v56, %v1448_v11  ;;  %v4816_v10 = vld [vmem:[%s7549_s4 + $0x50] sm:$0xff]   ;;  %3941 = vmatpush3.bf16.msra.mxu0 %v4815_v48 }
 0x205   : > { %v5836_v37 = vsel %vm601_vm10, %v1448_v11, %v1450_v31  ;;  %1228 = vst.msk [vmem:[#allocation4 + $0x109] sm:$0xff] %vm384_vm0, %v1151_v43  ;;  %v1113_v28 = vadd.f32 %v5641_v6, %v5713_v21  ;;  %v977_v19 = vcombine.high %v961_v20, %v961_v20  ;;  %v979_v60 = vcombine.high %v975_v26, %v975_v26  ;;  %v5868_v24 = vld [vmem:[#allocation4 + $0xf0] sm:$0xff]  ;;  %v5870_v56 = vld [vmem:[#allocation4 + $0xf8] sm:$0xff]  ;;  %v4819_v43 = vld [vmem:[%s7549_s4 + $0x18] sm:$0xff]  }
 0x206   : > { %4366 = vrot.lane.b32.xlu0 %v4365_v50, %s5007_s27  ;;  %v5842_v7 = vsel %vm601_vm10, %v1452_v1, %v1453_v12  ;;  %v5845_v8 = vsel %vm601_vm10, %v1453_v12, %v1455_v38  ;;  %1229 = vst.msk [vmem:[#allocation4 + $0x111] sm:$0xff] %vm384_vm0, %v1152_v14  ;;  %v1143_v61 = vmax.f32 %v1111_v53, 0.0  ;;  %v1114_v4 = vadd.f32 %v5641_v6, %v5717_v45  ;;  %v5886_v12 = vld [vmem:[#allocation4 + $0xe8] sm:$0x3] }
 0x207   : > { %4361 = vrot.lane.b32.xlu1 %v4350_v3, %s5009_s23  ;;  %v4375_v62 = vpack.i.bf16 %v5830_v16, %v5828_v57  ;;  %v2371_v22 = vpack.c.bf16 %v5836_v37, %v5833_v30  ;;  %v1144_v63 = vmax.f32 %v1112_v58, 0.0  ;;  %v1145_v21 = vmax.f32 %v1113_v28, 0.0  ;;  %v4817_v3 = vld [vmem:[%s7549_s4 + $0x10] sm:$0xff]   ;;  %7606 = vst [vmem:[#allocation19_spill] sm:$0xff] %v5868_v24  ;;  %7607 = vst [vmem:[#allocation20_spill] sm:$0xff] %v5870_v56  ;;  %v4818_v38 = vld [vmem:[%s7549_s4 + $0x58] sm:$0xff]  }
 0x208   : > { %v2374_v45 = vpack.c.bf16 %v5845_v8, %v5842_v7  ;;  %1220 = vst.msk [vmem:[#allocation4 + $0xa9] sm:$0xff] %vm384_vm0, %v1143_v61  ;;  %v1146_v11 = vmax.f32 %v1114_v4, 0.0  ;;  %3942 = vmatprep.subr.bf16.mxu0 %v4816_v10  ;;  %v5878_v31 = vrot.slane %v961_v20, %v5611_v25  ;;  %v5881_v1 = vrot.slane %v975_v26, %v5611_v25 }
 0x209   : > { %1221 = vst.msk [vmem:[#allocation4 + $0xb1] sm:$0xff] %vm384_vm0, %v1144_v63  ;;  %1222 = vst.msk [vmem:[#allocation4 + $0xc1] sm:$0xff] %vm384_vm0, %v1145_v21  ;;  %v5892_v2 = vrot.slane %v977_v19, %v5611_v25  ;;  %v5895_v20 = vrot.slane %v979_v60, %v5611_v25  ;;  %v5899_v26 = vpack.i.bf16 %v5870_v56, %v5868_v24  ;;  %3943 = vmatpush3.bf16.msra.mxu0 %v4817_v3  ;;  %v5914_v19 = vld [vmem:[#allocation4 + $0x28] sm:$0x3]  ;;  %v4820_v3 = vld [vmem:[%s7549_s4 + $0x60] sm:$0xff]  }
 0x20a   : > { %4376 = vrot.lane.b32.xlu0 %v4375_v62, %s5007_s27  ;;  %1223 = vst.msk [vmem:[#allocation4 + $0xc9] sm:$0xff] %vm384_vm0, %v1146_v11  ;;  %v4400_v53 = vpack.i.bf16 %v5754_v54, %v5752_v44  ;;  %v1467_v58 = vrot.slane %v5828_v57, 2  ;;  %v1468_v28 = vrot.slane %v5830_v16, 2  ;;  %3944 = vmatprep.subr.bf16.mxu0 %v4818_v38  ;;  %v5920_v60 = vpack.i.bf16 %v5808_v33, %v5803_v42 }
 0x20b   : > { %4131 = vmatmul.mubr.msk.bf16.gmra.mrb[8].mxu1 %vm384_vm0, %v2371_v22  ;;  %4371 = vrot.lane.b32.xlu1 %v4365_v50, %s5009_s23  ;;  %7608 = vst [vmem:[#allocation21_spill] sm:$0xff] %v5899_v26  ;;  %v5901_v50 = vld [vmem:[#allocation4 + $0x100] sm:$0x3]  ;;  %v1470_v61 = vrot.slane %v5886_v12, 2  ;;  %v1472_v4 = vrot.slane %v5868_v24, 2  ;;  %v1473_v10 = vrot.slane %v5870_v56, 2  ;;  %v1121_v21 = vadd.f32 %v5641_v6, %v5721_v18 }
 0x20c   : > { %4134 = vmatprep.mubr.msk.bf16.mxu1 %vm384_vm0, %v2374_v45  ;;  %7609 = vst [vmem:[#allocation22_spill] sm:$0xff] %v5901_v50  ;;  %v5906_v14 = vld [vmem:[#allocation4 + $0x108] sm:$0xff]  ;;  %v1475_v22 = vrot.slane %v5901_v50, 2  ;;  %v1347_v63 = vrot.slane %v5733_v47, 1  ;;  %v1350_v38 = vrot.slane %v5914_v19, 1  ;;  %v1122_v25 = vadd.f32 %v5641_v6, %v5725_v9  ;;  %v4821_v18 = vld [vmem:[%s7549_s4 + $0x20] sm:$0xff]  }
 0x20d   : > { %v5908_v48 = vld [vmem:[#allocation4 + $0x110] sm:$0xff]  ;;  %3945 = vmatpush3.bf16.msra.mxu0 %v4819_v43  ;;  %v1153_v40 = vmax.f32 %v1121_v21, 0.0  ;;  %v1084_v9 = vadd.f32 %v5878_v31, %v5643_v39 }
 0x20e   : > { %4381 = vrot.lane.b32.xlu0 %v5899_v26, %s5007_s27  ;;  %v5935_v45 = vpack.i.bf16 %v5908_v48, %v5906_v14  ;;  %v5954_v26 = vsel %vm601_vm10, %v1467_v58, %v1468_v28  ;;  %3946 = vmatprep.subr.bf16.mxu0 %v4820_v3  ;;  %v5968_v58 = vsel %vm601_vm10, %v1468_v28, %v1470_v61 }
 0x20f   : > { %4386 = vrot.lane.b32.xlu1 %v4375_v62, %s5009_s23  ;;  %v5937_v11 = vld [vmem:[#allocation4 + $0xa8] sm:$0xff]  ;;  %v1348_v62 = vrot.slane %v5739_v29, 1  ;;  %1230 = vst.msk [vmem:[#allocation4 + $0x121] sm:$0xff] %vm384_vm0, %v1153_v40 }
 0x210   : > { %7610 = vst [vmem:[#allocation23_spill] sm:$0xff] %v5935_v45  ;;  %7611 = vst [vmem:[#allocation24_spill] sm:$0xff] %v5937_v11  ;;  %v5946_v51 = vld [vmem:[#allocation4 + $0xb0] sm:$0xff]  ;;  %v5948_v36 = vld [vmem:[#allocation4 + $0xb8] sm:$0x3]  ;;  %v1457_v33 = vrot.slane %v5937_v11, 2 }
 0x211   : > { %7612 = vst [vmem:[#allocation25_spill] sm:$0xff] %v5946_v51  ;;  %7613 = vst [vmem:[#allocation26_spill] sm:$0xff] %v5948_v36  ;;  %v5951_v42 = vld [vmem:[#allocation4 + $0xc0] sm:$0xff]  ;;  %v1458_v43 = vrot.slane %v5946_v51, 2  ;;  %v1460_v54 = vrot.slane %v5948_v36, 2  ;;  %v5962_v44 = vld [vmem:[#allocation4 + $0xc8] sm:$0xff]  ;;  %v5977_v36 = vsel %vm601_vm10, %v1473_v10, %v1475_v22  ;;  %v5987_v61 = vsel %vm589_vm9, %v1347_v63, %v1348_v62  ;;  %3947 = vmatpush3.bf16.msra.mxu0 %v4821_v18 }
 0x212   : > { %4391 = vrot.lane.b32.xlu0 %v5935_v45, %s5007_s27  ;;  %7614 = vst [vmem:[#allocation27_spill] sm:$0xff] %v5962_v44  ;;  %v5964_v50 = vld [vmem:[#allocation4 + $0xd0] sm:$0x3]  ;;  %v1462_v56 = vrot.slane %v5951_v42, 2  ;;  %v1463_v21 = vrot.slane %v5962_v44, 2  ;;  %v5974_v45 = vsel %vm601_vm10, %v1472_v4, %v1473_v10  ;;  %7616 = vst [vmem:[#allocation29_spill] sm:$0xff] %v5987_v61  ;;  %v1085_v18 = vadd.f32 %v5636_v27, %v5878_v31 }
 0x213   : > { %7615 = vst [vmem:[#allocation28_spill] sm:$0xff] %v5964_v50  ;;  %4401 = vrot.lane.b32.xlu1 %v4400_v53, %s5009_s23  ;;  %v1465_v3 = vrot.slane %v5964_v50, 2  ;;  %v5981_v24 = vsel %vm601_vm10, %v1457_v33, %v1458_v43  ;;  %v5984_v28 = vsel %vm601_vm10, %v1458_v43, %v1460_v54  ;;  %v1154_v44 = vmax.f32 %v1122_v25, 0.0  ;;  %v4822_v4 = vld [vmem:[%s7549_s4 + $0x68] sm:$0xff]  }
 0x214   : > { %v4823_v10 = vld [vmem:[%s7549_s4 + $0x28] sm:$0xff]   ;;  %v2377_v40 = vpack.c.bf16 %v5984_v28, %v5981_v24  ;;  %v5998_v33 = vsel %vm601_vm10, %v1462_v56, %v1463_v21  ;;  %v6004_v25 = vsel %vm589_vm9, %v1348_v62, %v1350_v38  ;;  %v1427_v63 = vrot.slane %v5733_v47, 2  ;;  %3948 = vmatprep.subr.bf16.mxu0 %v4822_v4 }
 0x215   : > { %v6001_v54 = vsel %vm601_vm10, %v1463_v21, %v1465_v3  ;;  %7617 = vst [vmem:[#allocation30_spill] sm:$0xff] %v6004_v25  ;;  %1231 = vst.msk [vmem:[#allocation4 + $0x129] sm:$0xff] %vm384_vm0, %v1154_v44  ;;  %v1123_v56 = vadd.f32 %v5641_v6, %v1084_v9  ;;  %v2383_v62 = vpack.c.bf16 %v5968_v58, %v5954_v26  ;;  %v6021_v47 = vld [vmem:[#allocation4 + $0x118] sm:$0x3]  ;;  %v1428_v44 = vrot.slane %v5739_v29, 2  ;;  %v4824_v3 = vld [vmem:[%s7549_s4 + $0x70] sm:$0xff]  }
 0x216   : > { %v2380_v22 = vpack.c.bf16 %v6001_v54, %v5998_v33  ;;  %4396 = vrot.lane.b32.xlu0 %v4400_v53, %s5007_s27  ;;  %4135 = vmatmul.mubr.msk.bf16.gmra.mrb[12].mxu1 %vm384_vm0, %v2377_v40  ;;  %v2386_v53 = vpack.c.bf16 %v5977_v36, %v5974_v45  ;;  %v1430_v31 = vrot.slane %v5914_v19, 2  ;;  %v4440_v38 = vpack.i.bf16 %v6004_v25, %v5987_v61  ;;  %v4825_v29 = vld [vmem:[%s7549_s4 + $0x30] sm:$0xff]  }
 0x217   : > { %4416 = vrot.lane.b32.xlu1 %v5920_v60, %s5009_s23  ;;  %v1124_v9 = vadd.f32 %v5641_v6, %v1085_v18  ;;  %v1155_v43 = vmax.f32 %v1123_v56, 0.0  ;;  %v1086_v21 = vadd.f32 %v5881_v1, %v5643_v39  ;;  %3949 = vmatpush3.bf16.msra.mxu0 %v4823_v10  ;;  %v4420_v19 = vpack.i.bf16 %v5946_v51, %v5937_v11  ;;  %v6053_v50 = vld [vmem:[#allocation4 + $0x120] sm:$0xff] }
 0x218   : > { %4138 = vmatprep.mubr.msk.bf16.mxu1 %vm384_vm0, %v2380_v22  ;;  %v1477_v4 = vrot.slane %v5906_v14, 2  ;;  %v1478_v40 = vrot.slane %v5908_v48, 2  ;;  %v1087_v22 = vadd.f32 %v5636_v27, %v5881_v1  ;;  %v1480_v10 = vrot.slane %v6021_v47, 2  ;;  %3950 = vmatprep.subr.bf16.mxu0 %v4824_v3 }
 0x219   : > { %v1156_v18 = vmax.f32 %v1124_v9, 0.0  ;;  %1232 = vst.msk [vmem:[#allocation4 + $0x139] sm:$0xff] %vm384_vm0, %v1155_v43  ;;  %v1125_v56 = vadd.f32 %v5641_v6, %v1086_v21  ;;  %v1088_v61 = vadd.f32 %v5892_v2, %v5643_v39  ;;  %v1429_v25 = vsel %vm601_vm10, %v1427_v63, %v1428_v44  ;;  %v4826_v63 = vld [vmem:[%s7549_s4 + $0x78] sm:$0xff]  }
 0x21a   : > { %4406 = vrot.lane.b32.xlu0 %v5920_v60, %s5007_s27  ;;  %v1431_v1 = vsel %vm601_vm10, %v1428_v44, %v1430_v31  ;;  %v1126_v60 = vadd.f32 %v5641_v6, %v1087_v22  ;;  %v1089_v9 = vadd.f32 %v5636_v27, %v5892_v2  ;;  %v1352_v43 = vrot.slane %v5729_v46, 1  ;;  %v4827_v44 = vld [vmem:[%s7549_s4 + $0x38] sm:$0xff]  }
 0x21b   : > { %4421 = vrot.lane.b32.xlu1 %v4420_v19, %s5009_s23  ;;  %1233 = vst.msk [vmem:[#allocation4 + $0x141] sm:$0xff] %vm384_vm0, %v1156_v18  ;;  %v1157_v21 = vmax.f32 %v1125_v56, 0.0  ;;  %v1127_v3 = vadd.f32 %v5641_v6, %v1088_v61  ;;  %3951 = vmatpush3.bf16.msra.mxu0 %v4825_v29  ;;  %v1353_v46 = vrot.slane %v5731_v35, 1  ;;  %v1355_v2 = vrot.slane %v5701_v32, 1 }
 0x21c   : > { %v6067_v31 = vld [vmem:[#allocation4 + $0x128] sm:$0xff]  ;;  %v6069_v22 = vld [vmem:[#allocation4 + $0x130] sm:$0x3]  ;;  %v1158_v18 = vmax.f32 %v1126_v60, 0.0  ;;  %v1128_v61 = vadd.f32 %v5641_v6, %v1089_v9  ;;  %v6076_v29 = vsel %vm601_vm10, %v1477_v4, %v1478_v40  ;;  %v1482_v56 = vrot.slane %v6053_v50, 2  ;;  %3952 = vmatprep.subr.bf16.mxu0 %v4826_v63 }
 0x21d   : > { %v1483_v51 = vrot.slane %v6067_v31, 2  ;;  %1234 = vst.msk [vmem:[#allocation4 + $0x151] sm:$0xff] %vm384_vm0, %v1157_v21  ;;  %v1159_v11 = vmax.f32 %v1127_v3, 0.0  ;;  %v1485_v32 = vrot.slane %v6069_v22, 2  ;;  %v1091_v4 = vadd.f32 %v5636_v27, %v5895_v20 }
 0x21e   : > { %4411 = vrot.lane.b32.xlu0 %v4420_v19, %s5007_s27  ;;  %4139 = vmatmul.mubr.msk.bf16.gmra.mrb[16].mxu1 %vm384_vm0, %v2383_v62  ;;  %1235 = vst.msk [vmem:[#allocation4 + $0x159] sm:$0xff] %vm384_vm0, %v1158_v18  ;;  %v1160_v35 = vmax.f32 %v1128_v61, 0.0  ;;  %v1090_v19 = vadd.f32 %v5895_v20, %v5643_v39  ;;  %v6091_v60 = vsel %vm601_vm10, %v1478_v40, %v1480_v10  ;;  %v1357_v3 = vrot.slane %v5743_v0, 1 }
 0x21f   : > { %4441 = vrot.lane.b32.xlu1 %v4440_v38, %s5006_s17  ;;  %4142 = vmatprep.mubr.msk.bf16.mxu1 %vm384_vm0, %v2386_v53  ;;  %v4425_v9 = vpack.i.bf16 %v1431_v1, %v1429_v25  ;;  %1236 = vst.msk [vmem:[#allocation4 + $0x169] sm:$0xff] %vm384_vm0, %v1159_v11  ;;  %v6095_v62 = vsel %vm589_vm9, %v1352_v43, %v1353_v46  ;;  %v1360_v63 = vrot.slane %v5703_v34, 1 }
 0x220   : > { %3953 = vmatpush3.bf16.msra.mxu0 %v4827_v44  ;;  %v6098_v38 = vsel %vm589_vm9, %v1353_v46, %v1355_v2  ;;  %1237 = vst.msk [vmem:[#allocation4 + $0x171] sm:$0xff] %vm384_vm0, %v1160_v35  ;;  %v1129_v39 = vadd.f32 %v5641_v6, %v1090_v19  ;;  %v1130_v27 = vadd.f32 %v5641_v6, %v1091_v4  ;;  %v6111_v25 = vld [vmem:[#allocation4 + $0x138] sm:$0xff] }
 0x221   : > { %v6106_v20 = vsel %vm601_vm10, %v1482_v56, %v1483_v51  ;;  %v6109_v11 = vsel %vm601_vm10, %v1483_v51, %v1485_v32  ;;  %v2389_v6 = vpack.c.bf16 %v6091_v60, %v6076_v29  ;;  %v4430_v43 = vpack.i.bf16 %v6098_v38, %v6095_v62 }
 0x222   : > { %4426 = vrot.lane.b32.xlu0 %v4425_v9, %s5006_s17  ;;  %v6113_v53 = vld [vmem:[#allocation4 + $0x140] sm:$0xff]  ;;  %v6115_v40 = vld [vmem:[#allocation4 + $0x148] sm:$0x3]  ;;  %v1161_v10 = vmax.f32 %v1129_v39, 0.0  ;;  %v1162_v1 = vmax.f32 %v1130_v27, 0.0  ;;  %v1358_v51 = vrot.slane %v5745_v52, 1  ;;  %v2392_v44 = vpack.c.bf16 %v6109_v11, %v6106_v20 }
 0x223   : > { %4446 = vrot.lane.b32.xlu1 %v4425_v9, %s5007_s27  ;;  %v1487_v46 = vrot.slane %v6111_v25, 2  ;;  %v1488_v2 = vrot.slane %v6113_v53, 2  ;;  %v1490_v18 = vrot.slane %v6115_v40, 2  ;;  %v4435_v32 = vpack.i.bf16 %v5762_v59, %v5759_v41 }
 0x224   : > { %v6121_v21 = vld [vmem:[#allocation4 + $0x150] sm:$0xff]  ;;  %1238 = vst.msk [vmem:[#allocation4 + $0x181] sm:$0xff] %vm384_vm0, %v1161_v10  ;;  %1239 = vst.msk [vmem:[#allocation4 + $0x189] sm:$0xff] %vm384_vm0, %v1162_v1  ;;  %v6147_v35 = vsel %vm589_vm9, %v1357_v3, %v1358_v51  ;;  %v6150_v19 = vsel %vm589_vm9, %v1358_v51, %v1360_v63  ;;  %v1367_v63 = vrot.slane %v5788_v17, 1 }
 0x225   : > { %v6134_v0 = vld [vmem:[#allocation4 + $0x158] sm:$0xff]  ;;  %v6136_v52 = vld [vmem:[#allocation4 + $0x160] sm:$0x3]  ;;  %v1492_v34 = vrot.slane %v6121_v21, 2  ;;  %7618 = vst [vmem:[#allocation31_spill] sm:$0xff] %v6147_v35  ;;  %7619 = vst [vmem:[#allocation32_spill] sm:$0xff] %v6150_v19  ;;  %v1489_v4 = vsel %vm601_vm10, %v1487_v46, %v1488_v2  ;;  %v1491_v9 = vsel %vm601_vm10, %v1488_v2, %v1490_v18  ;;  %v4450_v1 = vpack.i.bf16 %v6150_v19, %v6147_v35 }
 0x226   : > { %4431 = vrot.lane.b32.xlu0 %v4430_v43, %s5009_s23  ;;  %4143 = vmatmul.mubr.msk.bf16.gmra.mrb[20].mxu1 %vm384_vm0, %v2389_v6  ;;  %v1493_v61 = vrot.slane %v6134_v0, 2  ;;  %v1495_v56 = vrot.slane %v6136_v52, 2  ;;  %v6162_v41 = vld [vmem:[#allocation4 + $0x168] sm:$0xff]  ;;  %v2395_v51 = vpack.c.bf16 %v1491_v9, %v1489_v4  ;;  %v1370_v46 = vrot.slane %v5799_v5, 1 }
 0x227   : > { %4461 = vrot.lane.b32.xlu1 %v4430_v43, %s5006_s17  ;;  %4146 = vmatprep.mubr.msk.bf16.mxu1 %vm384_vm0, %v2392_v44  ;;  %v6164_v59 = vld [vmem:[#allocation4 + $0x170] sm:$0xff]  ;;  %v6166_v10 = vld [vmem:[#allocation4 + $0x178] sm:$0x3]  ;;  %v1368_v44 = vrot.slane %v5790_v23, 1  ;;  %v1497_v18 = vrot.slane %v6162_v41, 2 }
 0x228   : > { %v6157_v39 = vsel %vm601_vm10, %v1492_v34, %v1493_v61  ;;  %v6160_v27 = vsel %vm601_vm10, %v1493_v61, %v1495_v56  ;;  %v1498_v34 = vrot.slane %v6164_v59, 2  ;;  %v1500_v61 = vrot.slane %v6166_v10, 2 }
 0x229   : > { %v2398_v2 = vpack.c.bf16 %v6160_v27, %v6157_v39  ;;  %v6192_v56 = vpack.i.bf16 %v5786_v15, %v5783_v55  ;;  %v6198_v35 = vsel %vm589_vm9, %v1367_v63, %v1368_v44 }
 0x22a   : > { %4436 = vrot.lane.b32.xlu0 %v4435_v32, %s5006_s17  ;;  %v1501_v19 = vsel %vm601_vm10, %v1498_v34, %v1500_v61  ;;  %v6272_v61 = vpack.i.bf16 %v6160_v27, %v6157_v39 }
 0x22b   : > { %4466 = vrot.lane.b32.xlu1 %v4435_v32, %s5007_s27  ;;  %v6170_v6 = vld [vmem:[#allocation4 + $0x180] sm:$0xff]  ;;  %v6172_v43 = vld [vmem:[#allocation4 + $0x188] sm:$0xff]  ;;  %v6174_v3 = vld [vmem:[#allocation4 + $0x190] sm:$0x3]  ;;  %v4455_v32 = vpack.i.bf16 %v5775_v49, %v5772_v13  ;;  %v6215_v13 = vpack.i.bf16 %v5845_v8, %v5842_v7  ;;  %v4485_v7 = vpack.i.bf16 %v5836_v37, %v5833_v30  ;;  %v1387_v8 = vrot.slane %v5828_v57, 1 }
 0x22c   : > { %v1542_v17 = vrot.slane %v6170_v6, 2  ;;  %v1543_v23 = vrot.slane %v6172_v43, 2  ;;  %v1545_v5 = vrot.slane %v6174_v3, 2  ;;  %v7620_v30 = vld [vmem:[#allocation27_spill] sm:$0xff]  ;;  %v6252_v57 = vpack.i.bf16 %v6109_v11, %v6106_v20  ;;  %v7623_v11 = vld [vmem:[#allocation22_spill] sm:$0xff] }
 0x22d   : > { %v4500_v37 = vpack.i.bf16 %v7620_v30, %v5951_v42  ;;  %v1505_v39 = vrot.slane %v6170_v6, 1  ;;  %v1506_v27 = vrot.slane %v6172_v43, 1 }
 0x22e   : > { %4451 = vrot.lane.b32.xlu0 %v4450_v1, %s5009_s23  ;;  %4147 = vmatmul.mubr.msk.bf16.gmra.mrb[24].mxu1 %vm384_vm0, %v2395_v51  ;;  %v1499_v51 = vsel %vm601_vm10, %v1497_v18, %v1498_v34  ;;  %v6208_v55 = vsel %vm601_vm10, %v1542_v17, %v1543_v23  ;;  %v6211_v15 = vsel %vm601_vm10, %v1543_v23, %v1545_v5  ;;  %v1388_v18 = vrot.slane %v5830_v16, 1 }
 0x22f   : > { %4471 = vrot.lane.b32.xlu1 %v4450_v1, %s5006_s17  ;;  %4150 = vmatprep.mubr.msk.bf16.mxu1 %vm384_vm0, %v2398_v2  ;;  %v6201_v1 = vsel %vm589_vm9, %v1368_v44, %v1370_v46  ;;  %v2401_v63 = vpack.c.bf16 %v1501_v19, %v1499_v51  ;;  %v2404_v44 = vpack.c.bf16 %v6211_v15, %v6208_v55  ;;  %v1395_v34 = vrot.slane %v7623_v11, 1 }
 0x230   : > { %v4480_v49 = vpack.i.bf16 %v6201_v1, %v6198_v35  ;;  %v6224_v46 = vpack.i.bf16 %v5984_v28, %v5981_v24  ;;  %v6228_v2 = vpack.i.bf16 %v5977_v36, %v5974_v45  ;;  %v1390_v24 = vrot.slane %v5886_v12, 1 }
 0x231   : > { %v6240_v28 = vpack.i.bf16 %v6001_v54, %v5998_v33  ;;  %v6246_v36 = vpack.i.bf16 %v6091_v60, %v6076_v29  ;;  %v6255_v16 = vsel %vm589_vm9, %v1387_v8, %v1388_v18  ;;  %v6262_v45 = vpack.i.bf16 %v1491_v9, %v1489_v4  ;;  %v7621_v54 = vld [vmem:[#allocation19_spill] sm:$0xff]  ;;  %v7622_v60 = vld [vmem:[#allocation20_spill] sm:$0xff] }
 0x232   : > { %4456 = vrot.lane.b32.xlu0 %v4455_v32, %s5006_s17  ;;  %v6258_v12 = vsel %vm589_vm9, %v1388_v18, %v1390_v24  ;;  %v1392_v29 = vrot.slane %v7621_v54, 1  ;;  %v1393_v20 = vrot.slane %v7622_v60, 1  ;;  %v4515_v4 = vpack.i.bf16 %v5968_v58, %v5954_v26 }
 0x233   : > { %4476 = vrot.lane.b32.xlu1 %v4455_v32, %s5007_s27  ;;  %v4505_v33 = vpack.i.bf16 %v6258_v12, %v6255_v16  ;;  %v6277_v9 = vpack.i.bf16 %v1501_v19, %v1499_v51  ;;  %v6287_v5 = vpack.i.bf16 %v6172_v43, %v6170_v6  ;;  %v1508_v26 = vrot.slane %v6174_v3, 1  ;;  %v7627_v51 = vld [vmem:[#allocation14_spill] sm:$0xff]  ;;  %v7629_v6 = vld [vmem:[#allocation13_spill] sm:$0xff] }
 0x234   : > { %v6280_v17 = vsel %vm589_vm9, %v1392_v29, %v1393_v20  ;;  %v6283_v23 = vsel %vm589_vm9, %v1393_v20, %v1395_v34  ;;  %v6299_v32 = vsel %vm589_vm9, %v1505_v39, %v1506_v27  ;;  %v7630_v3 = vld [vmem:[#allocation21_spill] sm:$0xff]  ;;  %v1400_v54 = vrot.slane %v6021_v47, 1  ;;  %v7631_v29 = vld [vmem:[#allocation16_spill] sm:$0xff]  ;;  %v7633_v34 = vld [vmem:[#allocation18_spill] sm:$0xff] }
 0x235   : > { %7624 = vst [vmem:[#allocation27_spill] sm:$0xff] %v6280_v17  ;;  %7625 = vst [vmem:[#allocation19_spill] sm:$0xff] %v6283_v23  ;;  %v4520_v19 = vpack.i.bf16 %v6283_v23, %v6280_v17  ;;  %v6305_v43 = vsel %vm589_vm9, %v1506_v27, %v1508_v26  ;;  %v1372_v60 = vrot.slane %v7631_v29, 1  ;;  %v7632_v20 = vld [vmem:[#allocation17_spill] sm:$0xff] }
 0x236   : > { %4481 = vrot.lane.b32.xlu0 %v4480_v49, %s5009_s23  ;;  %4151 = vmatmul.mubr.msk.bf16.gmra.mrb[28].mxu1 %vm384_vm0, %v2401_v63  ;;  %7626 = vst [vmem:[#allocation20_spill] sm:$0xff] %v6299_v32  ;;  %v7628_v63 = vld [vmem:[#allocation15_spill] sm:$0xff]  ;;  %v1373_v11 = vrot.slane %v7632_v20, 1 }
 0x237   : > { %4491 = vrot.lane.b32.xlu1 %v4480_v49, %s5006_s17  ;;  %4154 = vmatprep.mubr.msk.bf16.mxu1 %vm384_vm0, %v2404_v44  ;;  %v1362_v49 = vrot.slane %v7627_v51, 1  ;;  %v1363_v44 = vrot.slane %v7628_v63, 1 }
 0x239   : > { %v6311_v8 = vsel %vm589_vm9, %v1362_v49, %v1363_v44  ;;  %v7637_v49 = vld [vmem:[#allocation25_spill] sm:$0xff] }
 0x23a   : > { %4486 = vrot.lane.b32.xlu0 %v4485_v7, %s5006_s17  ;;  %v1378_v63 = vrot.slane %v7637_v49, 1  ;;  %v4630_v49 = vpack.i.bf16 %v6067_v31, %v6053_v50 }
 0x23b   : > { %4496 = vrot.lane.b32.xlu1 %v4485_v7, %s5007_s27  ;;  %v1365_v7 = vrot.slane %v7629_v6, 1 }
 0x23d   : > { %v6314_v18 = vsel %vm589_vm9, %v1363_v44, %v1365_v7  ;;  %v7638_v44 = vld [vmem:[#allocation26_spill] sm:$0xff] }
 0x23e   : > { %4501 = vrot.lane.b32.xlu0 %v4500_v37, %s5007_s27  ;;  %v4540_v24 = vpack.i.bf16 %v6314_v18, %v6311_v8  ;;  %v1380_v6 = vrot.slane %v7638_v44, 1 }
 0x23f   : > { %4511 = vrot.lane.b32.xlu1 %v4500_v37, %s5009_s23  ;;  %v1397_v37 = vrot.slane %v5906_v14, 1  ;;  %v6338_v14 = vsel %vm589_vm9, %v1372_v60, %v1373_v11 }
 0x240   : > { %v6360_v7 = vsel %vm589_vm9, %v1378_v63, %v1380_v6 }
 0x242   : > { %4506 = vrot.lane.b32.xlu0 %v4505_v33, %s5009_s23 }
 0x243   : > { %4531 = vrot.lane.b32.xlu1 %v4505_v33, %s5006_s17  ;;  %v1398_v33 = vrot.slane %v5908_v48, 1 }
 0x245   : > { %v6330_v39 = vsel %vm589_vm9, %v1397_v37, %v1398_v33  ;;  %v6333_v27 = vsel %vm589_vm9, %v1398_v33, %v1400_v54  ;;  %v1382_v37 = vrot.slane %v5951_v42, 1  ;;  %v1383_v33 = vrot.slane %v7620_v30, 1  ;;  %v7639_v54 = vld [vmem:[#allocation28_spill] sm:$0xff]  ;;  %v7641_v42 = vld [vmem:[#allocation23_spill] sm:$0xff] }
 0x246   : > { %4516 = vrot.lane.b32.xlu0 %v4515_v4, %s5006_s17  ;;  %7634 = vst [vmem:[#allocation22_spill] sm:$0xff] %v6330_v39  ;;  %7635 = vst [vmem:[#allocation14_spill] sm:$0xff] %v6333_v27  ;;  %v4550_v47 = vpack.i.bf16 %v6333_v27, %v6330_v39  ;;  %v1385_v29 = vrot.slane %v7639_v54, 1 }
 0x247   : > { %4536 = vrot.lane.b32.xlu1 %v4515_v4, %s5007_s27  ;;  %v1375_v4 = vrot.slane %v7633_v34, 1  ;;  %v6383_v20 = vsel %vm589_vm9, %v1382_v37, %v1383_v33  ;;  %v1407_v37 = vrot.slane %v6111_v25, 1 }
 0x248   : > { %7640 = vst [vmem:[#allocation15_spill] sm:$0xff] %v6383_v20 }
 0x249   : > { %v6341_v48 = vsel %vm589_vm9, %v1373_v11, %v1375_v4 }
 0x24a   : > { %4521 = vrot.lane.b32.xlu0 %v4520_v19, %s5009_s23  ;;  %v4600_v26 = vpack.i.bf16 %v6341_v48, %v6338_v14 }
 0x24b   : > { %4556 = vrot.lane.b32.xlu1 %v7630_v3, %s5009_s23 }
 0x24e   : > { %4526 = vrot.lane.b32.xlu0 %v6228_v2, %s5006_s17 }
 0x24f   : > { %4566 = vrot.lane.b32.xlu1 %v4520_v19, %s5006_s17  ;;  %v7636_v19 = vld [vmem:[#allocation24_spill] sm:$0xff] }
 0x250   : > { %v1377_v51 = vrot.slane %v7636_v19, 1  ;;  %v1405_v19 = vrot.slane %v6069_v22, 1 }
 0x252   : > { %4541 = vrot.lane.b32.xlu0 %v4540_v24, %s5009_s23 }
 0x253   : > { %4571 = vrot.lane.b32.xlu1 %v4540_v24, %s5006_s17  ;;  %v6368_v24 = vpop.permute.xlu1 %4331 }
 0x256   : > { %4546 = vrot.lane.b32.xlu0 %v6192_v56, %s5006_s17 }
 0x257   : > { %4576 = vrot.lane.b32.xlu1 %v6192_v56, %s5007_s27  ;;  %v6357_v56 = vsel %vm589_vm9, %v1377_v51, %v1378_v63  ;;  %v6380_v60 = vpop.permute.xlu1 %4336 }
 0x258   : > { %v4610_v3 = vpack.i.bf16 %v6360_v7, %v6357_v56  ;;  %v4339_v58 = vunpack.i.h.bf16 %v6380_v60 }
 0x25a   : > { %4551 = vrot.lane.b32.xlu0 %v4550_v47, %s5009_s23 }
 0x25b   : > { %4601 = vrot.lane.b32.xlu1 %v4600_v26, %s5006_s17 }
 0x25e   : > { %4561 = vrot.lane.b32.xlu0 %v6246_v36, %s5006_s17 }
 0x25f   : > { %4606 = vrot.lane.b32.xlu1 %v6215_v13, %s5007_s27 }
 0x262   : > { %4581 = vrot.lane.b32.xlu0 %v4600_v26, %s5009_s23  ;;  %v1403_v26 = vrot.slane %v6067_v31, 1 }
 0x263   : > { %4611 = vrot.lane.b32.xlu1 %v4610_v3, %s5006_s17 }
 0x264   : > { %v6421_v6 = vsel %vm589_vm9, %v1403_v26, %v1405_v19  ;;  %v1412_v19 = vrot.slane %v6121_v21, 1 }
 0x265   : > { %7643 = vst [vmem:[#allocation21_spill] sm:$0xff] %v6421_v6 }
 0x266   : > { %4586 = vrot.lane.b32.xlu0 %v6215_v13, %s5006_s17  ;;  %v6386_v13 = vsel %vm589_vm9, %v1383_v33, %v1385_v29  ;;  %v1410_v33 = vrot.slane %v6115_v40, 1 }
 0x267   : > { %4616 = vrot.lane.b32.xlu1 %v6224_v46, %s5007_s27  ;;  %v4620_v11 = vpack.i.bf16 %v6386_v13, %v6383_v20  ;;  %v4842_v20 = vld [vmem:[#allocation4 + $0x18] sm:$0xff] }
 0x26a   : > { %4591 = vrot.lane.b32.xlu0 %v4610_v3, %s5009_s23 }
 0x26b   : > { %4636 = vrot.lane.b32.xlu1 %v6228_v2, %s5007_s27 }
 0x26e   : > { %4596 = vrot.lane.b32.xlu0 %v6224_v46, %s5006_s17  ;;  %v1402_v46 = vrot.slane %v6053_v50, 1 }
 0x26f   : > { %4646 = vrot.lane.b32.xlu1 %v7641_v42, %s5009_s23 }
 0x270   : > { %v6392_v30 = vpop.permute.xlu0 %4341  ;;  %v6418_v44 = vsel %vm589_vm9, %v1402_v46, %v1403_v26 }
 0x271   : > { %v6396_v2 = vpop.permute.xlu1 %4346  ;;  %7642 = vst [vmem:[#allocation13_spill] sm:$0xff] %v6418_v44 }
 0x272   : > { %4621 = vrot.lane.b32.xlu0 %v4620_v11, %s5009_s23 }
 0x273   : > { %4656 = vrot.lane.b32.xlu1 %v4620_v11, %s5006_s17 }
 0x274   : > { %v6400_v34 = vpop.permute.xlu0 %4351 }
 0x275   : > { %v6402_v4 = vpop.permute.xlu1 %4356 }
 0x276   : > { %4626 = vrot.lane.b32.xlu0 %v6240_v28, %s5006_s17 }
 0x277   : > { %4661 = vrot.lane.b32.xlu1 %v6240_v28, %s5007_s27  ;;  %v4640_v28 = vpack.i.bf16 %v6421_v6, %v6418_v44  ;;  %v4840_v44 = vld [vmem:[#allocation4 + $0x8] sm:$0xff] }
 0x278   : > { %v6411_v51 = vpop.permute.xlu0 %4366 }
 0x279   : > { %v6415_v63 = vpop.permute.xlu1 %4361 }
 0x27a   : > { %4631 = vrot.lane.b32.xlu0 %v4630_v49, %s5007_s27 }
 0x27b   : > { %4666 = vrot.lane.b32.xlu1 %v4550_v47, %s5006_s17  ;;  %v1408_v47 = vrot.slane %v6113_v53, 1 }
 0x27c   : > { %v6425_v22 = vpop.permute.xlu0 %4376 }
 0x27d   : > { %v6429_v3 = vpop.permute.xlu1 %4371  ;;  %v6451_v42 = vsel %vm589_vm9, %v1407_v37, %v1408_v47  ;;  %v6454_v11 = vsel %vm589_vm9, %v1408_v47, %v1410_v33  ;;  %v4334_v37 = vunpack.i.h.bf16 %v6368_v24  ;;  %v4333_v47 = vunpack.i.l.bf16 %v6368_v24 }
 0x27e   : > { %4641 = vrot.lane.b32.xlu0 %v4640_v28, %s5009_s23  ;;  %7646 = vst [vmem:[#allocation18_spill] sm:$0xff] %v6451_v42  ;;  %7647 = vst [vmem:[#allocation24_spill] sm:$0xff] %v6454_v11  ;;  %v4680_v46 = vpack.i.bf16 %v6454_v11, %v6451_v42  ;;  %v4700_v33 = vpack.i.bf16 %v6134_v0, %v6121_v21  ;;  %v4338_v24 = vunpack.i.l.bf16 %v6380_v60  ;;  %v4349_v21 = vunpack.i.h.bf16 %v6396_v2 }
 0x27f   : > { %4676 = vrot.lane.b32.xlu1 %v6246_v36, %s5007_s27  ;;  %v4670_v36 = vpack.i.bf16 %v6113_v53, %v6111_v25  ;;  %v2169_v6 = vsel %vm384_vm0, %v4840_v44, %v4334_v37  ;;  %v4348_v60 = vunpack.i.l.bf16 %v6396_v2  ;;  %v4344_v2 = vunpack.i.h.bf16 %v6392_v30 }
 0x280   : > { %v6434_v50 = vpop.permute.xlu0 %4381  ;;  %v2201_v44 = vsel %vm615_vm11, %v2169_v6, %v4339_v58  ;;  %v1420_v58 = vrot.slane %v6166_v10, 1  ;;  %v4343_v6 = vunpack.i.l.bf16 %v6392_v30 }
 0x281   : > { %v6436_v31 = vpop.permute.xlu1 %4386 }
 0x282   : > { %7644 = vst [vmem:[#allocation16_spill] sm:$0xff] %v6436_v31  ;;  %4651 = vrot.lane.b32.xlu0 %v6252_v57, %s5006_s17  ;;  %v7651_v31 = vld [vmem:[#allocation29_spill] sm:$0xff] }
 0x283   : > { %4686 = vrot.lane.b32.xlu1 %v4630_v49, %s5009_s23  ;;  %v1413_v49 = vrot.slane %v6134_v0, 1 }
 0x284   : > { %v6444_v54 = vpop.permute.xlu0 %4391 }
 0x285   : > { %7645 = vst [vmem:[#allocation17_spill] sm:$0xff] %v6444_v54  ;;  %v6448_v29 = vpop.permute.xlu1 %4401  ;;  %v6485_v11 = vsel %vm589_vm9, %v1412_v19, %v1413_v49 }
 0x286   : > { %4671 = vrot.lane.b32.xlu0 %v4670_v36, %s5007_s27  ;;  %7648 = vst [vmem:[#allocation25_spill] sm:$0xff] %v6485_v11 }
 0x287   : > { %4696 = vrot.lane.b32.xlu1 %v4640_v28, %s5006_s17  ;;  %v1415_v28 = vrot.slane %v6136_v52, 1 }
 0x288   : > { %v6458_v40 = vpop.permute.xlu0 %4396 }
 0x289   : > { %v6462_v26 = vpop.permute.xlu1 %4416  ;;  %v6488_v52 = vsel %vm589_vm9, %v1413_v49, %v1415_v28  ;;  %v1417_v49 = vrot.slane %v6162_v41, 1  ;;  %v1418_v28 = vrot.slane %v6164_v59, 1 }
 0x28a   : > { %4681 = vrot.lane.b32.xlu0 %v4680_v46, %s5009_s23  ;;  %7649 = vst [vmem:[#allocation26_spill] sm:$0xff] %v6488_v52  ;;  %v4710_v19 = vpack.i.bf16 %v6488_v52, %v6485_v11 }
 0x28b   : > { %4706 = vrot.lane.b32.xlu1 %v6252_v57, %s5007_s27 }
 0x28c   : > { %v6467_v25 = vpop.permute.xlu0 %4406 }
 0x28d   : > { %v6469_v53 = vpop.permute.xlu1 %4421 }
 0x28e   : > { %4691 = vrot.lane.b32.xlu0 %v6262_v45, %s5006_s17 }
 0x28f   : > { %4716 = vrot.lane.b32.xlu1 %v4670_v36, %s5009_s23  ;;  %v4841_v36 = vld [vmem:[#allocation4] sm:$0xff] }
 0x290   : > { %v6479_v57 = vpop.permute.xlu0 %4411  ;;  %v2168_v39 = vsel %vm384_vm0, %v4841_v36, %v4333_v47 }
 0x291   : > { %v4442_v42 = vpop.permute.xlu1 %4441  ;;  %v2200_v47 = vsel %vm615_vm11, %v2168_v39, %v4338_v24  ;;  %v6515_v24 = vsel %vm589_vm9, %v1417_v49, %v1418_v28 }
 0x292   : > { %4701 = vrot.lane.b32.xlu0 %v4700_v33, %s5007_s27 }
 0x293   : > { %4726 = vrot.lane.b32.xlu1 %v4680_v46, %s5006_s17  ;;  %v7650_v46 = vld [vmem:[#allocation30_spill] sm:$0xff] }
 0x294   : > { %v4427_v0 = vpop.permute.xlu0 %4426 }
 0x295   : > { %v4429_v37 = vunpack.i.h.bf16 %v4427_v0  ;;  %v4428_v27 = vunpack.i.l.bf16 %v4427_v0  ;;  %v4447_v54 = vpop.permute.xlu1 %4446  ;;  %v2233_v0 = vsel %vm630_vm12, %v2201_v44, %v4349_v21 }
 0x296   : > { %4711 = vrot.lane.b32.xlu0 %v4710_v19, %s5009_s23  ;;  %v4448_v17 = vunpack.i.l.bf16 %v4447_v54  ;;  %v4449_v21 = vunpack.i.h.bf16 %v4447_v54 }
 0x297   : > { %v2265_v36 = vsel %vm384_vm0, %v7650_v46, %v4429_v37  ;;  %v2264_v11 = vsel %vm384_vm0, %v7651_v31, %v4428_v27  ;;  %4736 = vrot.lane.b32.xlu1 %v6262_v45, %s5007_s27  ;;  %v2232_v37 = vsel %vm630_vm12, %v2200_v47, %v4348_v60  ;;  %v4443_v46 = vunpack.i.l.bf16 %v4442_v42 }
 0x298   : > { %v4432_v39 = vpop.permute.xlu0 %4431  ;;  %v4444_v45 = vunpack.i.h.bf16 %v4442_v42  ;;  %v2296_v10 = vsel %vm615_vm11, %v2264_v11, %v4343_v6  ;;  %v2297_v30 = vsel %vm615_vm11, %v2265_v36, %v4344_v2  ;;  %v6528_v60 = vsel %vm589_vm9, %v1418_v28, %v1420_v58 }
 0x299   : > { %v4434_v52 = vunpack.i.h.bf16 %v4432_v39  ;;  %v4433_v27 = vunpack.i.l.bf16 %v4432_v39  ;;  %v6518_v31 = vpop.permute.xlu1 %4461  ;;  %v4730_v42 = vpack.i.bf16 %v6164_v59, %v6162_v41  ;;  %v2360_v23 = vpack.c.bf16 %v2233_v0, %v2232_v37 }
 0x29a   : > { %4721 = vrot.lane.b32.xlu0 %v6272_v61, %s5006_s17  ;;  %v2170_v11 = vsel %vm384_vm0, %v4842_v20, %v4443_v46  ;;  %v4740_v41 = vpack.i.bf16 %v6528_v60, %v6515_v24  ;;  %v4354_v58 = vunpack.i.h.bf16 %v6400_v34  ;;  %v4359_v0 = vunpack.i.h.bf16 %v6402_v4 }
 0x29b   : > { %4746 = vrot.lane.b32.xlu1 %v4700_v33, %s5009_s23  ;;  %v2328_v49 = vsel %vm630_vm12, %v2296_v10, %v4433_v27  ;;  %v2329_v44 = vsel %vm630_vm12, %v2297_v30, %v4434_v52  ;;  %v4843_v33 = vld [vmem:[#allocation4 + $0x20] sm:$0xff]  ;;  %v2202_v52 = vsel %vm615_vm11, %v2170_v11, %v4448_v17  ;;  %v4353_v17 = vunpack.i.l.bf16 %v6400_v34 }
 0x29c   : > { %v4437_v47 = vpop.permute.xlu0 %4436  ;;  %v2361_v39 = vpack.c.bf16 %v2329_v44, %v2328_v49  ;;  %v2171_v6 = vsel %vm384_vm0, %v4843_v33, %v4444_v45  ;;  %v4358_v37 = vunpack.i.l.bf16 %v6402_v4  ;;  %v1293_v33 = vld [vmem:[#allocation4 + $0x1a8] sm:$0x3] }
 0x29d   : > { %v4439_v36 = vunpack.i.h.bf16 %v4437_v47  ;;  %v4438_v54 = vunpack.i.l.bf16 %v4437_v47  ;;  %v6533_v2 = vpop.permute.xlu1 %4466  ;;  %v2203_v59 = vsel %vm615_vm11, %v2171_v6, %v4449_v21  ;;  %v1291_v47 = vld [vmem:[#allocation4 + $0x198] sm:$0xff] }
 0x29e   : > { %4731 = vrot.lane.b32.xlu0 %v4730_v42, %s5007_s27  ;;  %2639 = vmatprep.mubr.bf16.mxu0 %v2361_v39  ;;  %v1292_v39 = vld [vmem:[#allocation4 + $0x1a0] sm:$0xff]  ;;  %v1555_v11 = vrot.slane %v1291_v47, 2 }
 0x29f   : > { %v2267_v20 = vsel %vm384_vm0, %v6098_v38, %v4439_v36  ;;  %v2266_v28 = vsel %vm384_vm0, %v6095_v62, %v4438_v54  ;;  %4756 = vrot.lane.b32.xlu1 %v4710_v19, %s5006_s17  ;;  %2640 = vmatmul.mubr.bf16.vlgmr.msra.gmra.mrb[4].mxu0 %v2360_v23  ;;  %v2234_v23 = vsel %vm630_vm12, %v2202_v52, %v4358_v37  ;;  %v1558_v52 = vrot.slane %v1293_v33, 2 }
 0x2a0   : > { %v4452_v46 = vpop.permute.xlu0 %4451  ;;  %v2298_v62 = vsel %vm615_vm11, %v2266_v28, %v4353_v17  ;;  %v2299_v38 = vsel %vm615_vm11, %v2267_v20, %v4354_v58  ;;  %v2235_v19 = vsel %vm630_vm12, %v2203_v59, %v4359_v0  ;;  %v1551_v17 = vrot.slane %v1292_v39, 1 }
 0x2a1   : > { %v4454_v27 = vunpack.i.h.bf16 %v4452_v46  ;;  %v4453_v45 = vunpack.i.l.bf16 %v4452_v46  ;;  %v6550_v10 = vpop.permute.xlu1 %4471  ;;  %v2363_v44 = vpack.c.bf16 %v2235_v19, %v2234_v23  ;;  %v1553_v0 = vrot.slane %v1293_v33, 1 }
 0x2a2   : > { %4741 = vrot.lane.b32.xlu0 %v4740_v41, %s5009_s23 }
 0x2a3   : > { %4766 = vrot.lane.b32.xlu1 %v6272_v61, %s5007_s27  ;;  %v2330_v34 = vsel %vm630_vm12, %v2298_v62, %v4453_v45  ;;  %v2331_v4 = vsel %vm630_vm12, %v2299_v38, %v4454_v27  ;;  %v1556_v61 = vrot.slane %v1292_v39, 2  ;;  %v7652_v27 = vpack.i.bf16 %v6211_v15, %v6208_v55 }
 0x2a4   : > { %v6561_v30 = vpop.permute.xlu0 %4456  ;;  %v2364_v21 = vpack.c.bf16 %v2331_v4, %v2330_v34  ;;  %v4790_v45 = vpack.i.bf16 %v1292_v39, %v1291_v47  ;;  %v1554_v62 = vsel %vm589_vm9, %v1551_v17, %v1553_v0  ;;  %v4464_v55 = vunpack.i.h.bf16 %v6518_v31  ;;  %v7654_v0 = vld [vmem:[#allocation31_spill] sm:$0xff] }
 0x2a5   : > { %v6563_v49 = vpop.permute.xlu1 %4476  ;;  %v1557_v6 = vsel %vm601_vm10, %v1555_v11, %v1556_v61  ;;  %v1559_v28 = vsel %vm601_vm10, %v1556_v61, %v1558_v52  ;;  %v4463_v15 = vunpack.i.l.bf16 %v6518_v31  ;;  %v4459_v39 = vunpack.i.h.bf16 %v6561_v30  ;;  %v4844_v11 = vld [vmem:[#allocation4 + $0x38] sm:$0xff] }
 0x2a6   : > { %4751 = vrot.lane.b32.xlu0 %v6277_v9, %s5006_s17  ;;  %2647 = vmatprep.mubr.bf16.mxu0 %v2364_v21  ;;  %v2407_v58 = vpack.c.bf16 %v1559_v28, %v1557_v6  ;;  %v4469_v21 = vunpack.i.h.bf16 %v6533_v2  ;;  %v4458_v61 = vunpack.i.l.bf16 %v6561_v30  ;;  %v2173_v33 = vsel %vm384_vm0, %v4844_v11, %v4464_v55  ;;  %v4845_v6 = vld [vmem:[#allocation4 + $0x30] sm:$0xff] }
 0x2a7   : > { %4776 = vrot.lane.b32.xlu1 %v4730_v42, %s5009_s23  ;;  %2648 = vmatmul.mubr.bf16.gmra.mrb[8].mxu0 %v2363_v44  ;;  %v4770_v42 = vpack.i.bf16 %v6305_v43, %v6299_v32  ;;  %v4468_v44 = vunpack.i.l.bf16 %v6533_v2  ;;  %v2172_v52 = vsel %vm384_vm0, %v4845_v6, %v4463_v15  ;;  %v4364_v2 = vunpack.i.h.bf16 %v6415_v63 }
 0x2a8   : > { %v6568_v36 = vpop.permute.xlu0 %4481  ;;  %4155 = vmatmul.mubr.msk.bf16.gmra.mrb[32].mxu1 %vm384_vm0, %v2407_v58  ;;  %v2205_v28 = vsel %vm615_vm11, %v2173_v33, %v4469_v21  ;;  %v4474_v15 = vunpack.i.h.bf16 %v6550_v10  ;;  %v4473_v21 = vunpack.i.l.bf16 %v6550_v10 }
 0x2a9   : > { %v6570_v54 = vpop.permute.xlu1 %4491  ;;  %v2204_v31 = vsel %vm615_vm11, %v2172_v52, %v4468_v44  ;;  %v2237_v55 = vsel %vm630_vm12, %v2205_v28, %v4364_v2 }
 0x2aa   : > { %4761 = vrot.lane.b32.xlu0 %v6287_v5, %s5007_s27 }
 0x2ab   : > { %4786 = vrot.lane.b32.xlu1 %v4740_v41, %s5006_s17  ;;  %v1550_v41 = vrot.slane %v1291_v47, 1 }
 0x2ac   : > { %v6576_v59 = vpop.permute.xlu0 %4486 }
 0x2ad   : > { %v6580_v20 = vpop.permute.xlu1 %4496 }
 0x2ae   : > { %4771 = vrot.lane.b32.xlu0 %v4770_v42, %s5009_s23 }
 0x2af   : > { %4796 = vrot.lane.b32.xlu1 %v6277_v9, %s5007_s27  ;;  %v1552_v9 = vsel %vm589_vm9, %v1550_v41, %v1551_v17  ;;  %v4363_v17 = vunpack.i.l.bf16 %v6415_v63  ;;  %v7653_v41 = vld [vmem:[#allocation32_spill] sm:$0xff] }
 0x2b0   : > { %v6586_v37 = vpop.permute.xlu0 %4501  ;;  %v4800_v19 = vpack.i.bf16 %v1554_v62, %v1552_v9  ;;  %v2269_v30 = vsel %vm384_vm0, %v7653_v41, %v4459_v39  ;;  %v4398_v9 = vunpack.i.l.bf16 %v6458_v40  ;;  %v4479_v39 = vunpack.i.h.bf16 %v6563_v49 }
 0x2b1   : > { %v6589_v46 = vpop.permute.xlu1 %4511 }
 0x2b2   : > { %4781 = vrot.lane.b32.xlu0 %v7652_v27, %s5006_s17  ;;  %v2268_v27 = vsel %vm384_vm0, %v7654_v0, %v4458_v61  ;;  %v4478_v61 = vunpack.i.l.bf16 %v6563_v49  ;;  %v4847_v0 = vld [vmem:[#allocation4 + $0x48] sm:$0xff]  ;;  %s7332_s17 = scalar_lea.vmem [#allocation8], %s3822_s14 }
 0x2b3   : > { %4806 = vrot.lane.b32.xlu1 %v6287_v5, %s5009_s23  ;;  %v2300_v33 = vsel %vm615_vm11, %v2268_v27, %v4398_v9 }
 0x2b4   : > { %v6599_v38 = vpop.permute.xlu0 %4506 }
 0x2b5   : > { %v6601_v23 = vpop.permute.xlu1 %4531 }
 0x2b6   : > { %4791 = vrot.lane.b32.xlu0 %v4790_v45, %s5007_s27  ;;  %v4399_v45 = vunpack.i.h.bf16 %v6458_v40  ;;  %s3909_s27 = sshll.u32 %s5085_s13, 13  ;;  %s3728_s13 = scalar_lea.sflag [#allocation7], %s5168_s29 }
 0x2b7   : > { %s7496_s25 = scalar_lea.hbm %s7554_s9, %s3909_s27 }
 0x2b8   : > { %v6604_v34 = vpop.permute.xlu0 %4516  ;;  %v2301_v40 = vsel %vm615_vm11, %v2269_v30, %v4399_v45  ;;  %v4368_v30 = vunpack.i.l.bf16 %v6411_v51  ;;  %v4403_v45 = vunpack.i.l.bf16 %v6448_v29 }
 0x2b9   : > { %v6606_v4 = vpop.permute.xlu1 %4536 }
 0x2ba   : > { %4801 = vrot.lane.b32.xlu0 %v4800_v19, %s5009_s23  ;;  %v2236_v19 = vsel %vm630_vm12, %v2204_v31, %v4363_v17  ;;  %v4369_v31 = vunpack.i.h.bf16 %v6411_v51  ;;  %v4846_v17 = vld [vmem:[#allocation4 + $0x50] sm:$0xff]  ;;  %v4404_v51 = vunpack.i.h.bf16 %v6448_v29  ;;  %v4489_v29 = vunpack.i.h.bf16 %v6576_v59  ;;  %s3741_s23 = sshll.u32 %s7332_s17, 4  ;;  %s7498_s23 = int_to_ptr.vmem [resolvable:$true] %s3741_s23 }
 0x2bb   : > { %v2366_v10 = vpack.c.bf16 %v2237_v55, %v2236_v19  ;;  %v2175_v41 = vsel %vm384_vm0, %v4846_v17, %v4474_v15  ;;  %v4484_v19 = vunpack.i.h.bf16 %v6568_v36  ;;  %v4483_v55 = vunpack.i.l.bf16 %v6568_v36  ;;  %s4934_s24 = scalar_lea.vmem %s7498_s23, 8192 }
 0x2bc   : > { %v6611_v5 = vpop.permute.xlu0 %4521  ;;  %v4374_v17 = vunpack.i.h.bf16 %v6429_v3  ;;  %p4935_p6 = scmp.ne.s32.totalorder %s7498_s23, %s4934_s24 }
 0x2bd   : > { %v6615_v47 = vpop.permute.xlu1 %4556 }
 0x2be   : > { %p4936_p12 = pnand %p4935_p6, %p7671_p11 }
 0x2c0   : > { %v6621_v42 = vpop.permute.xlu0 %4526  ;;  %p4937_p13 = pneg %p4936_p12 }
 0x2c1   : > { %v6625_v58 = vpop.permute.xlu1 %4566 }
 0x2c4   : > { %v4542_v62 = vpop.permute.xlu0 %4541 }
 0x2c5   : > { %v4544_v63 = vunpack.i.h.bf16 %v4542_v62  ;;  %v4543_v44 = vunpack.i.l.bf16 %v4542_v62  ;;  %v4572_v11 = vpop.permute.xlu1 %4571  ;;  %v2174_v62 = vsel %vm384_vm0, %v4847_v0, %v4473_v21 }
 0x2c6   : > { %v2206_v9 = vsel %vm615_vm11, %v2174_v62, %v4478_v61  ;;  %v4373_v62 = vunpack.i.l.bf16 %v6429_v3  ;;  %v4409_v3 = vunpack.i.h.bf16 %v6467_v25 }
 0x2c7   : > { %v2332_v6 = vsel %vm630_vm12, %v2300_v33, %v4543_v44  ;;  %v2333_v52 = vsel %vm630_vm12, %v2301_v40, %v4544_v63  ;;  %v2207_v63 = vsel %vm615_vm11, %v2175_v41, %v4479_v39 }
 0x2c8   : > { %v4547_v28 = vpop.permute.xlu0 %4546  ;;  %v2367_v2 = vpack.c.bf16 %v2333_v52, %v2332_v6  ;;  %v4574_v6 = vunpack.i.h.bf16 %v4572_v11  ;;  %v4573_v52 = vunpack.i.l.bf16 %v4572_v11  ;;  %v4493_v11 = vunpack.i.l.bf16 %v6570_v54 }
 0x2c9   : > { %v4549_v49 = vunpack.i.h.bf16 %v4547_v28  ;;  %v4548_v32 = vunpack.i.l.bf16 %v4547_v28  ;;  %v4577_v27 = vpop.permute.xlu1 %4576  ;;  %v4488_v28 = vunpack.i.l.bf16 %v6576_v59 }
 0x2ca   : > { %2655 = vmatprep.mubr.bf16.mxu0 %v2367_v2  ;;  %v4579_v2 = vunpack.i.h.bf16 %v4577_v27 }
 0x2cb   : > { %v2271_v15 = vsel %vm384_vm0, %v6314_v18, %v4549_v49  ;;  %v2270_v21 = vsel %vm384_vm0, %v6311_v8, %v4548_v32  ;;  %2656 = vmatmul.mubr.bf16.gmra.mrb[12].mxu0 %v2366_v10  ;;  %v2238_v18 = vsel %vm630_vm12, %v2206_v9, %v4403_v45  ;;  %v2239_v8 = vsel %vm630_vm12, %v2207_v63, %v4404_v51  ;;  %v4848_v49 = vld [vmem:[#allocation4 + $0x68] sm:$0xff]  ;;  %v4849_v45 = vld [vmem:[#allocation4 + $0x60] sm:$0xff] }
 0x2cc   : > { %v6659_v44 = vpop.permute.xlu0 %4551  ;;  %v2302_v61 = vsel %vm615_vm11, %v2270_v21, %v4368_v30  ;;  %v2303_v39 = vsel %vm615_vm11, %v2271_v15, %v4369_v31  ;;  %v4578_v10 = vunpack.i.l.bf16 %v4577_v27  ;;  %v2369_v0 = vpack.c.bf16 %v2239_v8, %v2238_v18 }
 0x2cd   : > { %v6663_v33 = vpop.permute.xlu1 %4601  ;;  %v2334_v40 = vsel %vm630_vm12, %v2302_v61, %v4483_v55  ;;  %v2335_v36 = vsel %vm630_vm12, %v2303_v39, %v4484_v19  ;;  %v2177_v30 = vsel %vm384_vm0, %v4848_v49, %v4574_v6  ;;  %v2176_v59 = vsel %vm384_vm0, %v4849_v45, %v4573_v52  ;;  %v4850_v52 = vld [vmem:[#allocation4 + $0x78] sm:$0xff] }
 0x2ce   : > { %v2370_v32 = vpack.c.bf16 %v2335_v36, %v2334_v40  ;;  %v2273_v27 = vsel %vm384_vm0, %v6201_v1, %v4489_v29  ;;  %v2272_v9 = vsel %vm384_vm0, %v6198_v35, %v4488_v28  ;;  %v2208_v63 = vsel %vm615_vm11, %v2176_v59, %v4578_v10  ;;  %v4851_v28 = vld [vmem:[#allocation4 + $0x80] sm:$0xff] }
 0x2cf   : > { %v2209_v19 = vsel %vm615_vm11, %v2177_v30, %v4579_v2  ;;  %v4408_v55 = vunpack.i.l.bf16 %v6467_v25  ;;  %v4494_v15 = vunpack.i.h.bf16 %v6570_v54  ;;  %v4498_v21 = vunpack.i.l.bf16 %v6580_v20 }
 0x2d0   : > { %v6671_v31 = vpop.permute.xlu0 %4561  ;;  %2663 = vmatprep.mubr.bf16.mxu0 %v2370_v32  ;;  %v4499_v61 = vunpack.i.h.bf16 %v6580_v20  ;;  %v2305_v6 = vsel %vm615_vm11, %v2273_v27, %v4409_v3  ;;  %v2240_v25 = vsel %vm630_vm12, %v2208_v63, %v4373_v62  ;;  %v2241_v54 = vsel %vm630_vm12, %v2209_v19, %v4374_v17 }
 0x2d1   : > { %v6674_v41 = vpop.permute.xlu1 %4606  ;;  %v2304_v18 = vsel %vm615_vm11, %v2272_v9, %v4408_v55  ;;  %v2178_v32 = vsel %vm384_vm0, %v4850_v52, %v4493_v11  ;;  %v2179_v2 = vsel %vm384_vm0, %v4851_v28, %v4494_v15  ;;  %v2372_v59 = vpack.c.bf16 %v2241_v54, %v2240_v25 }
 0x2d2   : > { %v2210_v10 = vsel %vm615_vm11, %v2178_v32, %v4498_v21  ;;  %v2211_v17 = vsel %vm615_vm11, %v2179_v2, %v4499_v61  ;;  %v4379_v27 = vunpack.i.h.bf16 %v6425_v22  ;;  %v4419_v9 = vunpack.i.h.bf16 %v6462_v26 }
 0x2d3   : > { %2664 = vmatmul.mubr.bf16.gmra.mrb[16].mxu0 %v2369_v0  ;;  %v4418_v63 = vunpack.i.l.bf16 %v6462_v26  ;;  %v4378_v19 = vunpack.i.l.bf16 %v6425_v22  ;;  %v4414_v3 = vunpack.i.h.bf16 %v6479_v57  ;;  %v4413_v21 = vunpack.i.l.bf16 %v6479_v57 }
 0x2d4   : > { %v4582_v51 = vpop.permute.xlu0 %4581  ;;  %v2243_v26 = vsel %vm630_vm12, %v2211_v17, %v4419_v9  ;;  %v4609_v57 = vunpack.i.h.bf16 %v6674_v41  ;;  %v4853_v9 = vld [vmem:[#allocation4 + $0x98] sm:$0xff] }
 0x2d5   : > { %v4584_v1 = vunpack.i.h.bf16 %v4582_v51  ;;  %v4583_v39 = vunpack.i.l.bf16 %v4582_v51  ;;  %v6691_v40 = vpop.permute.xlu1 %4611  ;;  %v4603_v51 = vunpack.i.l.bf16 %v6663_v33 }
 0x2d6   : > { %v6693_v35 = vpop.f32.mrb[4].mxu1 }
 0x2d7   : > { %v6695_v36 = vpop.f32.mrb[5].mxu1  ;;  %v2336_v8 = vsel %vm630_vm12, %v2304_v18, %v4583_v39  ;;  %v2337_v29 = vsel %vm630_vm12, %v2305_v6, %v4584_v1  ;;  %v2242_v1 = vsel %vm630_vm12, %v2210_v10, %v4418_v63  ;;  %v4604_v39 = vunpack.i.h.bf16 %v6663_v33 }
 0x2d8   : > { %v6702_v20 = vpop.f32.mrb[6].mxu1  ;;  %v4587_v49 = vpop.permute.xlu0 %4586  ;;  %v2373_v62 = vpack.c.bf16 %v2337_v29, %v2336_v8  ;;  %v4608_v18 = vunpack.i.l.bf16 %v6674_v41  ;;  %v4383_v33 = vunpack.i.l.bf16 %v6434_v50  ;;  %v2375_v10 = vpack.c.bf16 %v2243_v26, %v2242_v1  ;;  %v4852_v41 = vld [vmem:[#allocation4 + $0x90] sm:$0xff] }
 0x2d9   : > { %v6708_v0 = vpop.f32.mrb[7].mxu1  ;;  %v4589_v30 = vunpack.i.h.bf16 %v4587_v49  ;;  %v4588_v45 = vunpack.i.l.bf16 %v4587_v49  ;;  %v6711_v11 = vpop.permute.xlu1 %4616  ;;  %v4519_v49 = vunpack.i.h.bf16 %v6604_v34  ;;  %v2180_v17 = vsel %vm384_vm0, %v4852_v41, %v4603_v51 }
 0x2da   : > { %2671 = vmatprep.mubr.bf16.mxu0 %v2373_v62  ;;  %v4518_v62 = vunpack.i.l.bf16 %v6604_v34  ;;  %v2181_v63 = vsel %vm384_vm0, %v4853_v9, %v4604_v39  ;;  %v4423_v34 = vunpack.i.l.bf16 %v6469_v53  ;;  %v4504_v1 = vunpack.i.h.bf16 %v6586_v37 }
 0x2db   : > { %v2275_v55 = vsel %vm384_vm0, %v6341_v48, %v4589_v30  ;;  %v2274_v15 = vsel %vm384_vm0, %v6338_v14, %v4588_v45  ;;  %2672 = vmatmul.mubr.bf16.gmra.mrb[20].mxu0 %v2372_v59  ;;  %v4384_v14 = vunpack.i.h.bf16 %v6434_v50  ;;  %v2213_v51 = vsel %vm615_vm11, %v2181_v63, %v4609_v57 }
 0x2dc   : > { %v4592_v61 = vpop.permute.xlu0 %4591  ;;  %v2306_v32 = vsel %vm615_vm11, %v2274_v15, %v4413_v21  ;;  %v2307_v8 = vsel %vm615_vm11, %v2275_v55, %v4414_v3  ;;  %v2212_v3 = vsel %vm615_vm11, %v2180_v17, %v4608_v18  ;;  %v4503_v26 = vunpack.i.l.bf16 %v6586_v37 }
 0x2dd   : > { %v4594_v6 = vunpack.i.h.bf16 %v4592_v61  ;;  %v4593_v25 = vunpack.i.l.bf16 %v4592_v61  ;;  %v6728_v48 = vpop.permute.xlu1 %4636  ;;  %v4424_v61 = vunpack.i.h.bf16 %v6469_v53  ;;  %v2281_v53 = vsel %vm384_vm0, %v6258_v12, %v4519_v49 }
 0x2de   : > { %v6730_v54 = vpop.f32.mrb[8].mxu1  ;;  %v2280_v57 = vsel %vm384_vm0, %v6255_v16, %v4518_v62  ;;  %v2244_v37 = vsel %vm630_vm12, %v2212_v3, %v4423_v34  ;;  %v4523_v16 = vunpack.i.l.bf16 %v6611_v5  ;;  %v4619_v62 = vunpack.i.h.bf16 %v6711_v11  ;;  %v4854_v3 = vld [vmem:[#allocation4 + $0xa8] sm:$0xff] }
 0x2df   : > { %v6734_v52 = vpop.f32.mrb[9].mxu1  ;;  %v2338_v28 = vsel %vm630_vm12, %v2306_v32, %v4593_v25  ;;  %v2339_v2 = vsel %vm630_vm12, %v2307_v8, %v4594_v6  ;;  %v4514_v6 = vunpack.i.h.bf16 %v6589_v46  ;;  %v4513_v25 = vunpack.i.l.bf16 %v6589_v46 }
 0x2e0   : > { %v6739_v29 = vpop.f32.mrb[10].mxu1  ;;  %v4597_v45 = vpop.permute.xlu0 %4596  ;;  %v2376_v59 = vpack.c.bf16 %v2339_v2, %v2338_v28  ;;  %v4613_v8 = vunpack.i.l.bf16 %v6691_v40  ;;  %v4618_v46 = vunpack.i.l.bf16 %v6711_v11  ;;  %v4855_v11 = vld [vmem:[#allocation4 + $0xb0] sm:$0xff] }
 0x2e1   : > { %v6746_v30 = vpop.f32.mrb[11].mxu1  ;;  %v4599_v55 = vunpack.i.h.bf16 %v4597_v45  ;;  %v4598_v15 = vunpack.i.l.bf16 %v4597_v45  ;;  %v6750_v21 = vpop.permute.xlu1 %4646  ;;  %v4509_v45 = vunpack.i.h.bf16 %v6599_v38 }
 0x2e2   : > { %2679 = vmatprep.mubr.bf16.mxu0 %v2376_v59  ;;  %v4508_v59 = vunpack.i.l.bf16 %v6599_v38  ;;  %v2312_v38 = vsel %vm615_vm11, %v2280_v57, %v4383_v33  ;;  %v4528_v57 = vunpack.i.l.bf16 %v6621_v42 }
 0x2e3   : > { %v2277_v39 = vsel %vm384_vm0, %v6360_v7, %v4599_v55  ;;  %v2276_v18 = vsel %vm384_vm0, %v6357_v56, %v4598_v15  ;;  %2680 = vmatmul.mubr.bf16.gmra.mrb[24].mxu0 %v2375_v10  ;;  %v2245_v56 = vsel %vm630_vm12, %v2213_v51, %v4424_v61  ;;  %v4614_v10 = vunpack.i.h.bf16 %v6691_v40 }
 0x2e4   : > { %v4622_v32 = vpop.permute.xlu0 %4621  ;;  %v2308_v12 = vsel %vm615_vm11, %v2276_v18, %v4503_v26  ;;  %v2309_v49 = vsel %vm615_vm11, %v2277_v39, %v4504_v1  ;;  %v4524_v40 = vunpack.i.h.bf16 %v6611_v5  ;;  %v2182_v55 = vsel %vm384_vm0, %v4854_v3, %v4613_v8  ;;  %v7655_v8 = vld [vmem:[#allocation15_spill] sm:$0xff] }
 0x2e5   : > { %v4624_v28 = vunpack.i.h.bf16 %v4622_v32  ;;  %v4623_v2 = vunpack.i.l.bf16 %v4622_v32  ;;  %v6769_v7 = vpop.permute.xlu1 %4656  ;;  %v2378_v1 = vpack.c.bf16 %v2245_v56, %v2244_v37  ;;  %v2183_v51 = vsel %vm384_vm0, %v4855_v11, %v4614_v10 }
 0x2e6   : > { %v2214_v26 = vsel %vm615_vm11, %v2182_v55, %v4618_v46  ;;  %v2313_v5 = vsel %vm615_vm11, %v2281_v53, %v4384_v14  ;;  %v2215_v18 = vsel %vm615_vm11, %v2183_v51, %v4619_v62  ;;  %v4529_v56 = vunpack.i.h.bf16 %v6621_v42  ;;  %v4856_v55 = vld [vmem:[#allocation4 + $0xc8] sm:$0xff] }
 0x2e7   : > { %v2340_v41 = vsel %vm630_vm12, %v2308_v12, %v4623_v2  ;;  %v2341_v17 = vsel %vm630_vm12, %v2309_v49, %v4624_v28  ;;  %v2344_v2 = vsel %vm630_vm12, %v2312_v38, %v4523_v16  ;;  %v2345_v53 = vsel %vm630_vm12, %v2313_v5, %v4524_v40  ;;  %v7658_v38 = vld [vmem:[#allocation16_spill] sm:$0xff] }
 0x2e8   : > { %v4627_v9 = vpop.permute.xlu0 %4626  ;;  %v2379_v63 = vpack.c.bf16 %v2341_v17, %v2340_v41  ;;  %v2246_v16 = vsel %vm630_vm12, %v2214_v26, %v4513_v25  ;;  %v4658_v22 = vunpack.i.l.bf16 %v6769_v7  ;;  %v7657_v25 = vld [vmem:[#allocation27_spill] sm:$0xff]  ;;  %v4389_v5 = vunpack.i.h.bf16 %v7658_v38 }
 0x2e9   : > { %v4629_v15 = vunpack.i.h.bf16 %v4627_v9  ;;  %v4628_v61 = vunpack.i.l.bf16 %v4627_v9  ;;  %v4662_v34 = vpop.permute.xlu1 %4661  ;;  %v6786_v39 = vpop.f32.mrb[12].mxu1  ;;  %v2282_v3 = vsel %vm384_vm0, %v7657_v25, %v4528_v57  ;;  %v4558_v25 = vunpack.i.l.bf16 %v6615_v47 }
 0x2ea   : > { %2687 = vmatprep.mubr.bf16.mxu0 %v2379_v63  ;;  %v6795_v32 = vpop.f32.mrb[13].mxu1  ;;  %v4664_v41 = vunpack.i.h.bf16 %v4662_v34  ;;  %v4663_v17 = vunpack.i.l.bf16 %v4662_v34  ;;  %v7656_v63 = vld [vmem:[#allocation19_spill] sm:$0xff]  ;;  %v4554_v34 = vunpack.i.h.bf16 %v6659_v44 }
 0x2eb   : > { %v2279_v37 = vsel %vm384_vm0, %v6386_v13, %v4629_v15  ;;  %v2278_v28 = vsel %vm384_vm0, %v7655_v8, %v4628_v61  ;;  %2688 = vmatmul.mubr.bf16.gmra.mrb[28].mxu0 %v2378_v1  ;;  %v6803_v33 = vpop.f32.mrb[14].mxu1  ;;  %v4857_v15 = vld [vmem:[#allocation4 + $0xc0] sm:$0xff]  ;;  %v4553_v1 = vunpack.i.l.bf16 %v6659_v44 }
 0x2ec   : > { %v6805_v50 = vpop.permute.xlu0 %4631  ;;  %v2310_v14 = vsel %vm615_vm11, %v2278_v28, %v4378_v19  ;;  %v2311_v13 = vsel %vm615_vm11, %v2279_v37, %v4379_v27  ;;  %v6815_v10 = vpop.f32.mrb[15].mxu1  ;;  %v4659_v19 = vunpack.i.h.bf16 %v6769_v7  ;;  %v2247_v27 = vsel %vm630_vm12, %v2215_v18, %v4514_v6  ;;  %v7659_v37 = vld [vmem:[#allocation17_spill] sm:$0xff] }
 0x2ed   : > { %v6817_v46 = vpop.permute.xlu1 %4666  ;;  %v2342_v12 = vsel %vm630_vm12, %v2310_v14, %v4508_v59  ;;  %v2343_v49 = vsel %vm630_vm12, %v2311_v13, %v4509_v45  ;;  %v2381_v9 = vpack.c.bf16 %v2247_v27, %v2246_v16  ;;  %v2385_v59 = vpack.c.bf16 %v2345_v53, %v2344_v2 }
 0x2ee   : > { %v2382_v62 = vpack.c.bf16 %v2343_v49, %v2342_v12  ;;  %v2283_v45 = vsel %vm384_vm0, %v7656_v63, %v4529_v56  ;;  %v2185_v7 = vsel %vm384_vm0, %v4856_v55, %v4659_v19  ;;  %v2184_v6 = vsel %vm384_vm0, %v4857_v15, %v4658_v22 }
 0x2ef   : > { %v2216_v11 = vsel %vm615_vm11, %v2184_v6, %v4663_v17  ;;  %v2217_v51 = vsel %vm615_vm11, %v2185_v7, %v4664_v41  ;;  %v4388_v18 = vunpack.i.l.bf16 %v7658_v38  ;;  %v4394_v8 = vunpack.i.h.bf16 %v7659_v37 }
 0x2f0   : > { %v6825_v42 = vpop.permute.xlu0 %4641  ;;  %2695 = vmatprep.mubr.bf16.mxu0 %v2382_v62  ;;  %v4393_v28 = vunpack.i.l.bf16 %v7659_v37  ;;  %v2249_v53 = vsel %vm630_vm12, %v2217_v51, %v4389_v5  ;;  %v4534_v19 = vunpack.i.h.bf16 %v6601_v23  ;;  %v4533_v22 = vunpack.i.l.bf16 %v6601_v23  ;;  %v7660_v5 = vld [vmem:[#allocation14_spill] sm:$0xff] }
 0x2f1   : > { %v6827_v40 = vpop.permute.xlu1 %4676  ;;  %v6835_v61 = vpop.f32.mrb[16].mxu1  ;;  %v2248_v13 = vsel %vm630_vm12, %v2216_v11, %v4388_v18  ;;  %v2315_v12 = vsel %vm615_vm11, %v2283_v45, %v4394_v8  ;;  %v4539_v62 = vunpack.i.h.bf16 %v6606_v4  ;;  %v4538_v27 = vunpack.i.l.bf16 %v6606_v4  ;;  %v7661_v18 = vld [vmem:[#allocation22_spill] sm:$0xff] }
 0x2f2   : > { %v6841_v26 = vpop.f32.mrb[17].mxu1  ;;  %v2314_v57 = vsel %vm615_vm11, %v2282_v3, %v4393_v28  ;;  %v2347_v16 = vsel %vm630_vm12, %v2315_v12, %v4554_v34  ;;  %v4559_v17 = vunpack.i.h.bf16 %v6615_v47  ;;  %v2384_v45 = vpack.c.bf16 %v2249_v53, %v2248_v13 }
 0x2f3   : > { %2696 = vmatmul.mubr.bf16.gmra.mrb[32].mxu0 %v2381_v9  ;;  %v6847_v2 = vpop.f32.mrb[18].mxu1  ;;  %v2346_v49 = vsel %vm630_vm12, %v2314_v57, %v4553_v1  ;;  %v4564_v9 = vunpack.i.h.bf16 %v6671_v31  ;;  %v4634_v3 = vunpack.i.h.bf16 %v6805_v50  ;;  %v4633_v23 = vunpack.i.l.bf16 %v6805_v50  ;;  %v4859_v1 = vld [vmem:[#allocation4 + $0xd8] sm:$0xff] }
 0x2f4   : > { %v6849_v56 = vpop.permute.xlu0 %4651  ;;  %2703 = vmatprep.mubr.bf16.mxu0 %v2385_v59  ;;  %v6851_v44 = vpop.f32.mrb[19].mxu1  ;;  %v4563_v59 = vunpack.i.l.bf16 %v6671_v31  ;;  %v2388_v4 = vpack.c.bf16 %v2347_v16, %v2346_v49  ;;  %v4644_v7 = vunpack.i.h.bf16 %v6825_v42  ;;  %v4643_v15 = vunpack.i.l.bf16 %v6825_v42  ;;  %v4858_v31 = vld [vmem:[#allocation4 + $0xe0] sm:$0xff]  ;;  %v4828_v49 = vld [vmem:[%s7552_s7] ss:$8 sps:$4 sm:$0xff]   ;;  %v4830_v16 = vld [vmem:[%s7552_s7 + $0x4] ss:$8 sps:$4 sm:$0xff]  }
 0x2f5   : > { %v6853_v14 = vpop.permute.xlu1 %4686  ;;  %v2187_v34 = vsel %vm384_vm0, %v4858_v31, %v4534_v19  ;;  %v2186_v47 = vsel %vm384_vm0, %v4859_v1, %v4533_v22  ;;  %v2285_v42 = vsel %vm384_vm0, %v7660_v5, %v4564_v9  ;;  %v4569_v19 = vunpack.i.h.bf16 %v6625_v58  ;;  %3069 = vmatprep.subr.bf16.mxu0 %v4830_v16  ;;  %4206 = vmatprep.subr.bf16.mxu1 %v4830_v16  ;;  %v4860_v1 = vld [vmem:[#allocation4 + $0xf8] sm:$0xff] }
 0x2f6   : > { %v2218_v50 = vsel %vm615_vm11, %v2186_v47, %v4538_v27  ;;  %v2219_v38 = vsel %vm615_vm11, %v2187_v34, %v4539_v62  ;;  %v2284_v37 = vsel %vm384_vm0, %v7661_v18, %v4563_v59  ;;  %v2317_v53 = vsel %vm615_vm11, %v2285_v42, %v4634_v3  ;;  %3070 = vmatpush1.bf16.msra.mxu0 %v4828_v49  ;;  %v4831_v34 = vld [vmem:[%s7552_s7 + $0x10] ss:$8 sps:$4 sm:$0xff]  }
 0x2f7   : > { %v2316_v13 = vsel %vm615_vm11, %v2284_v37, %v4633_v23  ;;  %v2250_v57 = vsel %vm630_vm12, %v2218_v50, %v4558_v25  ;;  %v2251_v12 = vsel %vm630_vm12, %v2219_v38, %v4559_v17  ;;  %v4568_v22 = vunpack.i.l.bf16 %v6625_v58  ;;  %4208 = vmatpush1.bf16.msra.mxu1 %v4828_v49  ;;  %v4861_v50 = vld [vmem:[#allocation4 + $0xf0] sm:$0xff] }
 0x2f8   : > { %v6865_v41 = vpop.permute.xlu0 %4671  ;;  %v2348_v62 = vsel %vm630_vm12, %v2316_v13, %v4643_v15  ;;  %v2349_v27 = vsel %vm630_vm12, %v2317_v53, %v4644_v7  ;;  %v4639_v9 = vunpack.i.h.bf16 %v6728_v48  ;;  %v4638_v17 = vunpack.i.l.bf16 %v6728_v48  ;;  %v7662_v53 = vld [vmem:[#allocation21_spill] sm:$0xff] }
 0x2f9   : > { %v6870_v63 = vpop.permute.xlu1 %4696  ;;  %v6875_v55 = vpop.f32.mrb[20].mxu1  ;;  %v4654_v25 = vunpack.i.h.bf16 %v6849_v56  ;;  %v4653_v3 = vunpack.i.l.bf16 %v6849_v56  ;;  %v2387_v58 = vpack.c.bf16 %v2251_v12, %v2250_v57  ;;  %v4674_v7 = vunpack.i.h.bf16 %v6865_v41  ;;  %v4833_v56 = vld [vmem:[%s7552_s7 + $0x14] ss:$8 sps:$4 sm:$0xff]  }
 0x2fa   : > { %v6879_v6 = vpop.f32.mrb[21].mxu1  ;;  %v4673_v48 = vunpack.i.l.bf16 %v6865_v41  ;;  %v2391_v31 = vpack.c.bf16 %v2349_v27, %v2348_v62  ;;  %v2189_v47 = vsel %vm384_vm0, %v4860_v1, %v4569_v19  ;;  %3071 = vmatprep.subr.bf16.mxu0 %v4833_v56  ;;  %v7663_v12 = vld [vmem:[#allocation13_spill] sm:$0xff]  ;;  %4207 = vmatprep.subr.bf16.mxu1 %v4833_v56  ;;  %v4689_v1 = vunpack.i.h.bf16 %v6853_v14 }
 0x2fb   : > { %2704 = vmatmul.mubr.bf16.gmra.mrb[36].mxu0 %v2384_v45  ;;  %v6883_v11 = vpop.f32.mrb[22].mxu1  ;;  %v4648_v45 = vunpack.i.l.bf16 %v6750_v21  ;;  %v2221_v18 = vsel %vm615_vm11, %v2189_v47, %v4639_v9  ;;  %v2287_v57 = vsel %vm384_vm0, %v7662_v53, %v4654_v25  ;;  %v2286_v49 = vsel %vm384_vm0, %v7663_v12, %v4653_v3  ;;  %4209 = vmatpush1.bf16.msra.mxu1 %v4831_v34 }
 0x2fc   : > { %v6885_v51 = vpop.permute.xlu0 %4681  ;;  %2711 = vmatprep.mubr.bf16.mxu0 %v2388_v4  ;;  %v6893_v8 = vpop.f32.mrb[23].mxu1  ;;  %v4649_v4 = vunpack.i.h.bf16 %v6750_v21  ;;  %v2188_v21 = vsel %vm384_vm0, %v4861_v50, %v4568_v22  ;;  %3072 = vmatpush1.bf16.msra.mxu0 %v4831_v34  ;;  %v2318_v22 = vsel %vm615_vm11, %v2286_v49, %v4673_v48  ;;  %v2319_v62 = vsel %vm615_vm11, %v2287_v57, %v4674_v7 }
 0x2fd   : > { %v6895_v28 = vpop.permute.xlu1 %4706  ;;  %v4684_v38 = vunpack.i.h.bf16 %v6885_v51  ;;  %v4683_v41 = vunpack.i.l.bf16 %v6885_v51  ;;  %v2220_v42 = vsel %vm615_vm11, %v2188_v21, %v4638_v17  ;;  %v4669_v9 = vunpack.i.h.bf16 %v6817_v46 }
 0x2fe   : > { %v2252_v19 = vsel %vm630_vm12, %v2220_v42, %v4648_v45  ;;  %v2253_v27 = vsel %vm630_vm12, %v2221_v18, %v4649_v4  ;;  %v4668_v17 = vunpack.i.l.bf16 %v6817_v46  ;;  %v4679_v45 = vunpack.i.h.bf16 %v6827_v40  ;;  %v4863_v42 = vld [vmem:[#allocation4 + $0x108] sm:$0xff] }
 0x2ff   : > { %v2350_v25 = vsel %vm630_vm12, %v2318_v22, %v4683_v41  ;;  %v2351_v3 = vsel %vm630_vm12, %v2319_v62, %v4684_v38  ;;  %v4678_v48 = vunpack.i.l.bf16 %v6827_v40  ;;  %v4688_v7 = vunpack.i.l.bf16 %v6853_v14  ;;  %v4862_v41 = vld [vmem:[#allocation4 + $0x110] sm:$0xff]  ;;  %v7664_v22 = vld [vmem:[#allocation24_spill] sm:$0xff] }
 0x300   : > { %v6913_v59 = vpop.permute.xlu0 %4691  ;;  %v2390_v46 = vpack.c.bf16 %v2253_v27, %v2252_v19  ;;  %v2394_v38 = vpack.c.bf16 %v2351_v3, %v2350_v25  ;;  %v2191_v40 = vsel %vm384_vm0, %v4862_v41, %v4669_v9  ;;  %v2190_v18 = vsel %vm384_vm0, %v4863_v42, %v4668_v17  ;;  %v7665_v27 = vld [vmem:[#allocation18_spill] sm:$0xff] }
 0x301   : > { %v6918_v23 = vpop.permute.xlu1 %4716  ;;  %v6923_v15 = vpop.f32.mrb[24].mxu1  ;;  %v4694_v4 = vunpack.i.h.bf16 %v6913_v59  ;;  %v4693_v34 = vunpack.i.l.bf16 %v6913_v59  ;;  %v2222_v12 = vsel %vm615_vm11, %v2190_v18, %v4678_v48  ;;  %v2223_v14 = vsel %vm615_vm11, %v2191_v40, %v4679_v45 }
 0x302   : > { %v6935_v5 = vpop.f32.mrb[25].mxu1  ;;  %v4699_v19 = vunpack.i.h.bf16 %v6870_v63  ;;  %v2254_v3 = vsel %vm630_vm12, %v2222_v12, %v4688_v7  ;;  %v4698_v48 = vunpack.i.l.bf16 %v6870_v63  ;;  %v4719_v40 = vunpack.i.h.bf16 %v6918_v23  ;;  %v4864_v63 = vld [vmem:[#allocation4 + $0x128] sm:$0xff] }
 0x303   : > { %2712 = vmatmul.mubr.bf16.gmra.mrb[40].mxu0 %v2387_v58  ;;  %v6939_v37 = vpop.f32.mrb[26].mxu1  ;;  %v5010_v58 = vmov 0   ;;  %v2289_v62 = vsel %vm384_vm0, %v7664_v22, %v4694_v4  ;;  %v2288_v9 = vsel %vm384_vm0, %v7665_v27, %v4693_v34  ;;  %v4708_v4 = vunpack.i.l.bf16 %v6895_v28 }
 0x304   : > { %v4702_v13 = vpop.permute.xlu0 %4701  ;;  %2719 = vmatprep.mubr.bf16.mxu0 %v2391_v31  ;;  %v6945_v16 = vpop.f32.mrb[27].mxu1  ;;  %3201 = vmatprep.mubr.bf16.mxu1 %v5010_v58  ;;  %v4718_v7 = vunpack.i.l.bf16 %v6918_v23 }
 0x305   : > { %v6947_v51 = vpop.permute.xlu1 %4726  ;;  %v4704_v47 = vunpack.i.h.bf16 %v4702_v13  ;;  %v4703_v50 = vunpack.i.l.bf16 %v4702_v13 }
 0x307   : > { %v2320_v45 = vsel %vm615_vm11, %v2288_v9, %v4703_v50  ;;  %v2193_v50 = vsel %vm384_vm0, %v4864_v63, %v4699_v19  ;;  %v7666_v9 = vld [vmem:[#allocation26_spill] sm:$0xff] }
 0x308   : > { %v4712_v31 = vpop.permute.xlu0 %4711 }
 0x309   : > { %v6963_v56 = vpop.permute.xlu1 %4736  ;;  %v6966_v21 = vpop.f32.mrb[28].mxu1  ;;  %v4714_v57 = vunpack.i.h.bf16 %v4712_v31  ;;  %v4713_v59 = vunpack.i.l.bf16 %v4712_v31  ;;  %v2321_v31 = vsel %vm615_vm11, %v2289_v62, %v4704_v47 }
 0x30a   : > { %v6970_v53 = vpop.f32.mrb[29].mxu1 }
 0x30b   : > { %2720 = vmatmul.mubr.bf16.gmra.mrb[44].mxu0 %v2390_v46  ;;  %v6974_v49 = vpop.f32.mrb[30].mxu1  ;;  %v2255_v46 = vsel %vm630_vm12, %v2223_v14, %v4689_v1  ;;  %v2352_v41 = vsel %vm630_vm12, %v2320_v45, %v4713_v59  ;;  %v2353_v34 = vsel %vm630_vm12, %v2321_v31, %v4714_v57  ;;  %v4865_v14 = vld [vmem:[#allocation4 + $0x120] sm:$0xff] }
 0x30c   : > { %v4722_v13 = vpop.permute.xlu0 %4721  ;;  %2727 = vmatprep.mubr.bf16.mxu0 %v2394_v38  ;;  %v6981_v17 = vpop.f32.mrb[31].mxu1  ;;  %v4709_v38 = vunpack.i.h.bf16 %v6895_v28  ;;  %v2393_v1 = vpack.c.bf16 %v2255_v46, %v2254_v3  ;;  %v2192_v28 = vsel %vm384_vm0, %v4865_v14, %v4698_v48  ;;  %v2397_v62 = vpack.c.bf16 %v2353_v34, %v2352_v41  ;;  %v7667_v45 = vld [vmem:[#allocation25_spill] sm:$0xff] }
 0x30d   : > { %v4747_v25 = vpop.permute.xlu1 %4746  ;;  %v4724_v18 = vunpack.i.h.bf16 %v4722_v13  ;;  %v4723_v47 = vunpack.i.l.bf16 %v4722_v13  ;;  %v2224_v57 = vsel %vm615_vm11, %v2192_v28, %v4708_v4  ;;  %v4729_v4 = vunpack.i.h.bf16 %v6947_v51 }
 0x30e   : > { %v2225_v27 = vsel %vm615_vm11, %v2193_v50, %v4709_v38  ;;  %v2256_v19 = vsel %vm630_vm12, %v2224_v57, %v4718_v7  ;;  %v4728_v38 = vunpack.i.l.bf16 %v6947_v51  ;;  %v4739_v7 = vunpack.i.h.bf16 %v6963_v56  ;;  %v4867_v57 = vld [vmem:[#allocation4 + $0x138] sm:$0xff] }
 0x30f   : > { %v2257_v13 = vsel %vm630_vm12, %v2225_v27, %v4719_v40  ;;  %v2291_v3 = vsel %vm384_vm0, %v7666_v9, %v4724_v18  ;;  %v2290_v48 = vsel %vm384_vm0, %v7667_v45, %v4723_v47  ;;  %v4738_v40 = vunpack.i.l.bf16 %v6963_v56 }
 0x310   : > { %v4732_v42 = vpop.permute.xlu0 %4731  ;;  %v4749_v18 = vunpack.i.h.bf16 %v4747_v25  ;;  %v4748_v47 = vunpack.i.l.bf16 %v4747_v25  ;;  %v2396_v28 = vpack.c.bf16 %v2257_v13, %v2256_v19 }
 0x311   : > { %v6995_v12 = vpop.permute.xlu1 %4756  ;;  %v4734_v22 = vunpack.i.h.bf16 %v4732_v42  ;;  %v4733_v59 = vunpack.i.l.bf16 %v4732_v42 }
 0x313   : > { %2728 = vmatmul.mubr.bf16.gmra.mrb[48].mxu0 %v2393_v1  ;;  %v2322_v34 = vsel %vm615_vm11, %v2290_v48, %v4733_v59  ;;  %v2323_v42 = vsel %vm615_vm11, %v2291_v3, %v4734_v22  ;;  %v2194_v59 = vsel %vm384_vm0, %v4867_v57, %v4728_v38  ;;  %v4869_v57 = vld [vmem:[#allocation4 + $0x150] sm:$0xff] }
 0x314   : > { %v4742_v23 = vpop.permute.xlu0 %4741  ;;  %2735 = vmatprep.mubr.bf16.mxu0 %v2397_v62  ;;  %v4866_v62 = vld [vmem:[#allocation4 + $0x140] sm:$0xff]  ;;  %v2226_v27 = vsel %vm615_vm11, %v2194_v59, %v4738_v40 }
 0x315   : > { %v4744_v31 = vunpack.i.h.bf16 %v4742_v23  ;;  %v4743_v46 = vunpack.i.l.bf16 %v4742_v23  ;;  %v4767_v41 = vpop.permute.xlu1 %4766  ;;  %v2195_v51 = vsel %vm384_vm0, %v4866_v62, %v4729_v4  ;;  %v2258_v9 = vsel %vm630_vm12, %v2226_v27, %v4748_v47 }
 0x316   : > { %v2227_v56 = vsel %vm615_vm11, %v2195_v51, %v4739_v7  ;;  %v4758_v4 = vunpack.i.l.bf16 %v6995_v12  ;;  %v4769_v38 = vunpack.i.h.bf16 %v4767_v41  ;;  %v4868_v51 = vld [vmem:[#allocation4 + $0x158] sm:$0xff] }
 0x317   : > { %v2354_v63 = vsel %vm630_vm12, %v2322_v34, %v4743_v46  ;;  %v2355_v50 = vsel %vm630_vm12, %v2323_v42, %v4744_v31  ;;  %v2259_v25 = vsel %vm630_vm12, %v2227_v56, %v4749_v18  ;;  %v4759_v46 = vunpack.i.h.bf16 %v6995_v12 }
 0x318   : > { %v4752_v1 = vpop.permute.xlu0 %4751  ;;  %v2400_v22 = vpack.c.bf16 %v2355_v50, %v2354_v63  ;;  %v2399_v31 = vpack.c.bf16 %v2259_v25, %v2258_v9  ;;  %v4768_v34 = vunpack.i.l.bf16 %v4767_v41 }
 0x319   : > { %v4777_v14 = vpop.permute.xlu1 %4776  ;;  %v4754_v3 = vunpack.i.h.bf16 %v4752_v1  ;;  %v4753_v19 = vunpack.i.l.bf16 %v4752_v1 }
 0x31a   : > { %v4779_v47 = vunpack.i.h.bf16 %v4777_v14  ;;  %v4778_v1 = vunpack.i.l.bf16 %v4777_v14 }
 0x31b   : > { %2736 = vmatmul.mubr.bf16.gmra.mrb[52].mxu0 %v2396_v28  ;;  %v2293_v7 = vsel %vm384_vm0, %v6528_v60, %v4754_v3  ;;  %v2292_v40 = vsel %vm384_vm0, %v6515_v24, %v4753_v19  ;;  %v2197_v60 = vsel %vm384_vm0, %v4868_v51, %v4759_v46  ;;  %v2196_v24 = vsel %vm384_vm0, %v4869_v57, %v4758_v4 }
 0x31c   : > { %v4762_v23 = vpop.permute.xlu0 %4761  ;;  %2743 = vmatprep.mubr.bf16.mxu0 %v2400_v22  ;;  %v2228_v27 = vsel %vm615_vm11, %v2196_v24, %v4768_v34  ;;  %v2229_v14 = vsel %vm615_vm11, %v2197_v60, %v4769_v38 }
 0x31d   : > { %v4787_v13 = vpop.permute.xlu1 %4786  ;;  %v4764_v45 = vunpack.i.h.bf16 %v4762_v23  ;;  %v4763_v48 = vunpack.i.l.bf16 %v4762_v23  ;;  %v2260_v56 = vsel %vm630_vm12, %v2228_v27, %v4778_v1  ;;  %v2261_v23 = vsel %vm630_vm12, %v2229_v14, %v4779_v47 }
 0x31e   : > { %v4789_v9 = vunpack.i.h.bf16 %v4787_v13  ;;  %v4788_v25 = vunpack.i.l.bf16 %v4787_v13  ;;  %v2402_v4 = vpack.c.bf16 %v2261_v23, %v2260_v56  ;;  %v4836_v23 = vld [vmem:[%s7551_s6 + $0x4] ss:$8 sps:$4 sm:$0xff]  }
 0x31f   : > { %v2324_v28 = vsel %vm615_vm11, %v2292_v40, %v4763_v48  ;;  %v2325_v62 = vsel %vm615_vm11, %v2293_v7, %v4764_v45  ;;  %3330 = vmatprep.subr.bf16.mxu1 %v4836_v23 }
 0x320   : > { %v4772_v42 = vpop.permute.xlu0 %4771 }
 0x321   : > { %v4774_v63 = vunpack.i.h.bf16 %v4772_v42  ;;  %v4773_v50 = vunpack.i.l.bf16 %v4772_v42  ;;  %v4797_v18 = vpop.permute.xlu1 %4796 }
 0x322   : > { %v4799_v19 = vunpack.i.h.bf16 %v4797_v18  ;;  %v4798_v45 = vunpack.i.l.bf16 %v4797_v18 }
 0x323   : > { %2744 = vmatmul.mubr.bf16.gmra.mrb[56].mxu0 %v2399_v31  ;;  %v2356_v12 = vsel %vm630_vm12, %v2324_v28, %v4773_v50  ;;  %v2357_v41 = vsel %vm630_vm12, %v2325_v62, %v4774_v63  ;;  %v4870_v63 = vld [vmem:[#allocation4 + $0x170] sm:$0xff]  ;;  %v4871_v50 = vld [vmem:[#allocation4 + $0x168] sm:$0xff]  ;;  %v7668_v62 = vld [vmem:[#allocation20_spill] sm:$0xff] }
 0x324   : > { %v4782_v59 = vpop.permute.xlu0 %4781  ;;  %v2403_v22 = vpack.c.bf16 %v2357_v41, %v2356_v12  ;;  %v2199_v38 = vsel %vm384_vm0, %v4870_v63, %v4789_v9  ;;  %v2198_v1 = vsel %vm384_vm0, %v4871_v50, %v4788_v25  ;;  %v7057_v9 = vld [vmem:[%s7550_s5] ss:$0 sm:$0xff] }
 0x325   : > { %v4807_v3 = vpop.permute.xlu1 %4806  ;;  %v4784_v31 = vunpack.i.h.bf16 %v4782_v59  ;;  %v4783_v46 = vunpack.i.l.bf16 %v4782_v59  ;;  %v2230_v13 = vsel %vm615_vm11, %v2198_v1, %v4798_v45  ;;  %v2231_v47 = vsel %vm615_vm11, %v2199_v38, %v4799_v19 }
 0x326   : > { %2751 = vmatprep.mubr.bf16.mxu0 %v2403_v22  ;;  %v4809_v42 = vunpack.i.h.bf16 %v4807_v3  ;;  %v4808_v7 = vunpack.i.l.bf16 %v4807_v3 }
 0x327   : > { %v2295_v28 = vsel %vm384_vm0, %v6305_v43, %v4784_v31  ;;  %v2294_v12 = vsel %vm384_vm0, %v7668_v62, %v4783_v46 }
 0x328   : > { %v4792_v48 = vpop.permute.xlu0 %4791  ;;  %v2262_v24 = vsel %vm630_vm12, %v2230_v13, %v4808_v7  ;;  %v2263_v59 = vsel %vm630_vm12, %v2231_v47, %v4809_v42 }
 0x329   : > { %v4794_v40 = vunpack.i.h.bf16 %v4792_v48  ;;  %v4793_v34 = vunpack.i.l.bf16 %v4792_v48  ;;  %v2405_v56 = vpack.c.bf16 %v2263_v59, %v2262_v24 }
 0x32b   : > { %2752 = vmatmul.mubr.bf16.gmra.mrb[60].mxu0 %v2402_v4  ;;  %v2326_v60 = vsel %vm615_vm11, %v2294_v12, %v4793_v34  ;;  %v2327_v57 = vsel %vm615_vm11, %v2295_v28, %v4794_v40 }
 0x32c   : > { %v4802_v18 = vpop.permute.xlu0 %4801 }
 0x32d   : > { %v4804_v41 = vunpack.i.h.bf16 %v4802_v18  ;;  %v4803_v51 = vunpack.i.l.bf16 %v4802_v18 }
 0x32f   : > { %v2358_v22 = vsel %vm630_vm12, %v2326_v60, %v4803_v51  ;;  %v2359_v27 = vsel %vm630_vm12, %v2327_v57, %v4804_v41 }
 0x330   : > { %v2406_v14 = vpack.c.bf16 %v2359_v27, %v2358_v22 }
 0x332   : > { %2759 = vmatprep.mubr.bf16.mxu0 %v2406_v14 }
 0x333   : > { %2760 = vmatmul.mubr.bf16.gmra.mrb[64].mxu0 %v2405_v56 }
 0x334   : > { %3101 = vmatprep.mubr.bf16.mxu0 %v5010_v58 }
 0x372   : > { %v3954_v43 = vpop.f32.mrb[4].mxu0 }
 0x373   : > { %v3955_v25 = vpop.f32.mrb[5].mxu0 }
 0x374   : > { %v3956_v3 = vadd.f32 %v3955_v25, %v3954_v43  ;;  %v3957_v19 = vpop.f32.mrb[6].mxu0 }
 0x375   : > { %v3958_v45 = vpop.f32.mrb[7].mxu0 }
 0x376   : > { %v2642_v48 = vadd.f32 %v3956_v3, %v7057_v9  ;;  %v3959_v31 = vadd.f32 %v3958_v45, %v3957_v19 }
 0x378   : > { %v2803_v46 = vadd.f32 %v6695_v36, %v2642_v48  ;;  %v2645_v4 = vadd.f32 %v3959_v31, %v7057_v9 }
 0x37a   : > { %v2806_v42 = vadd.f32 %v6708_v0, %v2645_v4  ;;  %v3960_v7 = vpop.f32.mrb[8].mxu0  ;;  %v2929_v34 = vmax.f32 %v2803_v46, 0.0 }
 0x37b   : > { %v3961_v40 = vpop.f32.mrb[9].mxu0  ;;  %v7069_v0 = vpop.f32.mrb[32].mxu1 }
 0x37c   : > { %v2930_v63 = vmax.f32 %v2806_v42, 0.0  ;;  %v3962_v38 = vadd.f32 %v3961_v40, %v3960_v7  ;;  %v3963_v50 = vpop.f32.mrb[10].mxu0  ;;  %v7071_v51 = vpop.f32.mrb[33].mxu1 }
 0x37d   : > { %v3964_v1 = vpop.f32.mrb[11].mxu0  ;;  %v7073_v57 = vpop.f32.mrb[34].mxu1 }
 0x37e   : > { %v2981_v13 = vpack.c.bf16 %v2930_v63, %v2929_v34  ;;  %v2650_v47 = vadd.f32 %v3962_v38, %v7057_v9  ;;  %v3965_v18 = vadd.f32 %v3964_v1, %v3963_v50  ;;  %v7075_v24 = vpop.f32.mrb[35].mxu1 }
 0x380   : > { %v2811_v28 = vadd.f32 %v6693_v35, %v2650_v47  ;;  %v2653_v62 = vadd.f32 %v3965_v18, %v7057_v9  ;;  %3867 = vmatmul.mubr.msk.bf16.vlgmr.msra.gmra.mrb[68].mxu0 %vm384_vm0, %v2981_v13 }
 0x381   : > { %3111 = vmatprep.mubr.bf16.mxu0 %v5010_v58 }
 0x382   : > { %v2814_v36 = vadd.f32 %v6702_v20, %v2653_v62  ;;  %v2931_v12 = vmax.f32 %v2811_v28, 0.0 }
 0x384   : > { %v2932_v41 = vmax.f32 %v2814_v36, 0.0 }
 0x386   : > { %v2982_v60 = vpack.c.bf16 %v2932_v41, %v2931_v12 }
 0x388   : > { %3868 = vmatmul.mubr.msk.bf16.gmra.mrb[72].mxu0 %vm384_vm0, %v2982_v60 }
 0x389   : > { %3121 = vmatprep.mubr.bf16.mxu0 %v5010_v58 }
 0x39e   : > { %v3966_v35 = vpop.f32.mrb[12].mxu0 }
 0x39f   : > { %v3967_v59 = vpop.f32.mrb[13].mxu0 }
 0x3a0   : > { %v3968_v22 = vadd.f32 %v3967_v59, %v3966_v35  ;;  %v3969_v27 = vpop.f32.mrb[14].mxu0 }
 0x3a1   : > { %v3970_v20 = vpop.f32.mrb[15].mxu0 }
 0x3a2   : > { %v2658_v14 = vadd.f32 %v3968_v22, %v7057_v9  ;;  %v3971_v56 = vadd.f32 %v3970_v20, %v3969_v27 }
 0x3a4   : > { %v2819_v43 = vadd.f32 %v6734_v52, %v2658_v14  ;;  %v2661_v23 = vadd.f32 %v3971_v56, %v7057_v9 }
 0x3a6   : > { %v2822_v25 = vadd.f32 %v6746_v30, %v2661_v23  ;;  %v3972_v3 = vpop.f32.mrb[16].mxu0  ;;  %v2933_v45 = vmax.f32 %v2819_v43, 0.0 }
 0x3a7   : > { %v3973_v19 = vpop.f32.mrb[17].mxu0 }
 0x3a8   : > { %v2934_v48 = vmax.f32 %v2822_v25, 0.0  ;;  %v3974_v31 = vadd.f32 %v3973_v19, %v3972_v3  ;;  %v3975_v46 = vpop.f32.mrb[18].mxu0 }
 0x3a9   : > { %v3976_v4 = vpop.f32.mrb[19].mxu0 }
 0x3aa   : > { %v2983_v42 = vpack.c.bf16 %v2934_v48, %v2933_v45  ;;  %v2666_v7 = vadd.f32 %v3974_v31, %v7057_v9  ;;  %v3977_v40 = vadd.f32 %v3976_v4, %v3975_v46 }
 0x3ac   : > { %v2827_v34 = vadd.f32 %v6730_v54, %v2666_v7  ;;  %v2669_v63 = vadd.f32 %v3977_v40, %v7057_v9  ;;  %3869 = vmatmul.mubr.msk.bf16.gmra.mrb[76].mxu0 %vm384_vm0, %v2983_v42 }
 0x3ad   : > { %3131 = vmatprep.mubr.bf16.mxu0 %v5010_v58 }
 0x3ae   : > { %v2830_v52 = vadd.f32 %v6739_v29, %v2669_v63  ;;  %v3978_v30 = vpop.f32.mrb[20].mxu0  ;;  %v2935_v50 = vmax.f32 %v2827_v34, 0.0 }
 0x3af   : > { %v3979_v38 = vpop.f32.mrb[21].mxu0 }
 0x3b0   : > { %v2936_v1 = vmax.f32 %v2830_v52, 0.0  ;;  %v3980_v13 = vadd.f32 %v3979_v38, %v3978_v30  ;;  %v3981_v47 = vpop.f32.mrb[22].mxu0 }
 0x3b1   : > { %v3982_v18 = vpop.f32.mrb[23].mxu0 }
 0x3b2   : > { %v2984_v28 = vpack.c.bf16 %v2936_v1, %v2935_v50  ;;  %v2674_v62 = vadd.f32 %v3980_v13, %v7057_v9  ;;  %v3983_v36 = vadd.f32 %v3982_v18, %v3981_v47 }
 0x3b4   : > { %v2835_v54 = vadd.f32 %v6795_v32, %v2674_v62  ;;  %v2677_v12 = vadd.f32 %v3983_v36, %v7057_v9  ;;  %3870 = vmatmul.mubr.msk.bf16.gmra.mrb[80].mxu0 %vm384_vm0, %v2984_v28 }
 0x3b5   : > { %3141 = vmatprep.mubr.bf16.mxu0 %v5010_v58 }
 0x3b6   : > { %v2838_v29 = vadd.f32 %v6815_v10, %v2677_v12  ;;  %v3984_v41 = vpop.f32.mrb[24].mxu0  ;;  %v2937_v35 = vmax.f32 %v2835_v54, 0.0 }
 0x3b7   : > { %v3985_v60 = vpop.f32.mrb[25].mxu0 }
 0x3b8   : > { %v2938_v59 = vmax.f32 %v2838_v29, 0.0  ;;  %v3986_v22 = vadd.f32 %v3985_v60, %v3984_v41  ;;  %v3987_v27 = vpop.f32.mrb[26].mxu0 }
 0x3b9   : > { %v3988_v20 = vpop.f32.mrb[27].mxu0 }
 0x3ba   : > { %v2985_v14 = vpack.c.bf16 %v2938_v59, %v2937_v35  ;;  %v2682_v56 = vadd.f32 %v3986_v22, %v7057_v9  ;;  %v3989_v43 = vadd.f32 %v3988_v20, %v3987_v27 }
 0x3bc   : > { %v2843_v32 = vadd.f32 %v6786_v39, %v2682_v56  ;;  %v2685_v23 = vadd.f32 %v3989_v43, %v7057_v9  ;;  %3871 = vmatmul.mubr.msk.bf16.gmra.mrb[84].mxu0 %vm384_vm0, %v2985_v14 }
 0x3bd   : > { %3151 = vmatprep.mubr.bf16.mxu0 %v5010_v58 }
 0x3be   : > { %v2846_v10 = vadd.f32 %v6803_v33, %v2685_v23  ;;  %v3990_v25 = vpop.f32.mrb[28].mxu0  ;;  %v2939_v19 = vmax.f32 %v2843_v32, 0.0 }
 0x3bf   : > { %v3991_v3 = vpop.f32.mrb[29].mxu0 }
 0x3c0   : > { %v2940_v45 = vmax.f32 %v2846_v10, 0.0  ;;  %v3992_v48 = vadd.f32 %v3991_v3, %v3990_v25  ;;  %v3993_v31 = vpop.f32.mrb[30].mxu0 }
 0x3c1   : > { %v3994_v46 = vpop.f32.mrb[31].mxu0 }
 0x3c2   : > { %v2986_v4 = vpack.c.bf16 %v2940_v45, %v2939_v19  ;;  %v2690_v42 = vadd.f32 %v3992_v48, %v7057_v9  ;;  %v3995_v7 = vadd.f32 %v3994_v46, %v3993_v31 }
 0x3c4   : > { %v2851_v39 = vadd.f32 %v6841_v26, %v2690_v42  ;;  %v2693_v40 = vadd.f32 %v3995_v7, %v7057_v9  ;;  %3872 = vmatmul.mubr.msk.bf16.gmra.mrb[88].mxu0 %vm384_vm0, %v2986_v4 }
 0x3c5   : > { %3161 = vmatprep.mubr.bf16.mxu0 %v5010_v58 }
 0x3c6   : > { %v2854_v33 = vadd.f32 %v6851_v44, %v2693_v40  ;;  %v3996_v34 = vpop.f32.mrb[32].mxu0  ;;  %v2941_v52 = vmax.f32 %v2851_v39, 0.0 }
 0x3c7   : > { %v3997_v63 = vpop.f32.mrb[33].mxu0 }
 0x3c8   : > { %v2942_v30 = vmax.f32 %v2854_v33, 0.0  ;;  %v3998_v38 = vadd.f32 %v3997_v63, %v3996_v34  ;;  %v3999_v50 = vpop.f32.mrb[34].mxu0 }
 0x3c9   : > { %v4000_v1 = vpop.f32.mrb[35].mxu0 }
 0x3ca   : > { %v2987_v13 = vpack.c.bf16 %v2942_v30, %v2941_v52  ;;  %v2698_v47 = vadd.f32 %v3998_v38, %v7057_v9  ;;  %v4001_v18 = vadd.f32 %v4000_v1, %v3999_v50 }
 0x3cc   : > { %v2859_v26 = vadd.f32 %v6835_v61, %v2698_v47  ;;  %v2701_v28 = vadd.f32 %v4001_v18, %v7057_v9  ;;  %3873 = vmatmul.mubr.msk.bf16.gmra.mrb[92].mxu0 %vm384_vm0, %v2987_v13  ;;  %v4834_v18 = vld [vmem:[%s7551_s6] ss:$8 sps:$4 sm:$0xff]  }
 0x3cd   : > { %3171 = vmatprep.mubr.bf16.mxu0 %v5010_v58 }
 0x3ce   : > { %v2862_v44 = vadd.f32 %v6847_v2, %v2701_v28  ;;  %v4002_v62 = vpop.f32.mrb[36].mxu0  ;;  %v2943_v54 = vmax.f32 %v2859_v26, 0.0 }
 0x3cf   : > { %v4003_v36 = vpop.f32.mrb[37].mxu0 }
 0x3d0   : > { %v2944_v12 = vmax.f32 %v2862_v44, 0.0  ;;  %v4004_v29 = vadd.f32 %v4003_v36, %v4002_v62  ;;  %v4005_v41 = vpop.f32.mrb[38].mxu0  ;;  %v4839_v44 = vld [vmem:[%s7551_s6 + $0x14] ss:$8 sps:$4 sm:$0xff]   ;;  %v4837_v36 = vld [vmem:[%s7551_s6 + $0x10] ss:$8 sps:$4 sm:$0xff]  }
 0x3d1   : > { %v4006_v60 = vpop.f32.mrb[39].mxu0 }
 0x3d2   : > { %v2988_v35 = vpack.c.bf16 %v2944_v12, %v2943_v54  ;;  %v2706_v59 = vadd.f32 %v4004_v29, %v7057_v9  ;;  %v4007_v22 = vadd.f32 %v4006_v60, %v4005_v41 }
 0x3d4   : > { %v2867_v61 = vadd.f32 %v6879_v6, %v2706_v59  ;;  %v2709_v27 = vadd.f32 %v4007_v22, %v7057_v9  ;;  %3874 = vmatmul.mubr.msk.bf16.gmra.mrb[96].mxu0 %vm384_vm0, %v2988_v35 }
 0x3d5   : > { %3181 = vmatprep.mubr.bf16.mxu0 %v5010_v58 }
 0x3d6   : > { %v2870_v2 = vadd.f32 %v6893_v8, %v2709_v27  ;;  %v4008_v20 = vpop.f32.mrb[40].mxu0  ;;  %v2945_v56 = vmax.f32 %v2867_v61, 0.0 }
 0x3d7   : > { %v4009_v14 = vpop.f32.mrb[41].mxu0 }
 0x3d8   : > { %v2946_v43 = vmax.f32 %v2870_v2, 0.0  ;;  %v4010_v32 = vadd.f32 %v4009_v14, %v4008_v20  ;;  %v4011_v23 = vpop.f32.mrb[42].mxu0 }
 0x3d9   : > { %v4012_v10 = vpop.f32.mrb[43].mxu0 }
 0x3da   : > { %v2989_v25 = vpack.c.bf16 %v2946_v43, %v2945_v56  ;;  %v2714_v3 = vadd.f32 %v4010_v32, %v7057_v9  ;;  %v4013_v19 = vadd.f32 %v4012_v10, %v4011_v23 }
 0x3dc   : > { %v2875_v6 = vadd.f32 %v6875_v55, %v2714_v3  ;;  %v2717_v45 = vadd.f32 %v4013_v19, %v7057_v9  ;;  %3875 = vmatmul.mubr.msk.bf16.gmra.mrb[100].mxu0 %vm384_vm0, %v2989_v25 }
 0x3dd   : > { %3191 = vmatprep.mubr.bf16.mxu0 %v5010_v58 }
 0x3de   : > { %v2878_v8 = vadd.f32 %v6883_v11, %v2717_v45  ;;  %v4014_v48 = vpop.f32.mrb[44].mxu0  ;;  %v2947_v46 = vmax.f32 %v2875_v6, 0.0 }
 0x3df   : > { %v4015_v31 = vpop.f32.mrb[45].mxu0 }
 0x3e0   : > { %v2948_v4 = vmax.f32 %v2878_v8, 0.0  ;;  %v4016_v42 = vadd.f32 %v4015_v31, %v4014_v48  ;;  %v4017_v7 = vpop.f32.mrb[46].mxu0 }
 0x3e1   : > { %v4018_v39 = vpop.f32.mrb[47].mxu0 }
 0x3e2   : > { %v2990_v40 = vpack.c.bf16 %v2948_v4, %v2947_v46  ;;  %v2722_v33 = vadd.f32 %v4016_v42, %v7057_v9  ;;  %v4019_v34 = vadd.f32 %v4018_v39, %v4017_v7 }
 0x3e4   : > { %v2883_v55 = vadd.f32 %v6935_v5, %v2722_v33  ;;  %v2725_v63 = vadd.f32 %v4019_v34, %v7057_v9  ;;  %3876 = vmatmul.mubr.msk.bf16.gmra.mrb[104].mxu0 %vm384_vm0, %v2990_v40 }
 0x3e6   : > { %v2886_v52 = vadd.f32 %v6945_v16, %v2725_v63  ;;  %v4020_v11 = vpop.f32.mrb[48].mxu0  ;;  %v2949_v38 = vmax.f32 %v2883_v55, 0.0 }
 0x3e7   : > { %v4021_v30 = vpop.f32.mrb[49].mxu0 }
 0x3e8   : > { %v2950_v50 = vmax.f32 %v2886_v52, 0.0  ;;  %v4022_v1 = vadd.f32 %v4021_v30, %v4020_v11  ;;  %v4023_v13 = vpop.f32.mrb[50].mxu0 }
 0x3e9   : > { %v4024_v47 = vpop.f32.mrb[51].mxu0 }
 0x3ea   : > { %v2991_v26 = vpack.c.bf16 %v2950_v50, %v2949_v38  ;;  %v2730_v5 = vadd.f32 %v4022_v1, %v7057_v9  ;;  %v4025_v28 = vadd.f32 %v4024_v47, %v4023_v13 }
 0x3ec   : > { %v2891_v16 = vadd.f32 %v6923_v15, %v2730_v5  ;;  %v2733_v62 = vadd.f32 %v4025_v28, %v7057_v9  ;;  %3877 = vmatmul.mubr.msk.bf16.vlgmr.msra.gmra.mrb[36].mxu1 %vm384_vm0, %v2991_v26 }
 0x3ed   : > { %3331 = vmatpush1.bf16.msra.mxu1 %v4834_v18  ;;  %3211 = vmatprep.mubr.bf16.mxu1 %v5010_v58 }
 0x3ee   : > { %v2894_v54 = vadd.f32 %v6939_v37, %v2733_v62  ;;  %v4026_v12 = vpop.f32.mrb[52].mxu0  ;;  %3332 = vmatprep.subr.bf16.mxu1 %v4839_v44  ;;  %v2951_v41 = vmax.f32 %v2891_v16, 0.0  ;;  %v4873_v44 = vld [vmem:[%s5172_s19 + $0x8] sm:$0xff]  ;;  %v4875_v16 = vld [vmem:[%s5172_s19 + $0x18] sm:$0xff] }
 0x3ef   : > { %v4027_v29 = vpop.f32.mrb[53].mxu0 }
 0x3f0   : > { %v2952_v60 = vmax.f32 %v2894_v54, 0.0  ;;  %v4028_v35 = vadd.f32 %v4027_v29, %v4026_v12  ;;  %v4029_v15 = vpop.f32.mrb[54].mxu0  ;;  %v4877_v54 = vld [vmem:[%s5172_s19 + $0x28] sm:$0xff]  ;;  %v4878_v29 = vld [vmem:[%s5172_s19 + $0x30] sm:$0xff] }
 0x3f1   : > { %v4030_v59 = vpop.f32.mrb[55].mxu0  ;;  %3333 = vmatpush1.bf16.msra.mxu1 %v4837_v36  ;;  %v4876_v36 = vld [vmem:[%s5172_s19 + $0x20] sm:$0xff] }
 0x3f2   : > { %v2992_v22 = vpack.c.bf16 %v2952_v60, %v2951_v41  ;;  %v2738_v61 = vadd.f32 %v4028_v35, %v7057_v9  ;;  %v4031_v27 = vadd.f32 %v4030_v59, %v4029_v15  ;;  %v2963_v12 = vpack.c.bf16 %v4877_v54, %v4876_v36  ;;  %v4879_v41 = vld [vmem:[%s5172_s19 + $0x38] sm:$0xff]  ;;  %v4880_v35 = vld [vmem:[%s5172_s19 + $0x40] sm:$0xff]  ;;  %v4881_v15 = vld [vmem:[%s5172_s19 + $0x48] sm:$0xff] }
 0x3f3   : > { %v2964_v60 = vpack.c.bf16 %v4879_v41, %v4878_v29  ;;  %v2965_v59 = vpack.c.bf16 %v4881_v15, %v4880_v35 }
 0x3f4   : > { %v2899_v2 = vadd.f32 %v6970_v53, %v2738_v61  ;;  %v2741_v20 = vadd.f32 %v4031_v27, %v7057_v9  ;;  %3878 = vmatmul.mubr.msk.bf16.gmra.mrb[40].mxu1 %vm384_vm0, %v2992_v22  ;;  %v4882_v22 = vld [vmem:[%s5172_s19 + $0x50] sm:$0xff]  ;;  %v4883_v61 = vld [vmem:[%s5172_s19 + $0x58] sm:$0xff] }
 0x3f5   : > { %3221 = vmatprep.mubr.bf16.mxu1 %v5010_v58  ;;  %v2966_v27 = vpack.c.bf16 %v4883_v61, %v4882_v22 }
 0x3f6   : > { %v2902_v37 = vadd.f32 %v6981_v17, %v2741_v20  ;;  %v4032_v14 = vpop.f32.mrb[56].mxu0  ;;  %v2953_v43 = vmax.f32 %v2899_v2, 0.0  ;;  %v4884_v2 = vld [vmem:[%s5172_s19 + $0x60] sm:$0xff]  ;;  %v4885_v20 = vld [vmem:[%s5172_s19 + $0x68] sm:$0xff] }
 0x3f7   : > { %v4033_v56 = vpop.f32.mrb[57].mxu0 }
 0x3f8   : > { %v2954_v32 = vmax.f32 %v2902_v37, 0.0  ;;  %v4034_v23 = vadd.f32 %v4033_v56, %v4032_v14  ;;  %v4035_v10 = vpop.f32.mrb[58].mxu0  ;;  %v2967_v37 = vpack.c.bf16 %v4885_v20, %v4884_v2  ;;  %v4886_v14 = vld [vmem:[%s5172_s19 + $0x70] sm:$0xff]  ;;  %v4887_v56 = vld [vmem:[%s5172_s19 + $0x78] sm:$0xff] }
 0x3f9   : > { %v4036_v25 = vpop.f32.mrb[59].mxu0 }
 0x3fa   : > { %v2993_v3 = vpack.c.bf16 %v2954_v32, %v2953_v43  ;;  %v2746_v19 = vadd.f32 %v4034_v23, %v7057_v9  ;;  %v4037_v6 = vadd.f32 %v4036_v25, %v4035_v10  ;;  %v2968_v43 = vpack.c.bf16 %v4887_v56, %v4886_v14 }
 0x3fc   : > { %v2907_v53 = vadd.f32 %v6966_v21, %v2746_v19  ;;  %v2749_v45 = vadd.f32 %v4037_v6, %v7057_v9  ;;  %3879 = vmatmul.mubr.msk.bf16.gmra.mrb[44].mxu1 %vm384_vm0, %v2993_v3  ;;  %v4888_v3 = vld [vmem:[%s5172_s19 + $0x80] sm:$0xff]  ;;  %v4889_v19 = vld [vmem:[%s5172_s19 + $0x88] sm:$0xff] }
 0x3fd   : > { %3231 = vmatprep.mubr.bf16.mxu1 %v5010_v58  ;;  %v2969_v6 = vpack.c.bf16 %v4889_v19, %v4888_v3  ;;  %v3523_v3 = vld [vmem:[%s7553_s8] sm:$0x3] }
 0x3fe   : > { %v2910_v17 = vadd.f32 %v6974_v49, %v2749_v45  ;;  %v4038_v8 = vpop.f32.mrb[60].mxu0  ;;  %v2955_v31 = vmax.f32 %v2907_v53, 0.0  ;;  %v7669_v19 = vld [vmem:[#allocation11_spill] sm:$0xff] }
 0x3ff   : > { %v4039_v48 = vpop.f32.mrb[61].mxu0 }
 0x400   : > { %v2956_v46 = vmax.f32 %v2910_v17, 0.0  ;;  %v4040_v4 = vadd.f32 %v4039_v48, %v4038_v8  ;;  %v4041_v42 = vpop.f32.mrb[62].mxu0  ;;  %v4890_v48 = vld [vmem:[%s5172_s19 + $0x90] sm:$0xff] }
 0x401   : > { %v4042_v7 = vpop.f32.mrb[63].mxu0 }
 0x402   : > { %v2994_v39 = vpack.c.bf16 %v2956_v46, %v2955_v31  ;;  %v2754_v40 = vadd.f32 %v4040_v4, %v7057_v9  ;;  %v4043_v33 = vadd.f32 %v4042_v7, %v4041_v42  ;;  %v4891_v31 = vld [vmem:[%s5172_s19 + $0x98] sm:$0xff]  ;;  %v4892_v4 = vld [vmem:[%s5172_s19 + $0xa0] sm:$0xff]  ;;  %v4893_v42 = vld [vmem:[%s5172_s19 + $0xa8] sm:$0xff] }
 0x403   : > { %v2970_v46 = vpack.c.bf16 %v4891_v31, %v4890_v48  ;;  %v2971_v7 = vpack.c.bf16 %v4893_v42, %v4892_v4  ;;  %v7670_v48 = vld [vmem:[#allocation12_spill] sm:$0xff] }
 0x404   : > { %v2915_v21 = vadd.f32 %v7071_v51, %v2754_v40  ;;  %v2757_v34 = vadd.f32 %v4043_v33, %v7057_v9  ;;  %3880 = vmatmul.mubr.msk.bf16.gmra.mrb[48].mxu1 %vm384_vm0, %v2994_v39  ;;  %v4894_v39 = vld [vmem:[%s5172_s19 + $0xb0] sm:$0xff]  ;;  %v4895_v40 = vld [vmem:[%s5172_s19 + $0xb8] sm:$0xff]  ;;  %v7319_v31 = vrot.slane %v3523_v3, %v7670_v48 }
 0x405   : > { %3241 = vmatprep.mubr.bf16.mxu1 %v5010_v58  ;;  %v2972_v33 = vpack.c.bf16 %v4895_v40, %v4894_v39 }
 0x406   : > { %v2918_v49 = vadd.f32 %v7075_v24, %v2757_v34  ;;  %v4044_v55 = vpop.f32.mrb[64].mxu0  ;;  %v2957_v52 = vmax.f32 %v2915_v21, 0.0  ;;  %v4896_v21 = vld [vmem:[%s5172_s19 + $0xc0] sm:$0xff]  ;;  %v4897_v34 = vld [vmem:[%s5172_s19 + $0xc8] sm:$0xff] }
 0x407   : > { %v4045_v63 = vpop.f32.mrb[65].mxu0 }
 0x408   : > { %v2958_v11 = vmax.f32 %v2918_v49, 0.0  ;;  %v4046_v30 = vadd.f32 %v4045_v63, %v4044_v55  ;;  %v4047_v38 = vpop.f32.mrb[66].mxu0  ;;  %v2973_v49 = vpack.c.bf16 %v4897_v34, %v4896_v21 }
 0x409   : > { %v4048_v50 = vpop.f32.mrb[67].mxu0 }
 0x40a   : > { %v2995_v1 = vpack.c.bf16 %v2958_v11, %v2957_v52  ;;  %v2762_v51 = vadd.f32 %v4046_v30, %v7057_v9  ;;  %v4049_v13 = vadd.f32 %v4048_v50, %v4047_v38  ;;  %v4898_v52 = vld [vmem:[%s5172_s19 + $0xd0] sm:$0xff]  ;;  %v4899_v11 = vld [vmem:[%s5172_s19 + $0xd8] sm:$0xff] }
 0x40b   : > { %v2974_v30 = vpack.c.bf16 %v4899_v11, %v4898_v52 }
 0x40c   : > { %v2923_v47 = vadd.f32 %v7069_v0, %v2762_v51  ;;  %v2765_v18 = vadd.f32 %v4049_v13, %v7057_v9  ;;  %3881 = vmatmul.mubr.msk.bf16.gmra.mrb[52].mxu1 %vm384_vm0, %v2995_v1  ;;  %v4872_v0 = vld [vmem:[%s5172_s19] sm:$0xff] }
 0x40d   : > { %3251 = vmatprep.mubr.bf16.mxu1 %v5010_v58  ;;  %v2961_v9 = vpack.c.bf16 %v4873_v44, %v4872_v0  ;;  %v4900_v13 = vld [vmem:[%s5172_s19 + $0xe0] sm:$0xff]  ;;  %v4902_v0 = vld [vmem:[%s5172_s19 + $0xf0] sm:$0xff]  ;;  %v4903_v44 = vld [vmem:[%s5172_s19 + $0xf8] sm:$0xff] }
 0x40e   : > { %v2926_v24 = vadd.f32 %v7073_v57, %v2765_v18  ;;  %v2959_v26 = vmax.f32 %v2923_v47, 0.0  ;;  %v4874_v57 = vld [vmem:[%s5172_s19 + $0x10] sm:$0xff]  ;;  %v4901_v47 = vld [vmem:[%s5172_s19 + $0xe8] sm:$0xff]  ;;  %s4938_s19 = sshll.u32 %s5011_s20, 4  ;;  %s4939_s19 = int_to_ptr.vmem [resolvable:$false] %s4938_s19 }
 0x40f   : > { %v2962_v62 = vpack.c.bf16 %v4875_v16, %v4874_v57  ;;  %v2975_v18 = vpack.c.bf16 %v4901_v47, %v4900_v13  ;;  %s4940_s28 = scalar_lea.vmem %s4939_s19, 16384  ;;  %p4941_p8 = scmp.lt.s32.totalorder %s7498_s23, %s4939_s19 }
 0x410   : > { %v2960_v5 = vmax.f32 %v2926_v24, 0.0  ;;  %p4942_p10 = scmp.lt.s32.totalorder %s4940_s28, %s4934_s24 }
 0x412   : > { %v2996_v28 = vpack.c.bf16 %v2960_v5, %v2959_v26  ;;  %p4943_p0 = por %p4942_p10, %p4941_p8 }
 0x414   : > { %3882 = vmatmul.mubr.msk.bf16.gmra.mrb[56].mxu1 %vm384_vm0, %v2996_v28  ;;  %p4944_p2 = pnand %p4943_p0, %p4937_p13 }
 0x415   : > { %3362 = vmatprep.mubr.bf16.mxu1 %v5010_v58 }
 0x41c   : > { %3887 = vmatmul.mubr.msk.bf16.vlgmr.msra.gmra.mrb[60].mxu1 %vm384_vm0, %v2961_v9  ;;  %v2976_v9 = vpack.c.bf16 %v4903_v44, %v4902_v0 }
 0x41d   : > { %3372 = vmatprep.mubr.bf16.mxu1 %v5010_v58 }
 0x424   : > { %3888 = vmatmul.mubr.msk.bf16.gmra.mrb[64].mxu1 %vm384_vm0, %v2962_v62 }
 0x425   : > { %3382 = vmatprep.mubr.bf16.mxu1 %v5010_v58 }
 0x42c   : > { %3889 = vmatmul.mubr.msk.bf16.gmra.mrb[68].mxu1 %vm384_vm0, %v2963_v12 }
 0x42d   : > { %3392 = vmatprep.mubr.bf16.mxu1 %v5010_v58 }
 0x434   : > { %3890 = vmatmul.mubr.msk.bf16.gmra.mrb[72].mxu1 %vm384_vm0, %v2964_v60 }
 0x435   : > { %3402 = vmatprep.mubr.bf16.mxu1 %v5010_v58 }
 0x43c   : > { %3891 = vmatmul.mubr.msk.bf16.gmra.mrb[76].mxu1 %vm384_vm0, %v2965_v59 }
 0x43d   : > { %3412 = vmatprep.mubr.bf16.mxu1 %v5010_v58 }
 0x444   : > { %3892 = vmatmul.mubr.msk.bf16.gmra.mrb[80].mxu1 %vm384_vm0, %v2966_v27 }
 0x445   : > { %3422 = vmatprep.mubr.bf16.mxu1 %v5010_v58 }
 0x44c   : > { %3893 = vmatmul.mubr.msk.bf16.gmra.mrb[84].mxu1 %vm384_vm0, %v2967_v37 }
 0x44d   : > { %3432 = vmatprep.mubr.bf16.mxu1 %v5010_v58 }
 0x453   : > { %v7201_v32 = vpop.f32.mrb[68].mxu0 }
 0x454   : > { %v7203_v23 = vpop.f32.mrb[69].mxu0  ;;  %3894 = vmatmul.mubr.msk.bf16.gmra.mrb[88].mxu1 %vm384_vm0, %v2968_v43 }
 0x455   : > { %v7206_v10 = vpop.f32.mrb[70].mxu0  ;;  %3442 = vmatprep.mubr.bf16.mxu1 %v5010_v58 }
 0x456   : > { %v7209_v25 = vpop.f32.mrb[71].mxu0 }
 0x45b   : > { %v7213_v53 = vpop.f32.mrb[72].mxu0 }
 0x45c   : > { %v7215_v45 = vpop.f32.mrb[73].mxu0  ;;  %3895 = vmatmul.mubr.msk.bf16.gmra.mrb[92].mxu1 %vm384_vm0, %v2969_v6  ;;  %v3531_v6 = vsub.s32 1, %v7669_v19 }
 0x45d   : > { %v7218_v17 = vpop.f32.mrb[74].mxu0  ;;  %3452 = vmatprep.mubr.bf16.mxu1 %v5010_v58 }
 0x45e   : > { %v7221_v8 = vpop.f32.mrb[75].mxu0 }
 0x464   : > { %3896 = vmatmul.mubr.msk.bf16.gmra.mrb[96].mxu1 %vm384_vm0, %v2970_v46  ;;  %v7321_v46 = vrot.slane %v3523_v3, %v3531_v6 }
 0x465   : > { %3462 = vmatprep.mubr.bf16.mxu1 %v5010_v58 }
 0x46c   : > { %3897 = vmatmul.mubr.msk.bf16.gmra.mrb[36].mxu1 %vm384_vm0, %v2971_v7 }
 0x46d   : > { %3472 = vmatprep.mubr.bf16.mxu1 %v5010_v58 }
 0x474   : > { %3898 = vmatmul.mubr.msk.bf16.gmra.mrb[40].mxu1 %vm384_vm0, %v2972_v33 }
 0x475   : > { %3482 = vmatprep.mubr.bf16.mxu1 %v5010_v58 }
 0x47c   : > { %3899 = vmatmul.mubr.msk.bf16.gmra.mrb[44].mxu1 %vm384_vm0, %v2973_v49 }
 0x47d   : > { %3492 = vmatprep.mubr.bf16.mxu1 %v5010_v58 }
 0x47f   : > { %v7239_v55 = vpop.f32.mrb[76].mxu0 }
 0x480   : > { %v7241_v63 = vpop.f32.mrb[77].mxu0 }
 0x481   : > { %v7245_v38 = vpop.f32.mrb[78].mxu0 }
 0x482   : > { %v7247_v50 = vpop.f32.mrb[79].mxu0 }
 0x484   : > { %3900 = vmatmul.mubr.msk.bf16.gmra.mrb[48].mxu1 %vm384_vm0, %v2974_v30 }
 0x485   : > { %3502 = vmatprep.mubr.bf16.mxu1 %v5010_v58 }
 0x487   : > { %v7251_v1 = vpop.f32.mrb[80].mxu0 }
 0x488   : > { %v7253_v51 = vpop.f32.mrb[81].mxu0 }
 0x489   : > { %v7257_v24 = vpop.f32.mrb[82].mxu0 }
 0x48a   : > { %v7259_v26 = vpop.f32.mrb[83].mxu0 }
 0x48c   : > { %3901 = vmatmul.mubr.msk.bf16.gmra.mrb[52].mxu1 %vm384_vm0, %v2975_v18 }
 0x48d   : > { %3512 = vmatprep.mubr.bf16.mxu1 %v5010_v58 }
 0x48f   : > { %v7263_v5 = vpop.f32.mrb[84].mxu0 }
 0x490   : > { %v7265_v28 = vpop.f32.mrb[85].mxu0 }
 0x491   : > { %v7269_v57 = vpop.f32.mrb[86].mxu0 }
 0x492   : > { %v7271_v16 = vpop.f32.mrb[87].mxu0 }
 0x494   : > { %3902 = vmatmul.mubr.msk.bf16.gmra.mrb[56].mxu1 %vm384_vm0, %v2976_v9 }
 0x497   : > { %v7274_v62 = vpop.f32.mrb[88].mxu0 }
 0x498   : > { %v7276_v36 = vpop.f32.mrb[89].mxu0 }
 0x499   : > { %v7278_v54 = vpop.f32.mrb[90].mxu0 }
 0x49a   : > { %v7280_v58 = vpop.f32.mrb[91].mxu0 }
 0x49f   : > { %v7282_v12 = vpop.f32.mrb[92].mxu0 }
 0x4a0   : > { %v7284_v29 = vpop.f32.mrb[93].mxu0 }
 0x4a1   : > { %v7286_v41 = vpop.f32.mrb[94].mxu0 }
 0x4a2   : > { %v7288_v60 = vpop.f32.mrb[95].mxu0 }
 0x4a7   : > { %v7290_v35 = vpop.f32.mrb[96].mxu0 }
 0x4a8   : > { %v7292_v15 = vpop.f32.mrb[97].mxu0 }
 0x4a9   : > { %v7294_v59 = vpop.f32.mrb[98].mxu0 }
 0x4aa   : > { %v7296_v22 = vpop.f32.mrb[99].mxu0 }
 0x4af   : > { %v7298_v61 = vpop.f32.mrb[100].mxu0 }
 0x4b0   : > { %v7300_v27 = vpop.f32.mrb[101].mxu0 }
 0x4b1   : > { %v7302_v2 = vpop.f32.mrb[102].mxu0 }
 0x4b2   : > { %v7304_v20 = vpop.f32.mrb[103].mxu0 }
 0x4b7   : > { %v7306_v37 = vpop.f32.mrb[104].mxu0 }
 0x4b8   : > { %v7308_v14 = vpop.f32.mrb[105].mxu0 }
 0x4b9   : > { %v7310_v56 = vpop.f32.mrb[106].mxu0 }
 0x4ba   : > { %v7312_v43 = vpop.f32.mrb[107].mxu0 }
 0x4ef   : > { %v3364_v4 = vpop.f32.mrb[60].mxu1 }
 0x4f0   : > { %v3365_v42 = vadd.f32 %v3364_v4, %v7201_v32  ;;  %v3366_v7 = vpop.f32.mrb[61].mxu1 }
 0x4f1   : > { %v3367_v39 = vadd.f32 %v3366_v7, %v7203_v23  ;;  %v3368_v40 = vpop.f32.mrb[62].mxu1 }
 0x4f2   : > { %v3535_v33 = vadd.f32 %v7319_v31, %v3365_v42  ;;  %v3369_v21 = vadd.f32 %v3368_v40, %v7206_v10  ;;  %v3370_v34 = vpop.f32.mrb[63].mxu1 }
 0x4f3   : > { %v3536_v49 = vadd.f32 %v7321_v46, %v3367_v39  ;;  %v3371_v52 = vadd.f32 %v3370_v34, %v7209_v25 }
 0x4f4   : > { %v3599_v11 = vmax.f32 %v3535_v33, 0.0  ;;  %v3537_v30 = vadd.f32 %v7319_v31, %v3369_v21 }
 0x4f5   : > { %v3600_v13 = vmax.f32 %v3536_v49, 0.0  ;;  %v3538_v47 = vadd.f32 %v7321_v46, %v3371_v52 }
 0x4f6   : > { %3663 = vst [vmem:[%s7332_s17] sm:$0xff] %v3599_v11  ;;  %v3601_v32 = vmax.f32 %v3537_v30, 0.0 }
 0x4f7   : > { %3664 = vst [vmem:[%s7332_s17 + $0x8] sm:$0xff] %v3600_v13  ;;  %v3602_v23 = vmax.f32 %v3538_v47, 0.0  ;;  %v3374_v10 = vpop.f32.mrb[64].mxu1 }
 0x4f8   : > { %3665 = vst [vmem:[%s7332_s17 + $0x10] sm:$0xff] %v3601_v32  ;;  %v3375_v25 = vadd.f32 %v3374_v10, %v7213_v53  ;;  %v3376_v18 = vpop.f32.mrb[65].mxu1 }
 0x4f9   : > { %3666 = vst [vmem:[%s7332_s17 + $0x18] sm:$0xff] %v3602_v23  ;;  %v3377_v0 = vadd.f32 %v3376_v18, %v7215_v45  ;;  %v3378_v44 = vpop.f32.mrb[66].mxu1 }
 0x4fa   : > { %v3539_v9 = vadd.f32 %v7319_v31, %v3375_v25  ;;  %v3379_v3 = vadd.f32 %v3378_v44, %v7218_v17  ;;  %v3380_v19 = vpop.f32.mrb[67].mxu1 }
 0x4fb   : > { %v3540_v6 = vadd.f32 %v7321_v46, %v3377_v0  ;;  %v3381_v48 = vadd.f32 %v3380_v19, %v7221_v8 }
 0x4fc   : > { %v3603_v4 = vmax.f32 %v3539_v9, 0.0  ;;  %v3541_v53 = vadd.f32 %v7319_v31, %v3379_v3 }
 0x4fd   : > { %v3604_v42 = vmax.f32 %v3540_v6, 0.0  ;;  %v3542_v7 = vadd.f32 %v7321_v46, %v3381_v48 }
 0x4fe   : > { %3667 = vst [vmem:[%s7332_s17 + $0x20] sm:$0xff] %v3603_v4  ;;  %v3605_v45 = vmax.f32 %v3541_v53, 0.0 }
 0x4ff   : > { %3668 = vst [vmem:[%s7332_s17 + $0x28] sm:$0xff] %v3604_v42  ;;  %v3606_v39 = vmax.f32 %v3542_v7, 0.0  ;;  %v3384_v40 = vpop.f32.mrb[68].mxu1 }
 0x500   : > { %3669 = vst [vmem:[%s7332_s17 + $0x30] sm:$0xff] %v3605_v45  ;;  %v3385_v17 = vadd.f32 %v3384_v40, %v7239_v55  ;;  %v3386_v33 = vpop.f32.mrb[69].mxu1 }
 0x501   : > { %3670 = vst [vmem:[%s7332_s17 + $0x38] sm:$0xff] %v3606_v39  ;;  %v3387_v8 = vadd.f32 %v3386_v33, %v7241_v63  ;;  %v3388_v21 = vpop.f32.mrb[70].mxu1 }
 0x502   : > { %v3543_v34 = vadd.f32 %v7319_v31, %v3385_v17  ;;  %v3389_v49 = vadd.f32 %v3388_v21, %v7245_v38  ;;  %v3390_v52 = vpop.f32.mrb[71].mxu1 }
 0x503   : > { %v3544_v11 = vadd.f32 %v7321_v46, %v3387_v8  ;;  %v3391_v30 = vadd.f32 %v3390_v52, %v7247_v50 }
 0x504   : > { %v3607_v13 = vmax.f32 %v3543_v34, 0.0  ;;  %v3545_v55 = vadd.f32 %v7319_v31, %v3389_v49 }
 0x505   : > { %v3608_v47 = vmax.f32 %v3544_v11, 0.0  ;;  %v3546_v32 = vadd.f32 %v7321_v46, %v3391_v30 }
 0x506   : > { %3671 = vst [vmem:[%s7332_s17 + $0x40] sm:$0xff] %v3607_v13  ;;  %v3609_v63 = vmax.f32 %v3545_v55, 0.0 }
 0x507   : > { %3672 = vst [vmem:[%s7332_s17 + $0x48] sm:$0xff] %v3608_v47  ;;  %v3610_v23 = vmax.f32 %v3546_v32, 0.0  ;;  %v3394_v10 = vpop.f32.mrb[72].mxu1 }
 0x508   : > { %3673 = vst [vmem:[%s7332_s17 + $0x50] sm:$0xff] %v3609_v63  ;;  %v3395_v38 = vadd.f32 %v3394_v10, %v7251_v1  ;;  %v3396_v25 = vpop.f32.mrb[73].mxu1 }
 0x509   : > { %3674 = vst [vmem:[%s7332_s17 + $0x58] sm:$0xff] %v3610_v23  ;;  %v3397_v50 = vadd.f32 %v3396_v25, %v7253_v51  ;;  %v3398_v18 = vpop.f32.mrb[74].mxu1 }
 0x50a   : > { %v3547_v0 = vadd.f32 %v7319_v31, %v3395_v38  ;;  %v3399_v44 = vadd.f32 %v3398_v18, %v7257_v24  ;;  %v3400_v9 = vpop.f32.mrb[75].mxu1 }
 0x50b   : > { %v3548_v3 = vadd.f32 %v7321_v46, %v3397_v50  ;;  %v3401_v19 = vadd.f32 %v3400_v9, %v7259_v26 }
 0x50c   : > { %v3611_v6 = vmax.f32 %v3547_v0, 0.0  ;;  %v3549_v1 = vadd.f32 %v7319_v31, %v3399_v44 }
 0x50d   : > { %v3612_v48 = vmax.f32 %v3548_v3, 0.0  ;;  %v3550_v4 = vadd.f32 %v7321_v46, %v3401_v19 }
 0x50e   : > { %3675 = vst [vmem:[%s7332_s17 + $0x60] sm:$0xff] %v3611_v6  ;;  %v3613_v51 = vmax.f32 %v3549_v1, 0.0 }
 0x50f   : > { %3676 = vst [vmem:[%s7332_s17 + $0x68] sm:$0xff] %v3612_v48  ;;  %v3614_v53 = vmax.f32 %v3550_v4, 0.0  ;;  %v3404_v42 = vpop.f32.mrb[76].mxu1 }
 0x510   : > { %3677 = vst [vmem:[%s7332_s17 + $0x70] sm:$0xff] %v3613_v51  ;;  %v3405_v24 = vadd.f32 %v3404_v42, %v7263_v5  ;;  %v3406_v7 = vpop.f32.mrb[77].mxu1 }
 0x511   : > { %3678 = vst [vmem:[%s7332_s17 + $0x78] sm:$0xff] %v3614_v53  ;;  %v3407_v26 = vadd.f32 %v3406_v7, %v7265_v28  ;;  %v3408_v45 = vpop.f32.mrb[78].mxu1 }
 0x512   : > { %v3551_v39 = vadd.f32 %v7319_v31, %v3405_v24  ;;  %v3409_v40 = vadd.f32 %v3408_v45, %v7269_v57  ;;  %v3410_v17 = vpop.f32.mrb[79].mxu1 }
 0x513   : > { %v3552_v33 = vadd.f32 %v7321_v46, %v3407_v26  ;;  %v3411_v8 = vadd.f32 %v3410_v17, %v7271_v16 }
 0x514   : > { %v3615_v21 = vmax.f32 %v3551_v39, 0.0  ;;  %v3553_v5 = vadd.f32 %v7319_v31, %v3409_v40 }
 0x515   : > { %v3616_v34 = vmax.f32 %v3552_v33, 0.0  ;;  %v3554_v49 = vadd.f32 %v7321_v46, %v3411_v8 }
 0x516   : > { %3679 = vst [vmem:[%s7332_s17 + $0x80] sm:$0xff] %v3615_v21  ;;  %v3617_v28 = vmax.f32 %v3553_v5, 0.0 }
 0x517   : > { %3680 = vst [vmem:[%s7332_s17 + $0x88] sm:$0xff] %v3616_v34  ;;  %v3618_v52 = vmax.f32 %v3554_v49, 0.0  ;;  %v3414_v11 = vpop.f32.mrb[80].mxu1 }
 0x518   : > { %3681 = vst [vmem:[%s7332_s17 + $0x90] sm:$0xff] %v3617_v28  ;;  %v3415_v57 = vadd.f32 %v3414_v11, %v7274_v62  ;;  %v3416_v30 = vpop.f32.mrb[81].mxu1 }
 0x519   : > { %3682 = vst [vmem:[%s7332_s17 + $0x98] sm:$0xff] %v3618_v52  ;;  %v3417_v16 = vadd.f32 %v3416_v30, %v7276_v36  ;;  %v3418_v13 = vpop.f32.mrb[82].mxu1 }
 0x51a   : > { %v3555_v55 = vadd.f32 %v7319_v31, %v3415_v57  ;;  %v3419_v47 = vadd.f32 %v3418_v13, %v7278_v54  ;;  %v3420_v32 = vpop.f32.mrb[83].mxu1 }
 0x51b   : > { %v3556_v63 = vadd.f32 %v7321_v46, %v3417_v16  ;;  %v3421_v23 = vadd.f32 %v3420_v32, %v7280_v58 }
 0x51c   : > { %v3619_v10 = vmax.f32 %v3555_v55, 0.0  ;;  %v3557_v62 = vadd.f32 %v7319_v31, %v3419_v47 }
 0x51d   : > { %v3620_v38 = vmax.f32 %v3556_v63, 0.0  ;;  %v3558_v25 = vadd.f32 %v7321_v46, %v3421_v23 }
 0x51e   : > { %3683 = vst [vmem:[%s7332_s17 + $0xa0] sm:$0xff] %v3619_v10  ;;  %v3621_v36 = vmax.f32 %v3557_v62, 0.0 }
 0x51f   : > { %3684 = vst [vmem:[%s7332_s17 + $0xa8] sm:$0xff] %v3620_v38  ;;  %v3622_v50 = vmax.f32 %v3558_v25, 0.0  ;;  %v3424_v18 = vpop.f32.mrb[84].mxu1 }
 0x520   : > { %3685 = vst [vmem:[%s7332_s17 + $0xb0] sm:$0xff] %v3621_v36  ;;  %v3425_v54 = vadd.f32 %v3424_v18, %v7282_v12  ;;  %v3426_v0 = vpop.f32.mrb[85].mxu1 }
 0x521   : > { %3686 = vst [vmem:[%s7332_s17 + $0xb8] sm:$0xff] %v3622_v50  ;;  %v3427_v58 = vadd.f32 %v3426_v0, %v7284_v29  ;;  %v3428_v44 = vpop.f32.mrb[86].mxu1 }
 0x522   : > { %v3559_v9 = vadd.f32 %v7319_v31, %v3425_v54  ;;  %v3429_v3 = vadd.f32 %v3428_v44, %v7286_v41  ;;  %v3430_v19 = vpop.f32.mrb[87].mxu1 }
 0x523   : > { %v3560_v6 = vadd.f32 %v7321_v46, %v3427_v58  ;;  %v3431_v1 = vadd.f32 %v3430_v19, %v7288_v60 }
 0x524   : > { %v3623_v48 = vmax.f32 %v3559_v9, 0.0  ;;  %v3561_v12 = vadd.f32 %v7319_v31, %v3429_v3 }
 0x525   : > { %v3624_v4 = vmax.f32 %v3560_v6, 0.0  ;;  %v3562_v51 = vadd.f32 %v7321_v46, %v3431_v1 }
 0x526   : > { %3687 = vst [vmem:[%s7332_s17 + $0xc0] sm:$0xff] %v3623_v48  ;;  %v3625_v29 = vmax.f32 %v3561_v12, 0.0 }
 0x527   : > { %3688 = vst [vmem:[%s7332_s17 + $0xc8] sm:$0xff] %v3624_v4  ;;  %v3626_v53 = vmax.f32 %v3562_v51, 0.0  ;;  %v3434_v42 = vpop.f32.mrb[88].mxu1 }
 0x528   : > { %3689 = vst [vmem:[%s7332_s17 + $0xd0] sm:$0xff] %v3625_v29  ;;  %v3435_v41 = vadd.f32 %v3434_v42, %v7290_v35  ;;  %v3436_v24 = vpop.f32.mrb[89].mxu1 }
 0x529   : > { %3690 = vst [vmem:[%s7332_s17 + $0xd8] sm:$0xff] %v3626_v53  ;;  %v3437_v60 = vadd.f32 %v3436_v24, %v7292_v15  ;;  %v3438_v7 = vpop.f32.mrb[90].mxu1 }
 0x52a   : > { %v3563_v26 = vadd.f32 %v7319_v31, %v3435_v41  ;;  %v3439_v45 = vadd.f32 %v3438_v7, %v7294_v59  ;;  %v3440_v39 = vpop.f32.mrb[91].mxu1 }
 0x52b   : > { %v3564_v40 = vadd.f32 %v7321_v46, %v3437_v60  ;;  %v3441_v17 = vadd.f32 %v3440_v39, %v7296_v22 }
 0x52c   : > { %v3627_v33 = vmax.f32 %v3563_v26, 0.0  ;;  %v3565_v35 = vadd.f32 %v7319_v31, %v3439_v45 }
 0x52d   : > { %v3628_v8 = vmax.f32 %v3564_v40, 0.0  ;;  %v3566_v21 = vadd.f32 %v7321_v46, %v3441_v17 }
 0x52e   : > { %3691 = vst [vmem:[%s7332_s17 + $0xe0] sm:$0xff] %v3627_v33  ;;  %v3629_v15 = vmax.f32 %v3565_v35, 0.0 }
 0x52f   : > { %3692 = vst [vmem:[%s7332_s17 + $0xe8] sm:$0xff] %v3628_v8  ;;  %v3630_v5 = vmax.f32 %v3566_v21, 0.0  ;;  %v3444_v34 = vpop.f32.mrb[92].mxu1 }
 0x530   : > { %3693 = vst [vmem:[%s7332_s17 + $0xf0] sm:$0xff] %v3629_v15  ;;  %v3445_v59 = vadd.f32 %v3444_v34, %v7298_v61  ;;  %v3446_v49 = vpop.f32.mrb[93].mxu1 }
 0x531   : > { %3694 = vst [vmem:[%s7332_s17 + $0xf8] sm:$0xff] %v3630_v5  ;;  %v3447_v22 = vadd.f32 %v3446_v49, %v7300_v27  ;;  %v3448_v28 = vpop.f32.mrb[94].mxu1 }
 0x532   : > { %v3567_v52 = vadd.f32 %v7319_v31, %v3445_v59  ;;  %v3449_v11 = vadd.f32 %v3448_v28, %v7302_v2  ;;  %v3450_v57 = vpop.f32.mrb[95].mxu1 }
 0x533   : > { %v3568_v30 = vadd.f32 %v7321_v46, %v3447_v22  ;;  %v3451_v16 = vadd.f32 %v3450_v57, %v7304_v20 }
 0x534   : > { %v3631_v13 = vmax.f32 %v3567_v52, 0.0  ;;  %v3569_v61 = vadd.f32 %v7319_v31, %v3449_v11 }
 0x535   : > { %v3632_v55 = vmax.f32 %v3568_v30, 0.0  ;;  %v3570_v47 = vadd.f32 %v7321_v46, %v3451_v16 }
 0x536   : > { %3695 = vst [vmem:[%s7332_s17 + $0x100] sm:$0xff] %v3631_v13  ;;  %v3633_v27 = vmax.f32 %v3569_v61, 0.0 }
 0x537   : > { %3696 = vst [vmem:[%s7332_s17 + $0x108] sm:$0xff] %v3632_v55  ;;  %v3634_v32 = vmax.f32 %v3570_v47, 0.0  ;;  %v3454_v63 = vpop.f32.mrb[96].mxu1 }
 0x538   : > { %3697 = vst [vmem:[%s7332_s17 + $0x110] sm:$0xff] %v3633_v27  ;;  %v3455_v2 = vadd.f32 %v3454_v63, %v7306_v37  ;;  %v3456_v23 = vpop.f32.mrb[97].mxu1 }
 0x539   : > { %3698 = vst [vmem:[%s7332_s17 + $0x118] sm:$0xff] %v3634_v32  ;;  %v3457_v20 = vadd.f32 %v3456_v23, %v7308_v14  ;;  %v3458_v10 = vpop.f32.mrb[98].mxu1 }
 0x53a   : > { %v3571_v62 = vadd.f32 %v7319_v31, %v3455_v2  ;;  %v3459_v38 = vadd.f32 %v3458_v10, %v7310_v56  ;;  %v3460_v25 = vpop.f32.mrb[99].mxu1 }
 0x53b   : > { %v3572_v36 = vadd.f32 %v7321_v46, %v3457_v20  ;;  %v3461_v50 = vadd.f32 %v3460_v25, %v7312_v43 }
 0x53c   : > { %v3635_v18 = vmax.f32 %v3571_v62, 0.0  ;;  %v3573_v37 = vadd.f32 %v7319_v31, %v3459_v38 }
 0x53d   : > { %v3636_v54 = vmax.f32 %v3572_v36, 0.0  ;;  %v3574_v0 = vadd.f32 %v7321_v46, %v3461_v50 }
 0x53e   : > { %3699 = vst [vmem:[%s7332_s17 + $0x120] sm:$0xff] %v3635_v18  ;;  %v3637_v14 = vmax.f32 %v3573_v37, 0.0 }
 0x53f   : > { %3700 = vst [vmem:[%s7332_s17 + $0x128] sm:$0xff] %v3636_v54  ;;  %v3638_v58 = vmax.f32 %v3574_v0, 0.0  ;;  %v3464_v44 = vpop.f32.mrb[36].mxu1 }
 0x540   : > { %3701 = vst [vmem:[%s7332_s17 + $0x130] sm:$0xff] %v3637_v14  ;;  %v3575_v56 = vadd.f32 %v7319_v31, %v3464_v44  ;;  %v3466_v9 = vpop.f32.mrb[37].mxu1 }
 0x541   : > { %3702 = vst [vmem:[%s7332_s17 + $0x138] sm:$0xff] %v3638_v58  ;;  %v3576_v43 = vadd.f32 %v7321_v46, %v3466_v9  ;;  %v3468_v3 = vpop.f32.mrb[38].mxu1 }
 0x542   : > { %v3639_v19 = vmax.f32 %v3575_v56, 0.0  ;;  %v3577_v6 = vadd.f32 %v7319_v31, %v3468_v3  ;;  %v3470_v1 = vpop.f32.mrb[39].mxu1 }
 0x543   : > { %v3640_v48 = vmax.f32 %v3576_v43, 0.0  ;;  %v3578_v12 = vadd.f32 %v7321_v46, %v3470_v1 }
 0x544   : > { %3703 = vst [vmem:[%s7332_s17 + $0x140] sm:$0xff] %v3639_v19  ;;  %v3641_v4 = vmax.f32 %v3577_v6, 0.0 }
 0x545   : > { %3704 = vst [vmem:[%s7332_s17 + $0x148] sm:$0xff] %v3640_v48  ;;  %v3642_v51 = vmax.f32 %v3578_v12, 0.0 }
 0x546   : > { %3705 = vst [vmem:[%s7332_s17 + $0x150] sm:$0xff] %v3641_v4 }
 0x547   : > { %3706 = vst [vmem:[%s7332_s17 + $0x158] sm:$0xff] %v3642_v51  ;;  %v3474_v29 = vpop.f32.mrb[40].mxu1 }
 0x548   : > { %v3579_v53 = vadd.f32 %v7319_v31, %v3474_v29  ;;  %v3476_v42 = vpop.f32.mrb[41].mxu1 }
 0x549   : > { %v3580_v41 = vadd.f32 %v7321_v46, %v3476_v42  ;;  %v3478_v24 = vpop.f32.mrb[42].mxu1 }
 0x54a   : > { %v3643_v60 = vmax.f32 %v3579_v53, 0.0  ;;  %v3581_v7 = vadd.f32 %v7319_v31, %v3478_v24  ;;  %v3480_v26 = vpop.f32.mrb[43].mxu1 }
 0x54b   : > { %v3644_v45 = vmax.f32 %v3580_v41, 0.0  ;;  %v3582_v39 = vadd.f32 %v7321_v46, %v3480_v26 }
 0x54c   : > { %3707 = vst [vmem:[%s7332_s17 + $0x160] sm:$0xff] %v3643_v60  ;;  %v3645_v40 = vmax.f32 %v3581_v7, 0.0 }
 0x54d   : > { %3708 = vst [vmem:[%s7332_s17 + $0x168] sm:$0xff] %v3644_v45  ;;  %v3646_v17 = vmax.f32 %v3582_v39, 0.0 }
 0x54e   : > { %3709 = vst [vmem:[%s7332_s17 + $0x170] sm:$0xff] %v3645_v40 }
 0x54f   : > { %3710 = vst [vmem:[%s7332_s17 + $0x178] sm:$0xff] %v3646_v17  ;;  %v3484_v33 = vpop.f32.mrb[44].mxu1 }
 0x550   : > { %v3583_v35 = vadd.f32 %v7319_v31, %v3484_v33  ;;  %v3486_v8 = vpop.f32.mrb[45].mxu1 }
 0x551   : > { %v3584_v21 = vadd.f32 %v7321_v46, %v3486_v8  ;;  %v3488_v15 = vpop.f32.mrb[46].mxu1 }
 0x552   : > { %v3647_v5 = vmax.f32 %v3583_v35, 0.0  ;;  %v3585_v34 = vadd.f32 %v7319_v31, %v3488_v15  ;;  %v3490_v59 = vpop.f32.mrb[47].mxu1 }
 0x553   : > { %v3648_v49 = vmax.f32 %v3584_v21, 0.0  ;;  %v3586_v22 = vadd.f32 %v7321_v46, %v3490_v59 }
 0x554   : > { %3711 = vst [vmem:[%s7332_s17 + $0x180] sm:$0xff] %v3647_v5  ;;  %v3649_v28 = vmax.f32 %v3585_v34, 0.0 }
 0x555   : > { %3712 = vst [vmem:[%s7332_s17 + $0x188] sm:$0xff] %v3648_v49  ;;  %v3650_v52 = vmax.f32 %v3586_v22, 0.0 }
 0x556   : > { %3713 = vst [vmem:[%s7332_s17 + $0x190] sm:$0xff] %v3649_v28 }
 0x557   : > { %3714 = vst [vmem:[%s7332_s17 + $0x198] sm:$0xff] %v3650_v52  ;;  %v3494_v11 = vpop.f32.mrb[48].mxu1 }
 0x558   : > { %v3587_v57 = vadd.f32 %v7319_v31, %v3494_v11  ;;  %v3496_v30 = vpop.f32.mrb[49].mxu1 }
 0x559   : > { %v3588_v16 = vadd.f32 %v7321_v46, %v3496_v30  ;;  %v3498_v13 = vpop.f32.mrb[50].mxu1 }
 0x55a   : > { %v3651_v61 = vmax.f32 %v3587_v57, 0.0  ;;  %v3589_v55 = vadd.f32 %v7319_v31, %v3498_v13  ;;  %v3500_v47 = vpop.f32.mrb[51].mxu1 }
 0x55b   : > { %v3652_v27 = vmax.f32 %v3588_v16, 0.0  ;;  %v3590_v32 = vadd.f32 %v7321_v46, %v3500_v47 }
 0x55c   : > { %3715 = vst [vmem:[%s7332_s17 + $0x1a0] sm:$0xff] %v3651_v61  ;;  %v3653_v63 = vmax.f32 %v3589_v55, 0.0 }
 0x55d   : > { %3716 = vst [vmem:[%s7332_s17 + $0x1a8] sm:$0xff] %v3652_v27  ;;  %v3654_v2 = vmax.f32 %v3590_v32, 0.0 }
 0x55e   : > { %3717 = vst [vmem:[%s7332_s17 + $0x1b0] sm:$0xff] %v3653_v63 }
 0x55f   : > { %3718 = vst [vmem:[%s7332_s17 + $0x1b8] sm:$0xff] %v3654_v2  ;;  %v3504_v23 = vpop.f32.mrb[52].mxu1 }
 0x560   : > { %v3591_v20 = vadd.f32 %v7319_v31, %v3504_v23  ;;  %v3506_v10 = vpop.f32.mrb[53].mxu1 }
 0x561   : > { %v3592_v62 = vadd.f32 %v7321_v46, %v3506_v10  ;;  %v3508_v38 = vpop.f32.mrb[54].mxu1 }
 0x562   : > { %v3655_v25 = vmax.f32 %v3591_v20, 0.0  ;;  %v3593_v36 = vadd.f32 %v7319_v31, %v3508_v38  ;;  %v3510_v50 = vpop.f32.mrb[55].mxu1 }
 0x563   : > { %v3656_v18 = vmax.f32 %v3592_v62, 0.0  ;;  %v3594_v37 = vadd.f32 %v7321_v46, %v3510_v50 }
 0x564   : > { %3719 = vst [vmem:[%s7332_s17 + $0x1c0] sm:$0xff] %v3655_v25  ;;  %v3657_v54 = vmax.f32 %v3593_v36, 0.0 }
 0x565   : > { %3720 = vst [vmem:[%s7332_s17 + $0x1c8] sm:$0xff] %v3656_v18  ;;  %v3658_v0 = vmax.f32 %v3594_v37, 0.0 }
 0x566   : > { %3721 = vst [vmem:[%s7332_s17 + $0x1d0] sm:$0xff] %v3657_v54 }
 0x567   : > { %3722 = vst [vmem:[%s7332_s17 + $0x1d8] sm:$0xff] %v3658_v0  ;;  %v3514_v14 = vpop.f32.mrb[56].mxu1 }
 0x568   : > { %v3595_v58 = vadd.f32 %v7319_v31, %v3514_v14  ;;  %v3516_v44 = vpop.f32.mrb[57].mxu1 }
 0x569   : > { %v3596_v56 = vadd.f32 %v7321_v46, %v3516_v44  ;;  %v3518_v9 = vpop.f32.mrb[58].mxu1 }
 0x56a   : > { %v3659_v43 = vmax.f32 %v3595_v58, 0.0  ;;  %v3597_v3 = vadd.f32 %v7319_v31, %v3518_v9  ;;  %v3520_v19 = vpop.f32.mrb[59].mxu1 }
 0x56b   : > { %v3660_v6 = vmax.f32 %v3596_v56, 0.0  ;;  %v3598_v1 = vadd.f32 %v7321_v46, %v3520_v19 }
 0x56c   : > { %3723 = vst [vmem:[%s7332_s17 + $0x1e0] sm:$0xff] %v3659_v43  ;;  %v3661_v48 = vmax.f32 %v3597_v3, 0.0 }
 0x56d   : > { %3724 = vst [vmem:[%s7332_s17 + $0x1e8] sm:$0xff] %v3660_v6  ;;  %v3662_v12 = vmax.f32 %v3598_v1, 0.0 }
 0x56e   : > { %3725 = vst [vmem:[%s7332_s17 + $0x1f0] sm:$0xff] %v3661_v48 }
 0x56f   : > { %3726 = vst [vmem:[%s7332_s17 + $0x1f8] sm:$0xff] %v3662_v12 }
 0x570   : > { %4947 = shalt.err (!%p4944_p2)
}
 0x571   : > { %s4948_s14 = scalar_lea.hbm %s7496_s25, 8192  ;;  %s4952_s16 = scalar_lea.hbm %s7554_s9, 16384 }
 0x572   : > { %p4949_p4 = scmp.ne.s32.totalorder %s7496_s25, %s4948_s14  ;;  %p4953_p9 = scmp.lt.u32.totalorder %s7496_s25, %s7554_s9 }
 0x573   : > { %p4954_p1 = scmp.lt.u32.totalorder %s4952_s16, %s4948_s14  ;;  %p4956_p6 = scmp.lt.u32.totalorder %s4948_s14, %s7496_s25 }
 0x574   : > { %p4950_p5 = pnand %p4949_p4, %p7671_p11 }
 0x575   : > { %p4955_p3 = por %p4954_p1, %p4953_p9 }
 0x576   : > { %p4951_p7 = pneg %p4950_p5 }
 0x577   : > { %p4957_p12 = por %p4956_p6, %p4955_p3 }
 0x579   : > { %p4958_p13 = pnand %p4957_p12, %p4951_p7 }
 0x57b   : > { %4961 = shalt.err (!%p4958_p13)
}
 0x57c   : > { %s5012_s24 = smov 256   ;;  %s5013_s19 = smov 16  }
 0x57d   : > { %4276 = dma.vmem_to_hbm [thread:$0]  (%p7671_p11), %s7498_s23, 8192, %s7496_s25, %s3728_s13, %s5012_s24, %s5012_s24, %s5013_s19  }
 0x57e PF: > { %s3756_s28 = sand.u32 1, %s4988_s30   ;;  %p7672_p8 = scmp.ne.s32.totalorder %s7596_s22, 0 }
 0x57f   : > { %p7673_p10 = scmp.ge.s32.totalorder %s5000_s12, 2  ;;  %s3757_s14 = scalar_lea.sflag [#allocation7], %s3756_s28 }
 0x581   : > { %p4283_p0 = pnand %p7673_p10, %p7672_p8 }
 0x583   : > { %4983 = dma.done.wait (!%p4283_p0), %s3757_s14, 8192  }
 0x584   : > { %4985 = vsyncadd (!%p4283_p0), %s3757_s14, 4294959104  ;;  %p22_p2 = scmp.ge.s32.totalorder %s5089_s15, 4   ;;  %s7674_s30 = smov %s4992_s10 }
 0x585   : > { %s7675_s10 = smov %s4996_s11  ;;  %s7676_s11 = smov %s5101_s18 }
 0x586   : > { %s7677_s12 = smov %s5089_s15  ;;  %24 = sbr.rel (!%p22_p2) target bundleno = 5 (0x5), region = 103 }
 0x58d   :  { %3762 = vsyncpa [#allocation6], 1 }
 0x58e   :  { %3764 = vsyncpa [#allocation6 + $0x1], 1 }
 0x58f   :  { %3765 = vsyncpa [#allocation7], 1 }
 0x590   :  { %3767 = vsyncpa [#allocation7 + $0x1], 1 }

</bundles_post_ra>
